<compile_context>
chip_gen: v5e
topology: v5e:2x2
jax: 0.10.0
libtpu: 0.0.40
codegen_flags: <defaults>
</compile_context>

<pallas_src>
import functools

import jax
import jax.numpy as jnp
from jax import lax
from jax.experimental import pallas as pl
from jax.experimental.pallas import tpu as pltpu


def _round_up(x, m):
    return (x + m - 1) // m * m


def _vmem_limit_bytes():
    # Per-generation VMEM budget (review item): ~75% of physical, capped at 100 MiB.
    # v7x: ~48 MiB of 64 MiB/TC; v5e/v6e: ~96 MiB of 128 MiB.
    try:
        cap = int(pltpu.get_tpu_info().vmem_capacity_bytes)
    except Exception:
        cap = 64 * 1024 * 1024  # conservative fallback (v7x per-TC size)
    return int(min((cap * 3) // 4, 100 * 1024 * 1024))


def _fused_kernel(text_ref, starts_ref, ends_ref,
                  emb_ref, w1t_ref, b1_ref, w2t_ref, b2_ref, w3t_ref, b3_ref,
                  o_ref, *, bag_tile, t_pad, v_pad, compute_dtype):
    cdt = compute_dtype
    one = jnp.ones((), cdt)
    zero = jnp.zeros((), cdt)

    # ---- EmbeddingBag(mode="mean"), fully vectorized on the MXU/VPU -----------------------
    # Gather every token's row with one MXU matmul: onehot(T_pad, V_pad) @ emb(V_pad, D_pad).
    # An out-of-range id never matches the iota -> contributes a zero row (no OOB VMEM read).
    toks = text_ref[...]                                                   # (T_pad, 1) int32
    vocab_iota = lax.broadcasted_iota(jnp.int32, (t_pad, v_pad), 1)
    onehot = jnp.where(vocab_iota == toks, one, zero)                      # (T_pad, V_pad)
    gathered = jnp.dot(onehot, emb_ref[...],
                       preferred_element_type=jnp.float32)                 # (T_pad, D_pad) f32

    # Segment (bag) membership mask from iota-vs-offset compares; one matmul does all bag sums.
    starts = starts_ref[...]                                               # (bag_tile, 1) int32
    ends = ends_ref[...]                                                   # (bag_tile, 1) int32
    tok_iota = lax.broadcasted_iota(jnp.int32, (bag_tile, t_pad), 1)
    in_bag = (tok_iota >= starts) & (tok_iota < ends)
    seg_mask = jnp.where(in_bag, one, zero)                                # (bag_tile, T_pad)
    # gathered values are exact cdt values (one-hot of 1.0 x cdt row), so this cast is lossless.
    bag_sums = jnp.dot(seg_mask, gathered.astype(cdt),
                       preferred_element_type=jnp.float32)                 # (bag_tile, D_pad) f32

    # Mean: one vectorized reciprocal per tile.  Empty/padded bags have an all-zero mask -> 0.
    # (pl.reciprocal(..., approx=True) would move this onto the EUP at ~2^-12 relative error;
    #  kept exact here so the f32 path matches the reference bit-for-bit up to matmul order.)
    counts = jnp.maximum(ends - starts, 1).astype(jnp.float32)             # (bag_tile, 1)
    bags = bag_sums * pl.reciprocal(counts, approx=False)                  # (bag_tile, D_pad) f32

    # ---- fc1 -> fc2 -> fc3 on the MXU, f32 accumulation, biases added once per tile -------
    h1 = jnp.dot(bags.astype(cdt), w1t_ref[...],
                 preferred_element_type=jnp.float32) + b1_ref[...]
    h2 = jnp.dot(h1.astype(cdt), w2t_ref[...],
                 preferred_element_type=jnp.float32) + b2_ref[...]
    o_ref[...] = (jnp.dot(h2.astype(cdt), w3t_ref[...],
                          preferred_element_type=jnp.float32) + b3_ref[...]).astype(o_ref.dtype)


def prepare_params(params, compute_dtype=jnp.float32):
    """Pad to lane/sublane-aligned shapes, pre-transpose Linear weights, cast for the MXU."""
    emb_w, w1, b1, w2, b2, w3, b3 = (params["emb_w"], params["w1"], params["b1"],
                                     params["w2"], params["b2"], params["w3"], params["b3"])
    V, D = emb_w.shape
    F = w1.shape[0]
    C = w3.shape[0]
    V_pad = _round_up(V, 128)   # V is the lane dim of the one-hot / K of the gather matmul
    D_pad = _round_up(D, 128)
    F_pad = _round_up(F, 128)
    C_pad = _round_up(C, 128)

    def pad2(x, rows, cols):
        return jnp.pad(x, ((0, rows - x.shape[0]), (0, cols - x.shape[1])))

    return dict(
        emb_w=pad2(emb_w, V_pad, D_pad).astype(compute_dtype),
        w1t=pad2(w1.T, D_pad, F_pad).astype(compute_dtype),
        b1=jnp.pad(b1, (0, F_pad - F)).reshape(1, F_pad).astype(jnp.float32),
        w2t=pad2(w2.T, F_pad, F_pad).astype(compute_dtype),
        b2=jnp.pad(b2, (0, F_pad - F)).reshape(1, F_pad).astype(jnp.float32),
        w3t=pad2(w3.T, F_pad, C_pad).astype(compute_dtype),
        b3=jnp.pad(b3, (0, C_pad - C)).reshape(1, C_pad).astype(jnp.float32),
        dims=dict(V_pad=V_pad, D_pad=D_pad, F_pad=F_pad, C_pad=C_pad, C=C),
        compute_dtype=compute_dtype,
    )


def text_classification_forward(text, offsets, prep, *, bag_tile=128):
    dims = prep["dims"]
    V_pad, D_pad, F_pad, C_pad, C = (dims["V_pad"], dims["D_pad"], dims["F_pad"],
                                     dims["C_pad"], dims["C"])
    compute_dtype = prep["compute_dtype"]

    T = int(text.shape[0])
    B = int(offsets.shape[0])
    T_pad = _round_up(max(T, 1), 128)
    B_pad = _round_up(max(B, 1), bag_tile)
    n_tiles = B_pad // bag_tile

    # Lane/sublane-dense VMEM operands (no SMEM scalar prefetch of the token stream).
    text_col = jnp.pad(text.astype(jnp.int32), (0, T_pad - T),
                       constant_values=-1).reshape(T_pad, 1)   # -1 never matches the one-hot
    off = offsets.astype(jnp.int32)
    starts = jnp.pad(off, (0, B_pad - B), constant_values=T).reshape(B_pad, 1)
    ends = jnp.pad(jnp.concatenate([off[1:], jnp.array([T], jnp.int32)]),
                   (0, B_pad - B), constant_values=T).reshape(B_pad, 1)  # padded bags empty

    kernel = functools.partial(_fused_kernel, bag_tile=bag_tile, t_pad=T_pad, v_pad=V_pad,
                               compute_dtype=compute_dtype)

    def run(single_buffer_weights):
        def resident(shape):
            # Constant block index across all batch tiles -> stays VMEM-resident; Buffered(1)
            # drops the pointless second pipeline buffer for these operands.
            kw = {}
            if single_buffer_weights:
                kw["pipeline_mode"] = pl.Buffered(1)
            return pl.BlockSpec(shape, lambda bt: (0, 0), **kw)

        grid_spec = pltpu.PrefetchScalarGridSpec(
            num_scalar_prefetch=0,
            grid=(n_tiles,),
            in_specs=[
                resident((T_pad, 1)),                               # token ids (column layout)
                pl.BlockSpec((bag_tile, 1), lambda bt: (bt, 0)),    # bag starts
                pl.BlockSpec((bag_tile, 1), lambda bt: (bt, 0)),    # bag ends
                resident((V_pad, D_pad)),                           # embedding table
                resident((D_pad, F_pad)),                           # W1^T
                resident((1, F_pad)),                               # b1
                resident((F_pad, F_pad)),                           # W2^T
                resident((1, F_pad)),                               # b2
                resident((F_pad, C_pad)),                           # W3^T (lane-padded classes)
                resident((1, C_pad)),                               # b3
            ],
            out_specs=pl.BlockSpec((bag_tile, C_pad), lambda bt: (bt, 0)),
        )
        return pl.pallas_call(
            kernel,
            grid_spec=grid_spec,
            out_shape=jax.ShapeDtypeStruct((B_pad, C_pad), jnp.float32),
            compiler_params=pltpu.CompilerParams(
                dimension_semantics=("parallel",),          # batch tiles split across TCs (v7x)
                vmem_limit_bytes=_vmem_limit_bytes()),
        )(text_col, starts, ends, prep["emb_w"], prep["w1t"], prep["b1"],
          prep["w2t"], prep["b2"], prep["w3t"], prep["b3"])

    try:
        out_padded = run(True)
    except Exception:
        # pipeline_mode=pl.Buffered(1) not supported by this jax build: fall back to defaults.
        out_padded = run(False)

    return out_padded[:B, :C]


def init_params(key, vocab_size, embed_dim, fc_size, num_class):
    initrange = 0.5
    k0, k1, k2, k3 = jax.random.split(key, 4)
    return {
        "emb_w": jax.random.uniform(k0, (vocab_size, embed_dim), jnp.float32,
                                    minval=-initrange, maxval=initrange),
        "w1": jax.random.uniform(k1, (fc_size, embed_dim), jnp.float32,
                                 minval=-initrange, maxval=initrange),
        "b1": jnp.zeros((fc_size,), jnp.float32),
        "w2": jax.random.uniform(k2, (fc_size, fc_size), jnp.float32,
                                 minval=-initrange, maxval=initrange),
        "b2": jnp.zeros((fc_size,), jnp.float32),
        "w3": jax.random.uniform(k3, (num_class, fc_size), jnp.float32,
                                 minval=-initrange, maxval=initrange),
        "b3": jnp.zeros((num_class,), jnp.float32),
    }


def ref_forward(text, offsets, params, compute_dtype=jnp.float32):
    """Pure-JAX reference; emulates the kernel's quantization points (identity for f32)."""
    def q(x):
        return x.astype(compute_dtype).astype(jnp.float32)

    T = int(text.shape[0])
    emb = q(params["emb_w"])
    gathered = jnp.take(emb, text, axis=0)
    starts = [int(s) for s in offsets.tolist()]
    ends = [int(e) for e in offsets[1:].tolist()] + [T]
    bags = [gathered[s:e].mean(axis=0) if e > s else jnp.zeros((emb.shape[1],), jnp.float32)
            for s, e in zip(starts, ends)]
    x = jnp.stack(bags, axis=0)

    def lin(h, w, b):
        return q(h) @ q(w).T + b.astype(jnp.float32)

    h = lin(x, params["w1"], params["b1"])
    h = lin(h, params["w2"], params["b2"])
    return lin(h, params["w3"], params["b3"])


if __name__ == "__main__":
    vocab_size, embed_dim, fc_size, num_class = 100, 32, 32, 4
    B, T = 2, 8  # 2 bags over 8 total tokens

    key = jax.random.PRNGKey(0)
    pkey, tkey = jax.random.split(key)
    params = init_params(pkey, vocab_size, embed_dim, fc_size, num_class)

    text = jax.random.randint(tkey, (T,), 0, vocab_size, dtype=jnp.int32)
    offsets = jnp.array([0, 5], dtype=jnp.int32)  # bag0 = text[0:5], bag1 = text[5:8]

    # f32 path: tight check against the pure-JAX reference
    prep_f32 = prepare_params(params, compute_dtype=jnp.float32)
    out_f32 = jax.block_until_ready(text_classification_forward(text, offsets, prep_f32))
    ref_f32 = ref_forward(text, offsets, params, compute_dtype=jnp.float32)
    assert out_f32.shape == (B, num_class)
    err_f32 = float(jnp.max(jnp.abs(out_f32 - ref_f32)))
    assert jnp.allclose(out_f32, ref_f32, atol=1e-4, rtol=1e-4), f"f32 mismatch: {err_f32}"

    # bf16 weights/activations (v6e / v7x MXU path) with f32 accumulation: looser check
    prep_bf16 = prepare_params(params, compute_dtype=jnp.bfloat16)
    out_bf16 = jax.block_until_ready(text_classification_forward(text, offsets, prep_bf16))
    ref_bf16 = ref_forward(text, offsets, params, compute_dtype=jnp.bfloat16)
    err_bf16 = float(jnp.max(jnp.abs(out_bf16 - ref_bf16)))
    assert jnp.allclose(out_bf16, ref_bf16, atol=2e-2, rtol=2e-2), f"bf16 mismatch: {err_bf16}"

    print("KERNEL_OK")
</pallas_src>

<mosaic_0001>
module attributes {stable_mosaic.version = 11 : i64} {
  func.func @_fused_kernel(%arg0: i32, %arg1: memref<128x1xi32, #tpu.memory_space<vmem>>, %arg2: memref<128x1xi32, #tpu.memory_space<vmem>>, %arg3: memref<128x1xi32, #tpu.memory_space<vmem>>, %arg4: memref<128x128xf32, #tpu.memory_space<vmem>>, %arg5: memref<128x128xf32, #tpu.memory_space<vmem>>, %arg6: memref<1x128xf32, #tpu.memory_space<vmem>>, %arg7: memref<128x128xf32, #tpu.memory_space<vmem>>, %arg8: memref<1x128xf32, #tpu.memory_space<vmem>>, %arg9: memref<128x128xf32, #tpu.memory_space<vmem>>, %arg10: memref<1x128xf32, #tpu.memory_space<vmem>>, %arg11: memref<128x128xf32, #tpu.memory_space<vmem>>) attributes {dimension_semantics = [#tpu.dimension_semantics<parallel>], iteration_bounds = array<i64: 1>, scalar_prefetch = 0 : i64, scratch_operands = 0 : i64, tpu.core_type = #tpu.core_type<tc>, window_params = [{pipeline_mode = #tpu.pipeline_mode<synchronous>, transform_indices = @transform_0, window_bounds = array<i64: 128, 1>}, {transform_indices = @transform_1, window_bounds = array<i64: 128, 1>}, {transform_indices = @transform_2, window_bounds = array<i64: 128, 1>}, {pipeline_mode = #tpu.pipeline_mode<synchronous>, transform_indices = @transform_3, window_bounds = array<i64: 128, 128>}, {pipeline_mode = #tpu.pipeline_mode<synchronous>, transform_indices = @transform_4, window_bounds = array<i64: 128, 128>}, {pipeline_mode = #tpu.pipeline_mode<synchronous>, transform_indices = @transform_5, window_bounds = array<i64: 1, 128>}, {pipeline_mode = #tpu.pipeline_mode<synchronous>, transform_indices = @transform_6, window_bounds = array<i64: 128, 128>}, {pipeline_mode = #tpu.pipeline_mode<synchronous>, transform_indices = @transform_7, window_bounds = array<i64: 1, 128>}, {pipeline_mode = #tpu.pipeline_mode<synchronous>, transform_indices = @transform_8, window_bounds = array<i64: 128, 128>}, {pipeline_mode = #tpu.pipeline_mode<synchronous>, transform_indices = @transform_9, window_bounds = array<i64: 1, 128>}, {transform_indices = @transform_10, window_bounds = array<i64: 128, 128>}]} {
    %c0 = arith.constant 0 : index
    %c0_0 = arith.constant 0 : index
    %0 = vector.load %arg1[%c0, %c0_0] : memref<128x1xi32, #tpu.memory_space<vmem>>, vector<128x1xi32>
    %1 = tpu.iota {dimensions = array<i32: 1>} : vector<128x128xi32>
    %2 = vector.broadcast %0 : vector<128x1xi32> to vector<128x128xi32>
    %3 = arith.cmpi eq, %1, %2 : vector<128x128xi32>
    %cst = arith.constant 1.000000e+00 : f32
    %cst_1 = arith.constant 0.000000e+00 : f32
    %4 = vector.broadcast %cst : f32 to vector<128x128xf32>
    %5 = vector.broadcast %cst_1 : f32 to vector<128x128xf32>
    %6 = arith.select %3, %4, %5 : vector<128x128xi1>, vector<128x128xf32>
    %c0_2 = arith.constant 0 : index
    %c0_3 = arith.constant 0 : index
    %7 = vector.load %arg4[%c0_2, %c0_3] : memref<128x128xf32, #tpu.memory_space<vmem>>, vector<128x128xf32>
    %cst_4 = arith.constant dense<0.000000e+00> : vector<128x128xf32>
    %8 = tpu.matmul %6, %7, %cst_4 {dimension_numbers = #tpu.dot_dimension_numbers<[1], [0], [0], [1], [0, 0, 1, 1], [], []>} : vector<128x128xf32>, vector<128x128xf32>, vector<128x128xf32> -> vector<128x128xf32>
    %c0_5 = arith.constant 0 : index
    %c0_6 = arith.constant 0 : index
    %9 = vector.load %arg2[%c0_5, %c0_6] : memref<128x1xi32, #tpu.memory_space<vmem>>, vector<128x1xi32>
    %c0_7 = arith.constant 0 : index
    %c0_8 = arith.constant 0 : index
    %10 = vector.load %arg3[%c0_7, %c0_8] : memref<128x1xi32, #tpu.memory_space<vmem>>, vector<128x1xi32>
    %11 = tpu.iota {dimensions = array<i32: 1>} : vector<128x128xi32>
    %12 = vector.broadcast %9 : vector<128x1xi32> to vector<128x128xi32>
    %13 = arith.cmpi sge, %11, %12 : vector<128x128xi32>
    %14 = vector.broadcast %10 : vector<128x1xi32> to vector<128x128xi32>
    %15 = arith.cmpi slt, %11, %14 : vector<128x128xi32>
    %16 = arith.andi %13, %15 : vector<128x128xi1>
    %cst_9 = arith.constant 1.000000e+00 : f32
    %cst_10 = arith.constant 0.000000e+00 : f32
    %17 = vector.broadcast %cst_9 : f32 to vector<128x128xf32>
    %18 = vector.broadcast %cst_10 : f32 to vector<128x128xf32>
    %19 = arith.select %16, %17, %18 : vector<128x128xi1>, vector<128x128xf32>
    %cst_11 = arith.constant dense<0.000000e+00> : vector<128x128xf32>
    %20 = tpu.matmul %19, %8, %cst_11 {dimension_numbers = #tpu.dot_dimension_numbers<[1], [0], [0], [1], [0, 0, 1, 1], [], []>} : vector<128x128xf32>, vector<128x128xf32>, vector<128x128xf32> -> vector<128x128xf32>
    %21 = arith.subi %10, %9 : vector<128x1xi32>
    %c1_i32 = arith.constant 1 : i32
    %22 = vector.broadcast %c1_i32 : i32 to vector<128x1xi32>
    %23 = arith.maxsi %21, %22 : vector<128x1xi32>
    %24 = arith.sitofp %23 : vector<128x1xi32> to vector<128x1xf32>
    %25 = tpu.reciprocal %24 : vector<128x1xf32> -> vector<128x1xf32>
    %26 = vector.broadcast %25 : vector<128x1xf32> to vector<128x128xf32>
    %27 = arith.mulf %20, %26 : vector<128x128xf32>
    %c0_12 = arith.constant 0 : index
    %c0_13 = arith.constant 0 : index
    %28 = vector.load %arg5[%c0_12, %c0_13] : memref<128x128xf32, #tpu.memory_space<vmem>>, vector<128x128xf32>
    %cst_14 = arith.constant dense<0.000000e+00> : vector<128x128xf32>
    %29 = tpu.matmul %27, %28, %cst_14 {dimension_numbers = #tpu.dot_dimension_numbers<[1], [0], [0], [1], [0, 0, 1, 1], [], []>} : vector<128x128xf32>, vector<128x128xf32>, vector<128x128xf32> -> vector<128x128xf32>
    %c0_15 = arith.constant 0 : index
    %c0_16 = arith.constant 0 : index
    %30 = vector.load %arg6[%c0_15, %c0_16] : memref<1x128xf32, #tpu.memory_space<vmem>>, vector<1x128xf32>
    %31 = vector.broadcast %30 : vector<1x128xf32> to vector<128x128xf32>
    %32 = arith.addf %29, %31 : vector<128x128xf32>
    %c0_17 = arith.constant 0 : index
    %c0_18 = arith.constant 0 : index
    %33 = vector.load %arg7[%c0_17, %c0_18] : memref<128x128xf32, #tpu.memory_space<vmem>>, vector<128x128xf32>
    %cst_19 = arith.constant dense<0.000000e+00> : vector<128x128xf32>
    %34 = tpu.matmul %32, %33, %cst_19 {dimension_numbers = #tpu.dot_dimension_numbers<[1], [0], [0], [1], [0, 0, 1, 1], [], []>} : vector<128x128xf32>, vector<128x128xf32>, vector<128x128xf32> -> vector<128x128xf32>
    %c0_20 = arith.constant 0 : index
    %c0_21 = arith.constant 0 : index
    %35 = vector.load %arg8[%c0_20, %c0_21] : memref<1x128xf32, #tpu.memory_space<vmem>>, vector<1x128xf32>
    %36 = vector.broadcast %35 : vector<1x128xf32> to vector<128x128xf32>
    %37 = arith.addf %34, %36 : vector<128x128xf32>
    %c0_22 = arith.constant 0 : index
    %c0_23 = arith.constant 0 : index
    %38 = vector.load %arg9[%c0_22, %c0_23] : memref<128x128xf32, #tpu.memory_space<vmem>>, vector<128x128xf32>
    %cst_24 = arith.constant dense<0.000000e+00> : vector<128x128xf32>
    %39 = tpu.matmul %37, %38, %cst_24 {dimension_numbers = #tpu.dot_dimension_numbers<[1], [0], [0], [1], [0, 0, 1, 1], [], []>} : vector<128x128xf32>, vector<128x128xf32>, vector<128x128xf32> -> vector<128x128xf32>
    %c0_25 = arith.constant 0 : index
    %c0_26 = arith.constant 0 : index
    %40 = vector.load %arg10[%c0_25, %c0_26] : memref<1x128xf32, #tpu.memory_space<vmem>>, vector<1x128xf32>
    %41 = vector.broadcast %40 : vector<1x128xf32> to vector<128x128xf32>
    %42 = arith.addf %39, %41 : vector<128x128xf32>
    %c0_27 = arith.constant 0 : index
    %c0_28 = arith.constant 0 : index
    %43 = vector.load %arg11[%c0_27, %c0_28] : memref<128x128xf32, #tpu.memory_space<vmem>>, vector<128x128xf32>
    tpu.vector_store %arg11[%c0_27, %c0_28], %42 {strides = array<i32>} : memref<128x128xf32, #tpu.memory_space<vmem>>, vector<128x128xf32>,
    return
  }
  func.func @transform_0(%arg0: i32) -> (i32, i32) {
    %c0_i32 = arith.constant 0 : i32
    %c0_i32_0 = arith.constant 0 : i32
    %c0_i32_1 = arith.constant 0 : i32
    return %c0_i32, %c0_i32_0 : i32, i32
  }
  func.func @transform_1(%arg0: i32) -> (i32, i32) {
    %c0_i32 = arith.constant 0 : i32
    %c0_i32_0 = arith.constant 0 : i32
    return %arg0, %c0_i32 : i32, i32
  }
  func.func @transform_2(%arg0: i32) -> (i32, i32) {
    %c0_i32 = arith.constant 0 : i32
    %c0_i32_0 = arith.constant 0 : i32
    return %arg0, %c0_i32 : i32, i32
  }
  func.func @transform_3(%arg0: i32) -> (i32, i32) {
    %c0_i32 = arith.constant 0 : i32
    %c0_i32_0 = arith.constant 0 : i32
    %c0_i32_1 = arith.constant 0 : i32
    return %c0_i32, %c0_i32_0 : i32, i32
  }
  func.func @transform_4(%arg0: i32) -> (i32, i32) {
    %c0_i32 = arith.constant 0 : i32
    %c0_i32_0 = arith.constant 0 : i32
    %c0_i32_1 = arith.constant 0 : i32
    return %c0_i32, %c0_i32_0 : i32, i32
  }
  func.func @transform_5(%arg0: i32) -> (i32, i32) {
    %c0_i32 = arith.constant 0 : i32
    %c0_i32_0 = arith.constant 0 : i32
    %c0_i32_1 = arith.constant 0 : i32
    return %c0_i32, %c0_i32_0 : i32, i32
  }
  func.func @transform_6(%arg0: i32) -> (i32, i32) {
    %c0_i32 = arith.constant 0 : i32
    %c0_i32_0 = arith.constant 0 : i32
    %c0_i32_1 = arith.constant 0 : i32
    return %c0_i32, %c0_i32_0 : i32, i32
  }
  func.func @transform_7(%arg0: i32) -> (i32, i32) {
    %c0_i32 = arith.constant 0 : i32
    %c0_i32_0 = arith.constant 0 : i32
    %c0_i32_1 = arith.constant 0 : i32
    return %c0_i32, %c0_i32_0 : i32, i32
  }
  func.func @transform_8(%arg0: i32) -> (i32, i32) {
    %c0_i32 = arith.constant 0 : i32
    %c0_i32_0 = arith.constant 0 : i32
    %c0_i32_1 = arith.constant 0 : i32
    return %c0_i32, %c0_i32_0 : i32, i32
  }
  func.func @transform_9(%arg0: i32) -> (i32, i32) {
    %c0_i32 = arith.constant 0 : i32
    %c0_i32_0 = arith.constant 0 : i32
    %c0_i32_1 = arith.constant 0 : i32
    return %c0_i32, %c0_i32_0 : i32, i32
  }
  func.func @transform_10(%arg0: i32) -> (i32, i32) {
    %c0_i32 = arith.constant 0 : i32
    %c0_i32_0 = arith.constant 0 : i32
    return %arg0, %c0_i32 : i32, i32
  }
}

module attributes {stable_mosaic.version = 11 : i64} {
  func.func @_fused_kernel(%arg0: i32, %arg1: memref<128x1xi32, #tpu.memory_space<vmem>>, %arg2: memref<128x1xi32, #tpu.memory_space<vmem>>, %arg3: memref<128x1xi32, #tpu.memory_space<vmem>>, %arg4: memref<128x128xf32, #tpu.memory_space<vmem>>, %arg5: memref<128x128xf32, #tpu.memory_space<vmem>>, %arg6: memref<1x128xf32, #tpu.memory_space<vmem>>, %arg7: memref<128x128xf32, #tpu.memory_space<vmem>>, %arg8: memref<1x128xf32, #tpu.memory_space<vmem>>, %arg9: memref<128x128xf32, #tpu.memory_space<vmem>>, %arg10: memref<1x128xf32, #tpu.memory_space<vmem>>, %arg11: memref<128x128xf32, #tpu.memory_space<vmem>>) attributes {dimension_semantics = [#tpu.dimension_semantics<parallel>], iteration_bounds = array<i64: 1>, scalar_prefetch = 0 : i64, scratch_operands = 0 : i64, tpu.core_type = #tpu.core_type<tc>, window_params = [{pipeline_mode = #tpu.pipeline_mode<synchronous>, transform_indices = @transform_0, window_bounds = array<i64: 128, 1>}, {transform_indices = @transform_1, window_bounds = array<i64: 128, 1>}, {transform_indices = @transform_2, window_bounds = array<i64: 128, 1>}, {pipeline_mode = #tpu.pipeline_mode<synchronous>, transform_indices = @transform_3, window_bounds = array<i64: 128, 128>}, {pipeline_mode = #tpu.pipeline_mode<synchronous>, transform_indices = @transform_4, window_bounds = array<i64: 128, 128>}, {pipeline_mode = #tpu.pipeline_mode<synchronous>, transform_indices = @transform_5, window_bounds = array<i64: 1, 128>}, {pipeline_mode = #tpu.pipeline_mode<synchronous>, transform_indices = @transform_6, window_bounds = array<i64: 128, 128>}, {pipeline_mode = #tpu.pipeline_mode<synchronous>, transform_indices = @transform_7, window_bounds = array<i64: 1, 128>}, {pipeline_mode = #tpu.pipeline_mode<synchronous>, transform_indices = @transform_8, window_bounds = array<i64: 128, 128>}, {pipeline_mode = #tpu.pipeline_mode<synchronous>, transform_indices = @transform_9, window_bounds = array<i64: 1, 128>}, {transform_indices = @transform_10, window_bounds = array<i64: 128, 128>}]} {
    %c0 = arith.constant 0 : index
    %c0_0 = arith.constant 0 : index
    %0 = vector.load %arg1[%c0, %c0_0] : memref<128x1xi32, #tpu.memory_space<vmem>>, vector<128x1xi32>
    %1 = tpu.iota {dimensions = array<i32: 1>} : vector<128x128xi32>
    %2 = vector.broadcast %0 : vector<128x1xi32> to vector<128x128xi32>
    %3 = arith.cmpi eq, %1, %2 : vector<128x128xi32>
    %cst = arith.constant 1.000000e+00 : f32
    %cst_1 = arith.constant 0.000000e+00 : f32
    %4 = vector.broadcast %cst : f32 to vector<128x128xf32>
    %5 = vector.broadcast %cst_1 : f32 to vector<128x128xf32>
    %6 = arith.select %3, %4, %5 : vector<128x128xi1>, vector<128x128xf32>
    %c0_2 = arith.constant 0 : index
    %c0_3 = arith.constant 0 : index
    %7 = vector.load %arg4[%c0_2, %c0_3] : memref<128x128xf32, #tpu.memory_space<vmem>>, vector<128x128xf32>
    %cst_4 = arith.constant dense<0.000000e+00> : vector<128x128xf32>
    %8 = tpu.matmul %6, %7, %cst_4 {dimension_numbers = #tpu.dot_dimension_numbers<[1], [0], [0], [1], [0, 0, 1, 1], [], []>} : vector<128x128xf32>, vector<128x128xf32>, vector<128x128xf32> -> vector<128x128xf32>
    %c0_5 = arith.constant 0 : index
    %c0_6 = arith.constant 0 : index
    %9 = vector.load %arg2[%c0_5, %c0_6] : memref<128x1xi32, #tpu.memory_space<vmem>>, vector<128x1xi32>
    %c0_7 = arith.constant 0 : index
    %c0_8 = arith.constant 0 : index
    %10 = vector.load %arg3[%c0_7, %c0_8] : memref<128x1xi32, #tpu.memory_space<vmem>>, vector<128x1xi32>
    %11 = tpu.iota {dimensions = array<i32: 1>} : vector<128x128xi32>
    %12 = vector.broadcast %9 : vector<128x1xi32> to vector<128x128xi32>
    %13 = arith.cmpi sge, %11, %12 : vector<128x128xi32>
    %14 = vector.broadcast %10 : vector<128x1xi32> to vector<128x128xi32>
    %15 = arith.cmpi slt, %11, %14 : vector<128x128xi32>
    %16 = arith.andi %13, %15 : vector<128x128xi1>
    %cst_9 = arith.constant 1.000000e+00 : f32
    %cst_10 = arith.constant 0.000000e+00 : f32
    %17 = vector.broadcast %cst_9 : f32 to vector<128x128xf32>
    %18 = vector.broadcast %cst_10 : f32 to vector<128x128xf32>
    %19 = arith.select %16, %17, %18 : vector<128x128xi1>, vector<128x128xf32>
    %cst_11 = arith.constant dense<0.000000e+00> : vector<128x128xf32>
    %20 = tpu.matmul %19, %8, %cst_11 {dimension_numbers = #tpu.dot_dimension_numbers<[1], [0], [0], [1], [0, 0, 1, 1], [], []>} : vector<128x128xf32>, vector<128x128xf32>, vector<128x128xf32> -> vector<128x128xf32>
    %21 = arith.subi %10, %9 : vector<128x1xi32>
    %c1_i32 = arith.constant 1 : i32
    %22 = vector.broadcast %c1_i32 : i32 to vector<128x1xi32>
    %23 = arith.maxsi %21, %22 : vector<128x1xi32>
    %24 = arith.sitofp %23 : vector<128x1xi32> to vector<128x1xf32>
    %25 = tpu.reciprocal %24 : vector<128x1xf32> -> vector<128x1xf32>
    %26 = vector.broadcast %25 : vector<128x1xf32> to vector<128x128xf32>
    %27 = arith.mulf %20, %26 : vector<128x128xf32>
    %c0_12 = arith.constant 0 : index
    %c0_13 = arith.constant 0 : index
    %28 = vector.load %arg5[%c0_12, %c0_13] : memref<128x128xf32, #tpu.memory_space<vmem>>, vector<128x128xf32>
    %cst_14 = arith.constant dense<0.000000e+00> : vector<128x128xf32>
    %29 = tpu.matmul %27, %28, %cst_14 {dimension_numbers = #tpu.dot_dimension_numbers<[1], [0], [0], [1], [0, 0, 1, 1], [], []>} : vector<128x128xf32>, vector<128x128xf32>, vector<128x128xf32> -> vector<128x128xf32>
    %c0_15 = arith.constant 0 : index
    %c0_16 = arith.constant 0 : index
    %30 = vector.load %arg6[%c0_15, %c0_16] : memref<1x128xf32, #tpu.memory_space<vmem>>, vector<1x128xf32>
    %31 = vector.broadcast %30 : vector<1x128xf32> to vector<128x128xf32>
    %32 = arith.addf %29, %31 : vector<128x128xf32>
    %c0_17 = arith.constant 0 : index
    %c0_18 = arith.constant 0 : index
    %33 = vector.load %arg7[%c0_17, %c0_18] : memref<128x128xf32, #tpu.memory_space<vmem>>, vector<128x128xf32>
    %cst_19 = arith.constant dense<0.000000e+00> : vector<128x128xf32>
    %34 = tpu.matmul %32, %33, %cst_19 {dimension_numbers = #tpu.dot_dimension_numbers<[1], [0], [0], [1], [0, 0, 1, 1], [], []>} : vector<128x128xf32>, vector<128x128xf32>, vector<128x128xf32> -> vector<128x128xf32>
    %c0_20 = arith.constant 0 : index
    %c0_21 = arith.constant 0 : index
    %35 = vector.load %arg8[%c0_20, %c0_21] : memref<1x128xf32, #tpu.memory_space<vmem>>, vector<1x128xf32>
    %36 = vector.broadcast %35 : vector<1x128xf32> to vector<128x128xf32>
    %37 = arith.addf %34, %36 : vector<128x128xf32>
    %c0_22 = arith.constant 0 : index
    %c0_23 = arith.constant 0 : index
    %38 = vector.load %arg9[%c0_22, %c0_23] : memref<128x128xf32, #tpu.memory_space<vmem>>, vector<128x128xf32>
    %cst_24 = arith.constant dense<0.000000e+00> : vector<128x128xf32>
    %39 = tpu.matmul %37, %38, %cst_24 {dimension_numbers = #tpu.dot_dimension_numbers<[1], [0], [0], [1], [0, 0, 1, 1], [], []>} : vector<128x128xf32>, vector<128x128xf32>, vector<128x128xf32> -> vector<128x128xf32>
    %c0_25 = arith.constant 0 : index
    %c0_26 = arith.constant 0 : index
    %40 = vector.load %arg10[%c0_25, %c0_26] : memref<1x128xf32, #tpu.memory_space<vmem>>, vector<1x128xf32>
    %41 = vector.broadcast %40 : vector<1x128xf32> to vector<128x128xf32>
    %42 = arith.addf %39, %41 : vector<128x128xf32>
    %c0_27 = arith.constant 0 : index
    %c0_28 = arith.constant 0 : index
    %43 = vector.load %arg11[%c0_27, %c0_28] : memref<128x128xf32, #tpu.memory_space<vmem>>, vector<128x128xf32>
    tpu.vector_store %arg11[%c0_27, %c0_28], %42 {strides = array<i32>} : memref<128x128xf32, #tpu.memory_space<vmem>>, vector<128x128xf32>,
    return
  }
  func.func @transform_0(%arg0: i32) -> (i32, i32) {
    %c0_i32 = arith.constant 0 : i32
    %c0_i32_0 = arith.constant 0 : i32
    %c0_i32_1 = arith.constant 0 : i32
    return %c0_i32, %c0_i32_0 : i32, i32
  }
  func.func @transform_1(%arg0: i32) -> (i32, i32) {
    %c0_i32 = arith.constant 0 : i32
    %c0_i32_0 = arith.constant 0 : i32
    return %arg0, %c0_i32 : i32, i32
  }
  func.func @transform_2(%arg0: i32) -> (i32, i32) {
    %c0_i32 = arith.constant 0 : i32
    %c0_i32_0 = arith.constant 0 : i32
    return %arg0, %c0_i32 : i32, i32
  }
  func.func @transform_3(%arg0: i32) -> (i32, i32) {
    %c0_i32 = arith.constant 0 : i32
    %c0_i32_0 = arith.constant 0 : i32
    %c0_i32_1 = arith.constant 0 : i32
    return %c0_i32, %c0_i32_0 : i32, i32
  }
  func.func @transform_4(%arg0: i32) -> (i32, i32) {
    %c0_i32 = arith.constant 0 : i32
    %c0_i32_0 = arith.constant 0 : i32
    %c0_i32_1 = arith.constant 0 : i32
    return %c0_i32, %c0_i32_0 : i32, i32
  }
  func.func @transform_5(%arg0: i32) -> (i32, i32) {
    %c0_i32 = arith.constant 0 : i32
    %c0_i32_0 = arith.constant 0 : i32
    %c0_i32_1 = arith.constant 0 : i32
    return %c0_i32, %c0_i32_0 : i32, i32
  }
  func.func @transform_6(%arg0: i32) -> (i32, i32) {
    %c0_i32 = arith.constant 0 : i32
    %c0_i32_0 = arith.constant 0 : i32
    %c0_i32_1 = arith.constant 0 : i32
    return %c0_i32, %c0_i32_0 : i32, i32
  }
  func.func @transform_7(%arg0: i32) -> (i32, i32) {
    %c0_i32 = arith.constant 0 : i32
    %c0_i32_0 = arith.constant 0 : i32
    %c0_i32_1 = arith.constant 0 : i32
    return %c0_i32, %c0_i32_0 : i32, i32
  }
  func.func @transform_8(%arg0: i32) -> (i32, i32) {
    %c0_i32 = arith.constant 0 : i32
    %c0_i32_0 = arith.constant 0 : i32
    %c0_i32_1 = arith.constant 0 : i32
    return %c0_i32, %c0_i32_0 : i32, i32
  }
  func.func @transform_9(%arg0: i32) -> (i32, i32) {
    %c0_i32 = arith.constant 0 : i32
    %c0_i32_0 = arith.constant 0 : i32
    %c0_i32_1 = arith.constant 0 : i32
    return %c0_i32, %c0_i32_0 : i32, i32
  }
  func.func @transform_10(%arg0: i32) -> (i32, i32) {
    %c0_i32 = arith.constant 0 : i32
    %c0_i32_0 = arith.constant 0 : i32
    return %arg0, %c0_i32 : i32, i32
  }
}

</mosaic_0001>

<bundles_post_ra>
// kernel: tpu_custom_call.1
= control target key start
LH: loop header
LB: loop body
LE: loop exit
PB: predicated region body
PF: predicated region fallthrough
CT: control target
= control target key end

     0   :  { %15 = vsyncpa [#allocation3], 0  ;;  %s2293_s0 = inlined_call_operand.vmem [shape: s32[128,1], index: 0, kind: input, shape index: {}]   ;;  %s2294_s1 = inlined_call_operand.vmem [shape: s32[128,1], index: 1, kind: input, shape index: {}]   ;;  %s2295_s2 = inlined_call_operand.vmem [shape: s32[128,1], index: 2, kind: input, shape index: {}]   ;;  %s2296_s3 = inlined_call_operand.vmem [shape: f32[128,128], index: 3, kind: input, shape index: {}]   ;;  %s2297_s4 = inlined_call_operand.vmem [shape: f32[128,128], index: 4, kind: input, shape index: {}]   ;;  %s2298_s5 = inlined_call_operand.vmem [shape: f32[1,128], index: 5, kind: input, shape index: {}]   ;;  %s2299_s6 = inlined_call_operand.vmem [shape: f32[128,128], index: 6, kind: input, shape index: {}]   ;;  %s2300_s7 = inlined_call_operand.vmem [shape: f32[1,128], index: 7, kind: input, shape index: {}]   ;;  %s2301_s8 = inlined_call_operand.hbm [shape: f32[128,128], index: 8, kind: input, shape index: {}]   ;;  %s2302_s9 = inlined_call_operand.vmem [shape: f32[1,128], index: 9, kind: input, shape index: {}]   ;;  %s2303_s10 = inlined_call_operand.hbm [shape: f32[128,128], index: 10, kind: output, shape index: {}]  }
   0x1   :  { %16 = vsyncpa [#allocation4], 0  ;;  %s37_s15 = sshll.u32 %s2301_s8, 4  ;;  %s1338_s16 = smov [#allocation2]   ;;  %s38_s15 = int_to_ptr.hbm [resolvable:$true] %s37_s15 }
   0x2   :  { %s39_s17 = sshll.u32 %s1338_s16, 4  ;;  %s1339_s18 = smov 128   ;;  %s40_s17 = int_to_ptr.vmem [resolvable:$true] %s39_s17 }
   0x3   :  { %s1340_s19 = smov 8  }
   0x4   :  { %45 = dma.hbm_to_vmem [thread:$0]  %s38_s15, 2048, %s40_s17, [#allocation3], %s1339_s18, %s1339_s18, %s1340_s19  }
   0x5   :  { %1334 = dma.done.wait [#allocation3], 2048  }
   0x6   :  { %1335 = vsyncadd [#allocation3], 4294965248  ;;  %v1341_v0 = vmov 0   ;;  %v66_v1 = vld [vmem:[%s2293_s0 + $0x70] sm:$0xff]  ;;  %v65_v2 = vld [vmem:[%s2293_s0 + $0x68] sm:$0xff]  ;;  %s1149_s25 = sshll.u32 %s2303_s10, 4  ;;  %s1150_s25 = int_to_ptr.hbm [resolvable:$true] %s1149_s25 }
   0x7   :  { %1250 = vset.pattern.permute.xlu2 %v1341_v0  ;;  %1249 = vset.pattern.permute.xlu1 %v1341_v0  ;;  %v64_v3 = vld [vmem:[%s2293_s0 + $0x60] sm:$0xff]  ;;  %v61_v4 = vld [vmem:[%s2293_s0 + $0x48] sm:$0xff]  ;;  %v67_v10 = vld [vmem:[%s2293_s0 + $0x78] sm:$0xff] }
   0x8   :  { %1248 = vset.pattern.permute.xlu0 %v1341_v0  ;;  %113 = vperm.xlu2 %1250, %v66_v1   ;;  %v56_v5 = vld [vmem:[%s2293_s0 + $0x20] sm:$0xff]  ;;  %v62_v12 = vld [vmem:[%s2293_s0 + $0x50] sm:$0xff]  ;;  %v63_v13 = vld [vmem:[%s2293_s0 + $0x58] sm:$0xff] }
   0x9   :  { %110 = vperm.xlu1 %1249, %v65_v2   ;;  %107 = vperm.xlu0 %1248, %v64_v3   ;;  %v60_v6 = vld [vmem:[%s2293_s0 + $0x40] sm:$0xff]  ;;  %v53_v14 = vld [vmem:[%s2293_s0 + $0x8] sm:$0xff]  ;;  %v54_v16 = vld [vmem:[%s2293_s0 + $0x10] sm:$0xff] }
   0xa   :  { %v231_v7 = vld [vmem:[%s2294_s1] sm:$0xff]  ;;  %v57_v15 = vld [vmem:[%s2293_s0 + $0x28] sm:$0xff]  ;;  %v59_v17 = vld [vmem:[%s2293_s0 + $0x38] sm:$0xff] }
   0xb   :  { %v247_v8 = vld [vmem:[%s2295_s2] sm:$0xff]  ;;  %v58_v18 = vld [vmem:[%s2293_s0 + $0x30] sm:$0xff]  ;;  %v55_v19 = vld [vmem:[%s2293_s0 + $0x18] sm:$0xff] }
   0xc   :  { %v1429_v9 = vsub.s32 %v247_v8, %v231_v7  ;;  %v52_v11 = vld [vmem:[%s2293_s0] sm:$0xff]  ;;  %v1464_v20 = vld [vmem:[%s2295_s2 + $0x8] sm:$0xff]  ;;  %v1469_v21 = vld [vmem:[%s2294_s1 + $0x10] sm:$0xff] }
   0xd   :  { %v1474_v22 = vld [vmem:[%s2294_s1 + $0x8] sm:$0xff]  ;;  %v165_v23 = vld [vmem:[%s2296_s3 + $0x78] sm:$0xff]  ;;  %v164_v24 = vld [vmem:[%s2296_s3 + $0x70] sm:$0xff] }
   0xe   :  { %1196 = vmatpush.msra.mxu3 %v165_v23  ;;  %166 = vmatpush.msra.mxu0 %v165_v23  ;;  %v234_v25 = vld [vmem:[%s2294_s1 + $0x18] sm:$0xff]  ;;  %v249_v27 = vld [vmem:[%s2295_s2 + $0x10] sm:$0xff]  ;;  %v163_v28 = vld [vmem:[%s2296_s3 + $0x68] sm:$0xff]  ;;  %v489_v43 = vsub.s32 %v1464_v20, %v1474_v22  ;;  %vm504_vm0 = vcmp.gt.s32.totalorder %v1429_v9, 1 }
   0xf   :  { %1195 = vmatpush.msra.mxu2 %v165_v23  ;;  %1194 = vmatpush.msra.mxu1 %v165_v23  ;;  %v250_v26 = vld [vmem:[%s2295_s2 + $0x18] sm:$0xff]  ;;  %v162_v29 = vld [vmem:[%s2296_s3 + $0x60] sm:$0xff]  ;;  %v236_v32 = vld [vmem:[%s2294_s1 + $0x28] sm:$0xff]  ;;  %v490_v44 = vsub.s32 %v249_v27, %v1469_v21  ;;  %v505_v54 = vsel %vm504_vm0, %v1429_v9, 1 }
  0x10   :  { %83 = vperm.xlu2 %1250, %v56_v5   ;;  %1199 = vmatpush.msra.mxu3 %v164_v24  ;;  %v161_v30 = vld [vmem:[%s2296_s3 + $0x58] sm:$0xff]  ;;  %v251_v31 = vld [vmem:[%s2295_s2 + $0x20] sm:$0xff]  ;;  %v160_v34 = vld [vmem:[%s2296_s3 + $0x50] sm:$0xff]  ;;  %v491_v46 = vsub.s32 %v250_v26, %v234_v25  ;;  %vm506_vm1 = vcmp.gt.s32.totalorder %v489_v43, 1  ;;  %v1565_v59 = vcvt.s32.f32 %v505_v54 }
  0x11   :  { %98 = vperm.xlu1 %1249, %v61_v4   ;;  %95 = vperm.xlu0 %1248, %v60_v6   ;;  %v235_v33 = vld [vmem:[%s2294_s1 + $0x20] sm:$0xff]  ;;  %v159_v35 = vld [vmem:[%s2296_s3 + $0x48] sm:$0xff]  ;;  %v157_v37 = vld [vmem:[%s2296_s3 + $0x38] sm:$0xff]  ;;  %vm508_vm2 = vcmp.gt.s32.totalorder %v490_v44, 1  ;;  %v507_v55 = vsel %vm506_vm1, %v489_v43, 1 }
  0x12   :  { %167 = vmatpush.msra.mxu0 %v164_v24  ;;  %1198 = vmatpush.msra.mxu2 %v164_v24  ;;  %v158_v36 = vld [vmem:[%s2296_s3 + $0x40] sm:$0xff]  ;;  %v237_v38 = vld [vmem:[%s2294_s1 + $0x30] sm:$0xff]  ;;  %v252_v40 = vld [vmem:[%s2295_s2 + $0x28] sm:$0xff]  ;;  %v492_v48 = vsub.s32 %v251_v31, %v235_v33  ;;  %vm510_vm3 = vcmp.gt.s32.totalorder %v491_v46, 1  ;;  %v509_v58 = vsel %vm508_vm2, %v490_v44, 1  ;;  %v1570_v62 = vcvt.s32.f32 %v507_v55 }
  0x13   :  { %1197 = vmatpush.msra.mxu1 %v164_v24  ;;  %1202 = vmatpush.msra.mxu3 %v163_v28  ;;  %v253_v39 = vld [vmem:[%s2295_s2 + $0x30] sm:$0xff]  ;;  %v155_v42 = vld [vmem:[%s2296_s3 + $0x28] sm:$0xff]  ;;  %v154_v45 = vld [vmem:[%s2296_s3 + $0x20] sm:$0xff]  ;;  %v493_v51 = vsub.s32 %v252_v40, %v236_v32  ;;  %v511_v60 = vsel %vm510_vm3, %v491_v46, 1  ;;  %v1572_v0 = vcvt.s32.f32 %v509_v58  ;;  %1254 = vrcp.f32 %v1565_v59 }
  0x14   :  { %168 = vmatpush.msra.mxu0 %v163_v28  ;;  %1201 = vmatpush.msra.mxu2 %v163_v28  ;;  %v156_v41 = vld [vmem:[%s2296_s3 + $0x30] sm:$0xff]  ;;  %v153_v47 = vld [vmem:[%s2296_s3 + $0x18] sm:$0xff]  ;;  %v239_v50 = vld [vmem:[%s2294_s1 + $0x40] sm:$0xff]  ;;  %vm512_vm4 = vcmp.gt.s32.totalorder %v492_v48, 1  ;;  %v494_v56 = vsub.s32 %v253_v39, %v237_v38  ;;  %v1583_v5 = vcvt.s32.f32 %v511_v60  ;;  %1256 = vrcp.f32 %v1570_v62 }
  0x15   :  { %1200 = vmatpush.msra.mxu1 %v163_v28  ;;  %1205 = vmatpush.msra.mxu3 %v162_v29  ;;  %v254_v49 = vld [vmem:[%s2295_s2 + $0x38] sm:$0xff]  ;;  %v152_v53 = vld [vmem:[%s2296_s3 + $0x10] sm:$0xff]  ;;  %v151_v57 = vld [vmem:[%s2296_s3 + $0x8] sm:$0xff]  ;;  %vm514_vm5 = vcmp.gt.s32.totalorder %v493_v51, 1  ;;  %v513_v63 = vsel %vm512_vm4, %v492_v48, 1  ;;  %1258 = vrcp.f32 %v1572_v0  ;;  %v68_v24 = vlaneseq }
  0x16   :  { %169 = vmatpush.msra.mxu0 %v162_v29  ;;  %1204 = vmatpush.msra.mxu2 %v162_v29  ;;  %v238_v52 = vld [vmem:[%s2294_s1 + $0x38] sm:$0xff]  ;;  %v150_v61 = vld [vmem:[%s2296_s3] sm:$0xff]  ;;  %v515_v1 = vsel %vm514_vm5, %v493_v51, 1  ;;  %vm516_vm6 = vcmp.gt.s32.totalorder %v494_v56, 1  ;;  %v240_v3 = vld [vmem:[%s2294_s1 + $0x48] sm:$0xff]  ;;  %1260 = vrcp.f32 %v1583_v5  ;;  %v1342_v55 = vmov 1.0  }
  0x17   :  { %1203 = vmatpush.msra.mxu1 %v162_v29  ;;  %1208 = vmatpush.msra.mxu3 %v161_v30  ;;  %v255_v2 = vld [vmem:[%s2295_s2 + $0x40] sm:$0xff]  ;;  %v256_v4 = vld [vmem:[%s2295_s2 + $0x48] sm:$0xff]  ;;  %v495_v6 = vsub.s32 %v254_v49, %v238_v52  ;;  %v1665_v43 = vand.u32 127, %v68_v24  ;;  %v1676_v46 = vld [vmem:[%s2295_s2 + $0x78] sm:$0xff]  ;;  %vm557_vm1 = vweird.f32 %v1565_v59  ;;  %vm571_vm4 = vweird.f32 %v1570_v62 }
  0x18   :  { %71 = vperm.xlu2 %1250, %v52_v11   ;;  %170 = vmatpush.msra.mxu0 %v161_v30  ;;  %v497_v9 = vsub.s32 %v256_v4, %v240_v3  ;;  %v517_v11 = vsel %vm516_vm6, %v494_v56, 1  ;;  %vm585_vm6 = vweird.f32 %v1572_v0 }
  0x19   :  { %116 = vperm.xlu1 %1249, %v67_v10   ;;  %101 = vperm.xlu0 %1248, %v62_v12   ;;  %v1589_v10 = vcvt.s32.f32 %v515_v1  ;;  %v241_v12 = vld [vmem:[%s2294_s1 + $0x50] sm:$0xff]  ;;  %vm518_vm7 = vcmp.gt.s32.totalorder %v495_v6, 1 }
  0x1a   :  { %1207 = vmatpush.msra.mxu2 %v161_v30  ;;  %1206 = vmatpush.msra.mxu1 %v161_v30  ;;  %vm522_vm9 = vcmp.gt.s32.totalorder %v497_v9, 1 }
  0x1b   :  { %1211 = vmatpush.msra.mxu3 %v160_v34  ;;  %171 = vmatpush.msra.mxu0 %v160_v34  ;;  %v523_v29 = vsel %vm522_vm9, %v497_v9, 1 }
  0x1c   :  { %1210 = vmatpush.msra.mxu2 %v160_v34  ;;  %1209 = vmatpush.msra.mxu1 %v160_v34 }
  0x1d   :  { %1214 = vmatpush.msra.mxu3 %v159_v35  ;;  %172 = vmatpush.msra.mxu0 %v159_v35 }
  0x1e   :  { %1213 = vmatpush.msra.mxu2 %v159_v35  ;;  %1212 = vmatpush.msra.mxu1 %v159_v35 }
  0x1f   :  { %1217 = vmatpush.msra.mxu3 %v158_v36  ;;  %173 = vmatpush.msra.mxu0 %v158_v36 }
  0x20   :  { %74 = vperm.xlu2 %1250, %v53_v14   ;;  %1216 = vmatpush.msra.mxu2 %v158_v36 }
  0x21   :  { %104 = vperm.xlu1 %1249, %v63_v13   ;;  %86 = vperm.xlu0 %1248, %v57_v15   ;;  %v257_v13 = vld [vmem:[%s2295_s2 + $0x50] sm:$0xff]  ;;  %v242_v15 = vld [vmem:[%s2294_s1 + $0x58] sm:$0xff] }
  0x22   :  { %1220 = vmatpush.msra.mxu3 %v157_v37  ;;  %1215 = vmatpush.msra.mxu1 %v158_v36  ;;  %v498_v14 = vsub.s32 %v257_v13, %v241_v12 }
  0x23   :  { %174 = vmatpush.msra.mxu0 %v157_v37  ;;  %1219 = vmatpush.msra.mxu2 %v157_v37 }
  0x24   :  { %1223 = vmatpush.msra.mxu3 %v156_v41  ;;  %1218 = vmatpush.msra.mxu1 %v157_v37  ;;  %vm524_vm10 = vcmp.gt.s32.totalorder %v498_v14, 1 }
  0x25   :  { %175 = vmatpush.msra.mxu0 %v156_v41  ;;  %1222 = vmatpush.msra.mxu2 %v156_v41 }
  0x26   :  { %1226 = vmatpush.msra.mxu3 %v155_v42  ;;  %1221 = vmatpush.msra.mxu1 %v156_v41 }
  0x27   :  { %176 = vmatpush.msra.mxu0 %v155_v42  ;;  %1225 = vmatpush.msra.mxu2 %v155_v42 }
  0x28   :  { %92 = vperm.xlu2 %1250, %v59_v17   ;;  %1229 = vmatpush.msra.mxu3 %v154_v45 }
  0x29   :  { %77 = vperm.xlu1 %1249, %v54_v16   ;;  %89 = vperm.xlu0 %1248, %v58_v18   ;;  %v1605_v16 = vld [vmem:[%s2295_s2 + $0x58] sm:$0xff] }
  0x2a   :  { %1232 = vmatpush.msra.mxu3 %v153_v47  ;;  %1224 = vmatpush.msra.mxu1 %v155_v42  ;;  %v499_v18 = vsub.s32 %v1605_v16, %v242_v15  ;;  %v1663_v42 = vcvt.s32.f32 %v523_v29  ;;  %v575_v29 = vand.u32 2147483647, %v1570_v62 }
  0x2b   :  { %177 = vmatpush.msra.mxu0 %v154_v45  ;;  %1228 = vmatpush.msra.mxu2 %v154_v45 }
  0x2c   :  { %1235 = vmatpush.msra.mxu3 %v152_v53  ;;  %1227 = vmatpush.msra.mxu1 %v154_v45  ;;  %vm526_vm11 = vcmp.gt.s32.totalorder %v499_v18, 1  ;;  %v1671_v45 = vld [vmem:[%s2294_s1 + $0x78] sm:$0xff] }
  0x2d   :  { %178 = vmatpush.msra.mxu0 %v153_v47  ;;  %1231 = vmatpush.msra.mxu2 %v153_v47  ;;  %v527_v44 = vsel %vm526_vm11, %v499_v18, 1 }
  0x2e   :  { %1238 = vmatpush.msra.mxu3 %v151_v57  ;;  %1230 = vmatpush.msra.mxu1 %v153_v47 }
  0x2f   :  { %179 = vmatpush.msra.mxu0 %v152_v53  ;;  %1234 = vmatpush.msra.mxu2 %v152_v53 }
  0x30   :  { %328 = vperm.xlu2 %1250, %v247_v8   ;;  %1241 = vmatpush.msra.mxu3 %v150_v61  ;;  %v1586_v8 = vcvt.s32.f32 %v513_v63 }
  0x31   :  { %264 = vperm.xlu1 %1249, %v231_v7   ;;  %80 = vperm.xlu0 %1248, %v55_v19   ;;  %v496_v7 = vsub.s32 %v255_v2, %v239_v50  ;;  %v1612_v19 = vcvt.s32.f32 %v517_v11 }
  0x32   :  { %1233 = vmatpush.msra.mxu1 %v152_v53  ;;  %180 = vmatpush.msra.mxu0 %v151_v57  ;;  %1262 = vrcp.f32 %v1586_v8  ;;  %v1690_v53 = vcvt.s32.f32 %v527_v44 }
  0x33   :  { %vm520_vm8 = vcmp.gt.s32.totalorder %v496_v7, 1  ;;  %1237 = vmatpush.msra.mxu2 %v151_v57  ;;  %1264 = vrcp.f32 %v1589_v10 }
  0x34   :  { %1236 = vmatpush.msra.mxu1 %v151_v57  ;;  %181 = vmatpush.msra.mxu0 %v150_v61  ;;  %v521_v23 = vsel %vm520_vm8, %v496_v7, 1  ;;  %1266 = vrcp.f32 %v1612_v19  ;;  %v563_v7 = vand.u32 2147483648, %v1565_v59 }
  0x35   :  { %1240 = vmatpush.msra.mxu2 %v150_v61 }
  0x36   :  { %1239 = vmatpush.msra.mxu1 %v150_v61 }
  0x38   :  { %270 = vperm.xlu2 %1250, %v1469_v21   ;;  %v1618_v21 = vpop.eup %1254 }
  0x39   :  { %331 = vperm.xlu1 %1249, %v1464_v20   ;;  %267 = vperm.xlu0 %1248, %v1474_v22   ;;  %v243_v20 = vld [vmem:[%s2294_s1 + $0x60] sm:$0xff]  ;;  %v519_v22 = vsel %vm518_vm7, %v495_v6, 1  ;;  %v1633_v28 = vpop.eup %1256  ;;  %vm558_vm2 = vweird.f32 %v1618_v21 }
  0x3a   :  { %v1647_v34 = vpop.eup %1258  ;;  %v1654_v37 = vcvt.s32.f32 %v519_v22  ;;  %v567_v47 = vmul.f32 %v1633_v28, %v1570_v62  ;;  %vm572_vm5 = vweird.f32 %v1633_v28  ;;  %v561_v22 = vand.u32 2147483647, %v1565_v59  ;;  %vm1736_vm8 = vmor %vm557_vm1, %vm558_vm2 }
  0x3b   :  { %v1652_v36 = vpop.eup %1260  ;;  %v581_v51 = vmul.f32 %v1647_v34, %v1572_v0  ;;  %vm586_vm7 = vweird.f32 %v1647_v34  ;;  %vm1751_vm9 = vmor %vm571_vm4, %vm572_vm5  ;;  %vm613_vm4 = vweird.f32 %v1586_v8 }
  0x3c   :  { %v1661_v41 = vpop.eup %1262  ;;  %1268 = vrcp.f32 %v1654_v37  ;;  %v568_v60 = vsub.f32 1.0, %v567_v47  ;;  %vm1776_vm11 = vcmp.eq.f32.partialorder %v561_v22, 8.507059e+37  ;;  %vm600_vm1 = vweird.f32 %v1652_v36 }
  0x3d   :  { %v1680_v48 = vpop.eup %1264  ;;  %v582_v63 = vsub.f32 1.0, %v581_v51  ;;  %vm614_vm5 = vweird.f32 %v1661_v41 }
  0x3e   :  { %v1693_v56 = vpop.eup %1266  ;;  %v569_v9 = vmul.f32 %v1633_v28, %v568_v60 }
  0x40   :  { %337 = vperm.xlu2 %1250, %v250_v26   ;;  %v1626_v26 = vld [vmem:[%s2294_s1 + $0x68] sm:$0xff] }
  0x41   :  { %273 = vperm.xlu1 %1249, %v234_v25   ;;  %334 = vperm.xlu0 %1248, %v249_v27   ;;  %v259_v25 = vld [vmem:[%s2295_s2 + $0x60] sm:$0xff]  ;;  %v1631_v27 = vld [vmem:[%s2295_s2 + $0x68] sm:$0xff] }
  0x42   :  { %v500_v30 = vsub.s32 %v259_v25, %v243_v20  ;;  %v1709_v11 = vpop.eup %1268 }
  0x44   :  { %vm528_vm12 = vcmp.gt.s32.totalorder %v500_v30, 1 }
  0x45   :  { %v529_v57 = vsel %vm528_vm12, %v500_v30, 1  ;;  %v609_v30 = vmul.f32 %v1661_v41, %v1586_v8  ;;  %vm1784_vm12 = vcmp.eq.f32.partialorder %v575_v29, 8.507059e+37 }
  0x46   :  { %v1699_v1 = vcvt.s32.f32 %v529_v57 }
  0x48   :  { %279 = vperm.xlu2 %1250, %v236_v32   ;;  %v1640_v32 = vld [vmem:[%s2294_s1 + $0x70] sm:$0xff] }
  0x49   :  { %340 = vperm.xlu1 %1249, %v251_v31   ;;  %276 = vperm.xlu0 %1248, %v235_v33   ;;  %v501_v31 = vsub.s32 %v1631_v27, %v1626_v26  ;;  %v1645_v33 = vld [vmem:[%s2295_s2 + $0x70] sm:$0xff] }
  0x4a   :  { %v502_v35 = vsub.s32 %v1645_v33, %v1640_v32 }
  0x4b   :  { %vm530_vm13 = vcmp.gt.s32.totalorder %v501_v31, 1 }
  0x4c   :  { %vm532_vm15 = vcmp.gt.s32.totalorder %v502_v35, 1  ;;  %v531_v58 = vsel %vm530_vm13, %v501_v31, 1 }
  0x4d   :  { %v533_v61 = vsel %vm532_vm15, %v502_v35, 1 }
  0x50   :  { %346 = vperm.xlu2 %1250, %v253_v39   ;;  %v525_v39 = vsel %vm524_vm10, %v498_v14, 1  ;;  %v595_v14 = vmul.f32 %v1652_v36, %v1583_v5  ;;  %vm1764_vm10 = vmor %vm585_vm6, %vm586_vm7  ;;  %vm627_vm6 = vweird.f32 %v1589_v10  ;;  %vm628_vm7 = vweird.f32 %v1680_v48 }
  0x51   :  { %282 = vperm.xlu1 %1249, %v237_v38   ;;  %343 = vperm.xlu0 %1248, %v252_v40   ;;  %v1656_v38 = vcvt.s32.f32 %v521_v23  ;;  %v553_v40 = vmul.f32 %v1618_v21, %v1565_v59 }
  0x53   :  { %v554_v54 = vsub.f32 1.0, %v553_v40  ;;  %1270 = vrcp.f32 %v1656_v38  ;;  %v596_v40 = vsub.f32 1.0, %v595_v14 }
  0x54   :  { %1272 = vrcp.f32 %v1663_v42 }
  0x58   :  { %288 = vperm.xlu2 %1250, %v239_v50   ;;  %v503_v50 = vsub.s32 %v1676_v46, %v1671_v45 }
  0x59   :  { %349 = vperm.xlu1 %1249, %v254_v49   ;;  %285 = vperm.xlu0 %1248, %v238_v52   ;;  %v1686_v52 = vcvt.s32.f32 %v525_v39  ;;  %v591_v39 = vand.u32 2147483648, %v1572_v0 }
  0x5a   :  { %vm534_vm0 = vcmp.gt.s32.totalorder %v503_v50, 1 }
  0x5b   :  { %1274 = vrcp.f32 %v1686_v52  ;;  %v535_v6 = vsel %vm534_vm0, %v503_v50, 1  ;;  %vm599_vm0 = vweird.f32 %v1583_v5 }
  0x5c   :  { %1276 = vrcp.f32 %v1690_v53  ;;  %v1758_v44 = vcvt.s32.f32 %v535_v6  ;;  %vm1821_vm2 = vmor %vm599_vm0, %vm600_vm1 }
  0x5d   :  { %1278 = vrcp.f32 %v1699_v1 }
  0x60   :  { %355 = vperm.xlu2 %1250, %v256_v4   ;;  %v1705_v4 = vcvt.s32.f32 %v533_v61 }
  0x61   :  { %291 = vperm.xlu1 %1249, %v240_v3   ;;  %352 = vperm.xlu0 %1248, %v255_v2   ;;  %v1701_v2 = vcvt.s32.f32 %v531_v58  ;;  %v555_v3 = vmul.f32 %v1618_v21, %v554_v54  ;;  %v564_v54 = vor.u32 1.1754944e-38, %v563_v7  ;;  %v603_v7 = vand.u32 2147483647, %v1583_v5 }
  0x62   :  { %v1608_v17 = vpop.permute.xlu2 %113 }
  0x63   :  { %1280 = vrcp.f32 %v1701_v2 }
  0x64   :  { %1282 = vrcp.f32 %v1705_v4 }
  0x65   :  { %1284 = vrcp.f32 %v1758_v44 }
  0x68   :  { %297 = vperm.xlu2 %1250, %v242_v15   ;;  %v1716_v15 = vpop.eup %1270 }
  0x69   :  { %358 = vperm.xlu1 %1249, %v257_v13   ;;  %294 = vperm.xlu0 %1248, %v241_v12   ;;  %v583_v13 = vmul.f32 %v1647_v34, %v582_v63  ;;  %v1722_v18 = vpop.eup %1272  ;;  %v597_v63 = vmul.f32 %v1652_v36, %v596_v40  ;;  %v665_v40 = vmul.f32 %v1716_v15, %v1656_v38 }
  0x6a   :  { %v84_v49 = vpop.permute.xlu2 %83  ;;  %v1729_v23 = vpop.eup %1274 }
  0x6b   :  { %vm122_vm14 = vcmp.eq.s32.totalorder %v1665_v43, %v84_v49  ;;  %v1744_v31 = vpop.eup %1276  ;;  %v584_v35 = vadd.f32 %v1647_v34, %v583_v13  ;;  %v623_v49 = vmul.f32 %v1680_v48, %v1589_v10  ;;  %v598_v24 = vadd.f32 %v1652_v36, %v597_v63 }
  0x6c   :  { %1166 = vmatmul.msk.f32.vlgmr.msra.gmra.mxu1 %vm122_vm14, %v1342_v55 }
  0x6d   :  { %v588_v61 = vsel %vm1764_vm10, %v1647_v34, %v584_v35  ;;  %v617_v35 = vand.u32 2147483647, %v1586_v8  ;;  %vm641_vm10 = vweird.f32 %v1612_v19 }
  0x70   :  { %364 = vperm.xlu2 %1250, %v259_v25   ;;  %v570_v25 = vadd.f32 %v1633_v28, %v569_v9  ;;  %v624_v9 = vsub.f32 1.0, %v623_v49 }
  0x71   :  { %300 = vperm.xlu1 %1249, %v243_v20   ;;  %361 = vperm.xlu0 %1248, %v1605_v16   ;;  %v577_v16 = vand.u32 2147483648, %v1570_v62  ;;  %v556_v20 = vadd.f32 %v1618_v21, %v555_v3  ;;  %v589_v62 = vand.u32 2147483647, %v1572_v0  ;;  %v1797_v3 = vpop.eup %1278 }
  0x72   :  { %v72_v12 = vpop.permute.xlu2 %71  ;;  %v574_v0 = vsel %vm1751_vm9, %v1633_v28, %v570_v25  ;;  %v605_v28 = vand.u32 2147483648, %v1583_v5  ;;  %v651_v25 = vmul.f32 %v1709_v11, %v1654_v37  ;;  %v625_v59 = vmul.f32 %v1680_v48, %v624_v9  ;;  %vm1856_vm9 = vmor %vm613_vm4, %vm614_vm5 }
  0x73   :  { %vm118_vm3 = vcmp.eq.s32.totalorder %v1665_v43, %v72_v12  ;;  %v560_v50 = vsel %vm1736_vm8, %v1618_v21, %v556_v20  ;;  %v578_v57 = vor.u32 1.1754944e-38, %v577_v16  ;;  %v637_v21 = vmul.f32 %v1693_v56, %v1612_v19  ;;  %v1801_v12 = vpop.eup %1280 }
  0x74   :  { %1162 = vmatmul.msk.f32.vlgmr.msra.gmra.mxu0 %vm118_vm3, %v1342_v55  ;;  %vm590_vm14 = vcmp.eq.f32.partialorder %v589_v62, 8.507059e+37  ;;  %v1808_v34 = vpop.eup %1282  ;;  %v1813_v13 = vsel %vm1776_vm11, %v564_v54, %v560_v50  ;;  %v606_v5 = vor.u32 1.1754944e-38, %v605_v28  ;;  %vm1825_vm3 = vcmp.eq.f32.partialorder %v603_v7, 8.507059e+37 }
  0x75   :  { %v579_v14 = vsel %vm1784_vm12, %v578_v57, %v574_v0  ;;  %v638_v20 = vsub.f32 1.0, %v637_v21  ;;  %v631_v62 = vand.u32 2147483647, %v1589_v10  ;;  %v602_v50 = vsel %vm1821_vm2, %v1652_v36, %v598_v24 }
  0x76   :  { %v652_v51 = vsub.f32 1.0, %v651_v25  ;;  %v626_v0 = vadd.f32 %v1680_v48, %v625_v59  ;;  %vm642_vm11 = vweird.f32 %v1693_v56  ;;  %v647_v36 = vand.u32 2147483648, %v1612_v19 }
  0x77   :  { %vm132_vm12 = vcmp.eq.s32.totalorder %v1665_v43, %v1608_v17  ;;  %v666_v21 = vsub.f32 1.0, %v665_v40  ;;  %vm1885_vm0 = vcmp.eq.f32.partialorder %v631_v62, 8.507059e+37  ;;  %v607_v63 = vsel %vm1825_vm3, %v606_v5, %v602_v50  ;;  %vm1901_vm1 = vmor %vm641_vm10, %vm642_vm11 }
  0x78   :  { %306 = vperm.xlu2 %1250, %v1640_v32   ;;  %v610_v32 = vsub.f32 1.0, %v609_v30  ;;  %v693_v7 = vmul.f32 %v1729_v23, %v1686_v52  ;;  %vm655_vm3 = vweird.f32 %v1654_v37  ;;  %vm656_vm4 = vweird.f32 %v1709_v11 }
  0x79   :  { %367 = vperm.xlu1 %1249, %v1631_v27   ;;  %303 = vperm.xlu0 %1248, %v1626_v26   ;;  %v592_v26 = vor.u32 1.1754944e-38, %v591_v39  ;;  %v619_v39 = vand.u32 2147483648, %v1586_v8  ;;  %v667_v24 = vmul.f32 %v1716_v15, %v666_v21  ;;  %v661_v5 = vand.u32 2147483648, %v1654_v37 }
  0x7a   :  { %v75_v60 = vpop.permute.xlu2 %74  ;;  %v611_v16 = vmul.f32 %v1661_v41, %v610_v32  ;;  %v645_v32 = vand.u32 2147483647, %v1612_v19  ;;  %vm669_vm5 = vweird.f32 %v1656_v38  ;;  %v694_v29 = vsub.f32 1.0, %v693_v7 }
  0x7b   :  { %v1790_v58 = vpop.permute.xlu1 %110  ;;  %v108_v6 = vpop.permute.xlu0 %107  ;;  %vm119_vm13 = vcmp.eq.s32.totalorder %v1665_v43, %v75_v60  ;;  %v593_v22 = vsel %vm590_vm14, %v592_v26, %v588_v61  ;;  %vm1867_vm14 = vcmp.eq.f32.partialorder %v617_v35, 8.507059e+37  ;;  %v620_v60 = vor.u32 1.1754944e-38, %v619_v39 }
  0x7c   :  { %vm130_vm15 = vcmp.eq.s32.totalorder %v1665_v43, %v108_v6  ;;  %1163 = vmatmul.msk.f32.gmra.mxu0 %vm119_vm13, %v1342_v55  ;;  %v612_v47 = vadd.f32 %v1661_v41, %v611_v16  ;;  %vm131_vm8 = vcmp.eq.s32.totalorder %v1665_v43, %v1790_v58  ;;  %v679_v26 = vmul.f32 %v1722_v18, %v1663_v42 }
  0x7d   :  { %1174 = vmatmul.msk.f32.vlgmr.msra.gmra.mxu3 %vm130_vm15, %v1342_v55  ;;  %vm1875_vm15 = vmor %vm627_vm6, %vm628_vm7  ;;  %v653_v6 = vmul.f32 %v1709_v11, %v652_v51  ;;  %vm1912_vm2 = vcmp.eq.f32.partialorder %v645_v32, 8.507059e+37  ;;  %vm670_vm6 = vweird.f32 %v1716_v15  ;;  %v707_v30 = vmul.f32 %v1744_v31, %v1690_v53 }
  0x7e   :  { %v616_v28 = vsel %vm1856_vm9, %v1661_v41, %v612_v47  ;;  %v630_v9 = vsel %vm1875_vm15, %v1680_v48, %v626_v0  ;;  %v659_v41 = vand.u32 2147483647, %v1654_v37  ;;  %vm1939_vm7 = vmor %vm655_vm3, %vm656_vm4  ;;  %v675_v40 = vand.u32 2147483648, %v1656_v38 }
  0x7f   :  { %v654_v25 = vadd.f32 %v1709_v11, %v653_v6  ;;  %v621_v59 = vsel %vm1867_vm14, %v620_v60, %v616_v28  ;;  %v668_v62 = vadd.f32 %v1716_v15, %v667_v24  ;;  %v662_v37 = vor.u32 1.1754944e-38, %v661_v5  ;;  %vm1962_vm10 = vmor %vm669_vm5, %vm670_vm6 }
  0x80   :  { %373 = vperm.xlu2 %1250, %v1676_v46   ;;  %v1844_v46 = vpop.eup %1284  ;;  %v689_v51 = vand.u32 2147483648, %v1663_v42  ;;  %vm683_vm11 = vweird.f32 %v1663_v42  ;;  %v708_v57 = vsub.f32 1.0, %v707_v30  ;;  %v701_v0 = vand.u32 2147483647, %v1686_v52 }
  0x81   :  { %309 = vperm.xlu1 %1249, %v1671_v45   ;;  %370 = vperm.xlu0 %1248, %v1645_v33   ;;  %v639_v45 = vmul.f32 %v1693_v56, %v638_v20  ;;  %v633_v33 = vand.u32 2147483648, %v1589_v10  ;;  %v648_v20 = vor.u32 1.1754944e-38, %v647_v36  ;;  %v658_v17 = vsel %vm1939_vm7, %v1709_v11, %v654_v25 }
  0x82   :  { %v703_v36 = vand.u32 2147483648, %v1686_v52  ;;  %v672_v27 = vsel %vm1962_vm10, %v1716_v15, %v668_v62  ;;  %vm697_vm14 = vweird.f32 %v1686_v52  ;;  %vm698_vm15 = vweird.f32 %v1729_v23 }
  0x83   :  { %v99_v49 = vpop.permute.xlu1 %98  ;;  %v96_v54 = vpop.permute.xlu0 %95  ;;  %v640_v10 = vadd.f32 %v1693_v56, %v639_v45  ;;  %v634_v16 = vor.u32 1.1754944e-38, %v633_v33  ;;  %v673_v45 = vand.u32 2147483647, %v1656_v38  ;;  %v687_v33 = vand.u32 2147483647, %v1663_v42 }
  0x84   :  { %vm126_vm13 = vcmp.eq.s32.totalorder %v1665_v43, %v96_v54  ;;  %vm127_vm9 = vcmp.eq.s32.totalorder %v1665_v43, %v99_v49  ;;  %v695_v54 = vmul.f32 %v1729_v23, %v694_v29  ;;  %v676_v38 = vor.u32 1.1754944e-38, %v675_v40 }
  0x85   :  { %1170 = vmatmul.msk.f32.vlgmr.msra.gmra.mxu2 %vm126_vm13, %v1342_v55  ;;  %1175 = vmatmul.msk.f32.gmra.mxu3 %vm131_vm8, %v1342_v55  ;;  %v644_v48 = vsel %vm1901_vm1, %v1693_v56, %v640_v10  ;;  %v635_v56 = vsel %vm1885_vm0, %v634_v16, %v630_v9  ;;  %vm1943_vm8 = vcmp.eq.f32.partialorder %v659_v41, 8.507059e+37  ;;  %vm674_vm13 = vcmp.eq.f32.partialorder %v673_v45, 8.507059e+37  ;;  %v887_v45 = vld [vmem:[%s2297_s4 + $0x78] sm:$0xff] }
  0x86   :  { %v649_v47 = vsel %vm1912_vm2, %v648_v20, %v644_v48  ;;  %v663_v11 = vsel %vm1943_vm8, %v662_v37, %v658_v17  ;;  %vm1985_vm0 = vcmp.eq.f32.partialorder %v687_v33, 8.507059e+37  ;;  %v690_v21 = vor.u32 1.1754944e-38, %v689_v51  ;;  %vm2005_vm2 = vmor %vm697_vm14, %vm698_vm15  ;;  %892 = vmatpush.msrb.mxu2 %v887_v45  ;;  %v883_v17 = vld [vmem:[%s2297_s4 + $0x58] sm:$0xff] }
  0x87   :  { %v696_v61 = vadd.f32 %v1729_v23, %v695_v54  ;;  %v709_v10 = vmul.f32 %v1744_v31, %v708_v57  ;;  %v677_v58 = vsel %vm674_vm13, %v676_v38, %v672_v27  ;;  %vm2009_vm3 = vcmp.eq.f32.partialorder %v701_v0, 8.507059e+37  ;;  %v93_v27 = vpop.permute.xlu2 %92 }
  0x88   :  { %788 = vperm.xlu2 %1250, %v593_v22   ;;  %v704_v7 = vor.u32 1.1754944e-38, %v703_v36  ;;  %v721_v9 = vmul.f32 %v1797_v3, %v1699_v1  ;;  %vm711_vm6 = vweird.f32 %v1690_v53  ;;  %vm712_vm7 = vweird.f32 %v1744_v31 }
  0x89   :  { %783 = vperm.xlu1 %1249, %v579_v14   ;;  %778 = vperm.xlu0 %1248, %v1813_v13   ;;  %v680_v14 = vsub.f32 1.0, %v679_v26  ;;  %v735_v26 = vmul.f32 %v1801_v12, %v1701_v2  ;;  %v715_v16 = vand.u32 2147483647, %v1690_v53  ;;  %v717_v20 = vand.u32 2147483648, %v1690_v53 }
  0x8a   :  { %v700_v41 = vsel %vm2005_vm2, %v1729_v23, %v696_v61  ;;  %v710_v19 = vadd.f32 %v1744_v31, %v709_v10  ;;  %vm725_vm10 = vweird.f32 %v1699_v1  ;;  %vm739_vm13 = vweird.f32 %v1701_v2 }
  0x8b   :  { %v1925_v22 = vpop.permute.xlu1 %116  ;;  %v102_v13 = vpop.permute.xlu0 %101  ;;  %v681_v50 = vmul.f32 %v1722_v18, %v680_v14  ;;  %v736_v24 = vsub.f32 1.0, %v735_v26  ;;  %v722_v14 = vsub.f32 1.0, %v721_v9  ;;  %vm740_vm15 = vweird.f32 %v1801_v12 }
  0x8c   :  { %vm128_vm4 = vcmp.eq.s32.totalorder %v1665_v43, %v102_v13  ;;  %vm133_vm8 = vcmp.eq.s32.totalorder %v1665_v43, %v1925_v22  ;;  %v718_v22 = vor.u32 1.1754944e-38, %v717_v20  ;;  %v763_v35 = vmul.f32 %v1844_v46, %v1758_v44 }
  0x8d   :  { %1171 = vmatmul.msk.f32.gmra.mxu2 %vm127_vm9, %v1342_v55  ;;  %1176 = vmatmul.msk.f32.gmra.mxu3 %vm132_vm12, %v1342_v55  ;;  %vm684_vm12 = vweird.f32 %v1722_v18  ;;  %v682_v8 = vadd.f32 %v1722_v18, %v681_v50  ;;  %vm2033_vm9 = vmor %vm711_vm6, %vm712_vm7  ;;  %v737_v30 = vmul.f32 %v1801_v12, %v736_v24  ;;  %vm753_vm2 = vweird.f32 %v1705_v4 }
  0x8e   :  { %vm1993_vm1 = vmor %vm683_vm11, %vm684_vm12  ;;  %vm2042_vm11 = vcmp.eq.f32.partialorder %v715_v16, 8.507059e+37  ;;  %vm726_vm12 = vweird.f32 %v1797_v3  ;;  %v714_v29 = vsel %vm2033_vm9, %v1744_v31, %v710_v19  ;;  %v731_v39 = vand.u32 2147483648, %v1699_v1 }
  0x8f   :  { %v686_v52 = vsel %vm1993_vm1, %v1722_v18, %v682_v8  ;;  %v705_v18 = vsel %vm2009_vm3, %v704_v7, %v700_v41  ;;  %vm754_vm3 = vweird.f32 %v1808_v34  ;;  %v719_v31 = vsel %vm2042_vm11, %v718_v22, %v714_v29  ;;  %vm2092_vm6 = vmor %vm725_vm10, %vm726_vm12  ;;  %v329_v5 = vpop.permute.xlu2 %328 }
  0x90   :  { %803 = vperm.xlu2 %1250, %v635_v56   ;;  %v691_v53 = vsel %vm1985_vm0, %v690_v21, %v686_v52  ;;  %v723_v56 = vmul.f32 %v1797_v3, %v722_v14  ;;  %v745_v40 = vand.u32 2147483648, %v1701_v2  ;;  %v738_v62 = vadd.f32 %v1801_v12, %v737_v30 }
  0x91   :  { %798 = vperm.xlu1 %1249, %v621_v59   ;;  %793 = vperm.xlu0 %1248, %v607_v63   ;;  %v749_v63 = vmul.f32 %v1808_v34, %v1705_v4  ;;  %v743_v37 = vand.u32 2147483647, %v1701_v2  ;;  %v757_v50 = vand.u32 2147483647, %v1705_v4  ;;  %v729_v51 = vand.u32 2147483647, %v1699_v1 }
  0x92   :  { %v724_v33 = vadd.f32 %v1797_v3, %v723_v56  ;;  %v764_v54 = vsub.f32 1.0, %v763_v35  ;;  %v732_v57 = vor.u32 1.1754944e-38, %v731_v39  ;;  %v746_v38 = vor.u32 1.1754944e-38, %v745_v40 }
  0x93   :  { %v105_v60 = vpop.permute.xlu1 %104  ;;  %v87_v28 = vpop.permute.xlu0 %86  ;;  %v750_v48 = vsub.f32 1.0, %v749_v63  ;;  %vm744_vm7 = vcmp.eq.f32.partialorder %v743_v37, 8.507059e+37  ;;  %vm730_vm9 = vcmp.eq.f32.partialorder %v729_v51, 8.507059e+37  ;;  %vm125_vm10 = vcmp.eq.s32.totalorder %v1665_v43, %v93_v27  ;;  %v886_v37 = vld [vmem:[%s2297_s4 + $0x70] sm:$0xff] }
  0x94   :  { %vm123_vm5 = vcmp.eq.s32.totalorder %v1665_v43, %v87_v28  ;;  %vm129_vm0 = vcmp.eq.s32.totalorder %v1665_v43, %v105_v60  ;;  %v765_v8 = vmul.f32 %v1844_v46, %v764_v54  ;;  %vm767_vm12 = vweird.f32 %v1758_v44  ;;  %893 = vmatpush.msrb.mxu2 %v886_v37  ;;  %v882_v54 = vld [vmem:[%s2297_s4 + $0x50] sm:$0xff] }
  0x95   :  { %1167 = vmatmul.msk.f32.gmra.mxu1 %vm123_vm5, %v1342_v55  ;;  %1172 = vmatmul.msk.f32.gmra.mxu2 %vm128_vm4, %v1342_v55  ;;  %v751_v13 = vmul.f32 %v1808_v34, %v750_v48  ;;  %vm2073_vm4 = vmor %vm739_vm13, %vm740_vm15  ;;  %vm768_vm13 = vweird.f32 %v1844_v46  ;;  %v771_v60 = vand.u32 2147483647, %v1758_v44 }
  0x96   :  { %1177 = vmatmul.msk.f32.gmra.mxu3 %vm133_vm8, %v1342_v55  ;;  %vm2084_vm5 = vmor %vm753_vm2, %vm754_vm3  ;;  %vm758_vm8 = vcmp.eq.f32.partialorder %v757_v50, 8.507059e+37  ;;  %v766_v21 = vadd.f32 %v1844_v46, %v765_v8 }
  0x97   :  { %v752_v49 = vadd.f32 %v1808_v34, %v751_v13  ;;  %vm772_vm15 = vcmp.eq.f32.partialorder %v771_v60, 8.507059e+37 }
  0x98   :  { %818 = vperm.xlu2 %1250, %v677_v58  }
  0x99   :  { %813 = vperm.xlu1 %1249, %v663_v11   ;;  %808 = vperm.xlu0 %1248, %v649_v47   ;;  %v759_v47 = vand.u32 2147483648, %v1705_v4  ;;  %v742_v4 = vsel %vm2073_vm4, %v1801_v12, %v738_v62  ;;  %v756_v36 = vsel %vm2084_vm5, %v1808_v34, %v752_v49  ;;  %v728_v11 = vsel %vm2092_vm6, %v1797_v3, %v724_v33  ;;  %v885_v49 = vld [vmem:[%s2297_s4 + $0x68] sm:$0xff]  ;;  %v884_v33 = vld [vmem:[%s2297_s4 + $0x60] sm:$0xff] }
  0x9a   :  { %v747_v12 = vsel %vm744_vm7, %v746_v38, %v742_v4  ;;  %v733_v32 = vsel %vm730_vm9, %v732_v57, %v728_v11  ;;  %v773_v3 = vand.u32 2147483648, %v1758_v44  ;;  %894 = vmatpush.msrb.mxu2 %v885_v49  ;;  %v881_v57 = vld [vmem:[%s2297_s4 + $0x48] sm:$0xff]  ;;  %v880_v38 = vld [vmem:[%s2297_s4 + $0x40] sm:$0xff]  ;;  %v878_v4 = vld [vmem:[%s2297_s4 + $0x30] sm:$0xff] }
  0x9b   :  { %v78_v25 = vpop.permute.xlu1 %77  ;;  %v90_v59 = vpop.permute.xlu0 %89  ;;  %v760_v0 = vor.u32 1.1754944e-38, %v759_v47  ;;  %v876_v11 = vld [vmem:[%s2297_s4 + $0x20] sm:$0xff]  ;;  %v968_v49 = vld [vmem:[%s2299_s6 + $0x58] sm:$0xff] }
  0x9c   :  { %vm120_vm14 = vcmp.eq.s32.totalorder %v1665_v43, %v78_v25  ;;  %vm124_vm1 = vcmp.eq.s32.totalorder %v1665_v43, %v90_v59  ;;  %v774_v15 = vor.u32 1.1754944e-38, %v773_v3  ;;  %895 = vmatpush.msrb.mxu2 %v884_v33  ;;  %v873_v3 = vld [vmem:[%s2297_s4 + $0x8] sm:$0xff] }
  0x9d   :  { %1164 = vmatmul.msk.f32.gmra.mxu0 %vm120_vm14, %v1342_v55  ;;  %1168 = vmatmul.msk.f32.gmra.mxu1 %vm124_vm1, %v1342_v55  ;;  %v761_v34 = vsel %vm758_vm8, %v760_v0, %v756_v36  ;;  %vm769_vm14 = vmor %vm767_vm12, %vm768_vm13  ;;  %vm375_vm1 = vcmp.lt.s32.totalorder %v1665_v43, %v329_v5  ;;  %v879_v0 = vld [vmem:[%s2297_s4 + $0x38] sm:$0xff]  ;;  %v966_v33 = vld [vmem:[%s2299_s6 + $0x48] sm:$0xff] }
  0x9e   :  { %1173 = vmatmul.msk.f32.gmra.mxu2 %vm129_vm0, %v1342_v55  ;;  %v770_v61 = vsel %vm769_vm14, %v1844_v46, %v766_v21  ;;  %v872_v21 = vld [vmem:[%s2297_s4] sm:$0xff] }
  0x9f   :  { %v775_v10 = vsel %vm772_vm15, %v774_v15, %v770_v61  ;;  %896 = vmatpush.msrb.mxu2 %v883_v17 }
  0xa0   :  { %833 = vperm.xlu2 %1250, %v719_v31  }
  0xa1   :  { %828 = vperm.xlu1 %1249, %v705_v18   ;;  %823 = vperm.xlu0 %1248, %v691_v53   ;;  %v271_v18 = vpop.permute.xlu2 %270 }
  0xa2   :  { %vm313_vm7 = vcmp.ge.s32.totalorder %v1665_v43, %v271_v18  ;;  %897 = vmatpush.msrb.mxu2 %v882_v54 }
  0xa3   :  { %v81_v1 = vpop.permute.xlu0 %80  ;;  %v265_v24 = vpop.permute.xlu1 %264 }
  0xa4   :  { %vm121_vm11 = vcmp.eq.s32.totalorder %v1665_v43, %v81_v1  ;;  %vm311_vm0 = vcmp.ge.s32.totalorder %v1665_v43, %v265_v24  ;;  %898 = vmatpush.msrb.mxu2 %v881_v57  ;;  %v877_v1 = vld [vmem:[%s2297_s4 + $0x28] sm:$0xff]  ;;  %v964_v57 = vld [vmem:[%s2299_s6 + $0x38] sm:$0xff] }
  0xa5   :  { %1165 = vmatmul.msk.f32.gmra.mxu0 %vm121_vm11, %v1342_v55  ;;  %1169 = vmatmul.msk.f32.gmra.mxu1 %vm125_vm10, %v1342_v55  ;;  %vm391_vm2 = vmand %vm311_vm0, %vm375_vm1 }
  0xa6   :  { %899 = vmatpush.msrb.mxu2 %v880_v38  ;;  %v963_v38 = vld [vmem:[%s2299_s6 + $0x30] sm:$0xff] }
  0xa8   :  { %848 = vperm.xlu2 %1250, %v761_v34   ;;  %900 = vmatpush.msrb.mxu2 %v879_v0  ;;  %v874_v34 = vld [vmem:[%s2297_s4 + $0x10] sm:$0xff]  ;;  %v962_v0 = vld [vmem:[%s2299_s6 + $0x28] sm:$0xff] }
  0xa9   :  { %843 = vperm.xlu1 %1249, %v747_v12   ;;  %838 = vperm.xlu0 %1248, %v733_v32   ;;  %v338_v25 = vpop.permute.xlu2 %337  ;;  %v875_v12 = vld [vmem:[%s2297_s4 + $0x18] sm:$0xff] }
  0xaa   :  { %vm378_vm10 = vcmp.lt.s32.totalorder %v1665_v43, %v338_v25  ;;  %901 = vmatpush.msrb.mxu2 %v878_v4  ;;  %v961_v4 = vld [vmem:[%s2299_s6 + $0x20] sm:$0xff] }
  0xab   :  { %v268_v14 = vpop.permute.xlu0 %267  ;;  %v332_v53 = vpop.permute.xlu1 %331 }
  0xac   :  { %vm312_vm3 = vcmp.ge.s32.totalorder %v1665_v43, %v268_v14  ;;  %vm376_vm4 = vcmp.lt.s32.totalorder %v1665_v43, %v332_v53  ;;  %902 = vmatpush.msrb.mxu2 %v877_v1 }
  0xad   :  { %vm392_vm5 = vmand %vm312_vm3, %vm376_vm4 }
  0xae   :  { %903 = vmatpush.msrb.mxu2 %v876_v11 }
  0xb0   :  { %904 = vmatpush.msrb.mxu2 %v875_v12  ;;  %v958_v12 = vld [vmem:[%s2299_s6 + $0x8] sm:$0xff] }
  0xb1   :  { %853 = vperm.xlu0 %1248, %v775_v10   ;;  %v280_v13 = vpop.permute.xlu2 %279 }
  0xb2   :  { %vm316_vm0 = vcmp.ge.s32.totalorder %v1665_v43, %v280_v13  ;;  %905 = vmatpush.msrb.mxu2 %v874_v34  ;;  %v957_v34 = vld [vmem:[%s2299_s6] sm:$0xff] }
  0xb3   :  { %v335_v23 = vpop.permute.xlu0 %334  ;;  %v274_v22 = vpop.permute.xlu1 %273 }
  0xb4   :  { %vm377_vm6 = vcmp.lt.s32.totalorder %v1665_v43, %v335_v23  ;;  %vm314_vm9 = vcmp.ge.s32.totalorder %v1665_v43, %v274_v22  ;;  %906 = vmatpush.msrb.mxu2 %v873_v3 }
  0xb5   :  { %vm393_vm8 = vmand %vm313_vm7, %vm377_vm6 }
  0xb6   :  { %vm394_vm11 = vmand %vm314_vm9, %vm378_vm10  ;;  %907 = vmatpush.msrb.mxu2 %v872_v21 }
  0xb9   :  { %v347_v35 = vpop.permute.xlu2 %346 }
  0xba   :  { %vm381_vm3 = vcmp.lt.s32.totalorder %v1665_v43, %v347_v35 }
  0xbb   :  { %v277_v29 = vpop.permute.xlu0 %276  ;;  %v341_v30 = vpop.permute.xlu1 %340 }
  0xbc   :  { %vm315_vm12 = vcmp.ge.s32.totalorder %v1665_v43, %v277_v29  ;;  %vm379_vm13 = vcmp.lt.s32.totalorder %v1665_v43, %v341_v30 }
  0xbd   :  { %vm395_vm14 = vmand %vm315_vm12, %vm379_vm13 }
  0xc1   :  { %v289_v40 = vpop.permute.xlu2 %288 }
  0xc2   :  { %vm319_vm9 = vcmp.ge.s32.totalorder %v1665_v43, %v289_v40  ;;  %v970_v40 = vld [vmem:[%s2299_s6 + $0x68] sm:$0xff] }
  0xc3   :  { %v344_v59 = vpop.permute.xlu0 %343  ;;  %v283_v56 = vpop.permute.xlu1 %282 }
  0xc4   :  { %vm380_vm15 = vcmp.lt.s32.totalorder %v1665_v43, %v344_v59 }
  0xc5   :  { %vm396_vm1 = vmand %vm316_vm0, %vm380_vm15 }
  0xc9   :  { %v356_v50 = vpop.permute.xlu2 %355 }
  0xca   :  { %vm384_vm12 = vcmp.lt.s32.totalorder %v1665_v43, %v356_v50  ;;  %v967_v50 = vld [vmem:[%s2299_s6 + $0x50] sm:$0xff] }
  0xcb   :  { %v286_v31 = vpop.permute.xlu0 %285  ;;  %v350_v39 = vpop.permute.xlu1 %349 }
  0xcc   :  { %vm382_vm6 = vcmp.lt.s32.totalorder %v1665_v43, %v350_v39  ;;  %v971_v39 = vld [vmem:[%s2299_s6 + $0x70] sm:$0xff] }
  0xd1   :  { %v298_v36 = vpop.permute.xlu2 %297 }
  0xd3   :  { %v353_v47 = vpop.permute.xlu0 %352  ;;  %v292_v62 = vpop.permute.xlu1 %291 }
  0xd9   :  { %v365_v32 = vpop.permute.xlu2 %364 }
  0xdb   :  { %v295_v51 = vpop.permute.xlu0 %294  ;;  %v359_v2 = vpop.permute.xlu1 %358 }
  0xdc   :  { %vm385_vm15 = vcmp.lt.s32.totalorder %v1665_v43, %v359_v2 }
  0xe1   :  { %v307_v61 = vpop.permute.xlu2 %306 }
  0xe3   :  { %v362_v27 = vpop.permute.xlu0 %361  ;;  %v301_v8 = vpop.permute.xlu1 %300 }
  0xe9   :  { %v195_v58 = vpop.f32.mrf.mxu1 }
  0xeb   :  { %v304_v60 = vpop.permute.xlu0 %303  ;;  %v368_v15 = vpop.permute.xlu1 %367 }
  0xf1   :  { %v183_v7 = vpop.f32.mrf.mxu0 }
  0xf3   :  { %v371_v10 = vpop.permute.xlu0 %370 }
  0xf9   :  { %v186_v16 = vpop.f32.mrf.mxu0 }
 0x100   :  { %v219_v26 = vpop.f32.mrf.mxu3 }
 0x108   :  { %v207_v63 = vpop.f32.mrf.mxu2  ;;  %v222_v28 = vpop.f32.mrf.mxu3 }
 0x110   :  { %v210_v42 = vpop.f32.mrf.mxu2  ;;  %v225_v6 = vpop.f32.mrf.mxu3 }
 0x112   :  { %v198_v9 = vpop.f32.mrf.mxu1 }
 0x118   :  { %v213_v52 = vpop.f32.mrf.mxu2 }
 0x119   :  { %v228_v44 = vpop.f32.mrf.mxu3 }
 0x11a   :  { %423 = vmatpush.msrb.mxu1 %v228_v44  ;;  %v201_v20 = vpop.f32.mrf.mxu1  ;;  %v189_v41 = vpop.f32.mrf.mxu0 }
 0x11c   :  { %424 = vmatpush.msrb.mxu1 %v225_v6 }
 0x11e   :  { %425 = vmatpush.msrb.mxu1 %v222_v28  ;;  %v779_v28 = vpop.permute.xlu0 %778 }
 0x120   :  { %426 = vmatpush.msrb.mxu1 %v219_v26  ;;  %v310_v26 = vpop.permute.xlu1 %309 }
 0x121   :  { %v216_v46 = vpop.f32.mrf.mxu2 }
 0x122   :  { %427 = vmatpush.msrb.mxu1 %v216_v46  ;;  %v204_v19 = vpop.f32.mrf.mxu1  ;;  %v192_v48 = vpop.f32.mrf.mxu0 }
 0x124   :  { %428 = vmatpush.msrb.mxu1 %v213_v52 }
 0x126   :  { %429 = vmatpush.msrb.mxu1 %v210_v42 }
 0x128   :  { %430 = vmatpush.msrb.mxu1 %v207_v63  ;;  %v374_v63 = vpop.permute.xlu2 %373  ;;  %v784_v6 = vpop.permute.xlu1 %783 }
 0x12a   :  { %431 = vmatpush.msrb.mxu1 %v204_v19 }
 0x12c   :  { %432 = vmatpush.msrb.mxu1 %v201_v20  ;;  %v794_v20 = vpop.permute.xlu0 %793 }
 0x12e   :  { %433 = vmatpush.msrb.mxu1 %v198_v9 }
 0x130   :  { %434 = vmatpush.msrb.mxu1 %v195_v58  ;;  %v789_v52 = vpop.permute.xlu2 %788 }
 0x132   :  { %435 = vmatpush.msrb.mxu1 %v192_v48 }
 0x134   :  { %436 = vmatpush.msrb.mxu1 %v189_v41  ;;  %v809_v14 = vpop.permute.xlu0 %808 }
 0x136   :  { %437 = vmatpush.msrb.mxu1 %v186_v16 }
 0x138   :  { %438 = vmatpush.msrb.mxu1 %v183_v7 }
 0x139   :  { %1178 = vmatmul.msk.f32.vlgmr.msrb.gmra.mxu1 %vm391_vm2, %v1342_v55  ;;  %vm317_vm2 = vcmp.ge.s32.totalorder %v1665_v43, %v283_v56 }
 0x13a   :  { %vm397_vm4 = vmand %vm317_vm2, %vm381_vm3  ;;  %vm322_vm2 = vcmp.ge.s32.totalorder %v1665_v43, %v298_v36  ;;  %v960_v36 = vld [vmem:[%s2299_s6 + $0x18] sm:$0xff] }
 0x13c   :  { %v824_v59 = vpop.permute.xlu0 %823 }
 0x141   :  { %1179 = vmatmul.msk.f32.gmra.mxu1 %vm392_vm5, %v1342_v55  ;;  %vm318_vm5 = vcmp.ge.s32.totalorder %v1665_v43, %v286_v31  ;;  %v972_v31 = vld [vmem:[%s2299_s6 + $0x78] sm:$0xff] }
 0x142   :  { %vm398_vm7 = vmand %vm318_vm5, %vm382_vm6  ;;  %vm387_vm5 = vcmp.lt.s32.totalorder %v1665_v43, %v365_v32  ;;  %977 = vmatpush.msrb.mxu3 %v972_v31  ;;  %v1050_v31 = vld [vmem:[#allocation2 + $0x40] sm:$0xff] }
 0x144   :  { %978 = vmatpush.msrb.mxu3 %v971_v39 }
 0x146   :  { %979 = vmatpush.msrb.mxu3 %v970_v40 }
 0x149   :  { %1180 = vmatmul.msk.f32.gmra.mxu1 %vm393_vm8, %v1342_v55  ;;  %vm383_vm8 = vcmp.lt.s32.totalorder %v1665_v43, %v353_v47  ;;  %v969_v47 = vld [vmem:[%s2299_s6 + $0x60] sm:$0xff] }
 0x14a   :  { %vm399_vm10 = vmand %vm319_vm9, %vm383_vm8  ;;  %vm388_vm8 = vcmp.lt.s32.totalorder %v1665_v43, %v368_v15  ;;  %980 = vmatpush.msrb.mxu3 %v969_v47  ;;  %v1049_v47 = vld [vmem:[#allocation2 + $0x38] sm:$0xff] }
 0x14c   :  { %981 = vmatpush.msrb.mxu3 %v968_v49  ;;  %v1045_v49 = vld [vmem:[#allocation2 + $0x18] sm:$0xff] }
 0x14e   :  { %982 = vmatpush.msrb.mxu3 %v967_v50 }
 0x150   :  { %983 = vmatpush.msrb.mxu3 %v966_v33 }
 0x151   :  { %1181 = vmatmul.msk.f32.gmra.mxu1 %vm394_vm11, %v1342_v55  ;;  %vm320_vm11 = vcmp.ge.s32.totalorder %v1665_v43, %v292_v62 }
 0x152   :  { %vm400_vm13 = vmand %vm320_vm11, %vm384_vm12  ;;  %vm325_vm11 = vcmp.ge.s32.totalorder %v1665_v43, %v307_v61 }
 0x159   :  { %1182 = vmatmul.msk.f32.gmra.mxu1 %vm395_vm14, %v1342_v55  ;;  %vm321_vm14 = vcmp.ge.s32.totalorder %v1665_v43, %v295_v51  ;;  %v965_v51 = vld [vmem:[%s2299_s6 + $0x40] sm:$0xff] }
 0x15a   :  { %vm401_vm0 = vmand %vm321_vm14, %vm385_vm15  ;;  %vm390_vm14 = vcmp.lt.s32.totalorder %v1665_v43, %v374_v63  ;;  %984 = vmatpush.msrb.mxu3 %v965_v51  ;;  %v1044_v51 = vld [vmem:[#allocation2 + $0x10] sm:$0xff] }
 0x15c   :  { %985 = vmatpush.msrb.mxu3 %v964_v57 }
 0x15e   :  { %986 = vmatpush.msrb.mxu3 %v963_v38 }
 0x160   :  { %987 = vmatpush.msrb.mxu3 %v962_v0 }
 0x161   :  { %1183 = vmatmul.msk.f32.gmra.mxu1 %vm396_vm1, %v1342_v55  ;;  %vm386_vm1 = vcmp.lt.s32.totalorder %v1665_v43, %v362_v27  ;;  %v839_v27 = vpop.permute.xlu0 %838 }
 0x162   :  { %vm402_vm3 = vmand %vm322_vm2, %vm386_vm1  ;;  %988 = vmatpush.msrb.mxu3 %v961_v4 }
 0x164   :  { %989 = vmatpush.msrb.mxu3 %v960_v36 }
 0x169   :  { %1184 = vmatmul.msk.f32.gmra.mxu1 %vm397_vm4, %v1342_v55  ;;  %vm323_vm4 = vcmp.ge.s32.totalorder %v1665_v43, %v301_v8  ;;  %v959_v8 = vld [vmem:[%s2299_s6 + $0x10] sm:$0xff] }
 0x16a   :  { %vm403_vm6 = vmand %vm323_vm4, %vm387_vm5  ;;  %990 = vmatpush.msrb.mxu3 %v959_v8 }
 0x16c   :  { %991 = vmatpush.msrb.mxu3 %v958_v12 }
 0x16e   :  { %992 = vmatpush.msrb.mxu3 %v957_v34 }
 0x171   :  { %1185 = vmatmul.msk.f32.gmra.mxu1 %vm398_vm7, %v1342_v55  ;;  %vm324_vm7 = vcmp.ge.s32.totalorder %v1665_v43, %v304_v60 }
 0x172   :  { %vm404_vm9 = vmand %vm324_vm7, %vm388_vm8 }
 0x179   :  { %1186 = vmatmul.msk.f32.gmra.mxu1 %vm399_vm10, %v1342_v55  ;;  %vm389_vm10 = vcmp.lt.s32.totalorder %v1665_v43, %v371_v10  ;;  %v854_v10 = vpop.permute.xlu0 %853 }
 0x17a   :  { %vm405_vm12 = vmand %vm325_vm11, %vm389_vm10 }
 0x181   :  { %1187 = vmatmul.msk.f32.gmra.mxu1 %vm400_vm13, %v1342_v55  ;;  %vm326_vm13 = vcmp.ge.s32.totalorder %v1665_v43, %v310_v26  ;;  %v799_v43 = vpop.permute.xlu1 %798 }
 0x182   :  { %vm406_vm15 = vmand %vm326_vm13, %vm390_vm14 }
 0x189   :  { %1188 = vmatmul.msk.f32.gmra.mxu1 %vm401_vm0, %v1342_v55  ;;  %v814_v23 = vpop.permute.xlu1 %813 }
 0x191   :  { %1189 = vmatmul.msk.f32.gmra.mxu1 %vm402_vm3, %v1342_v55  ;;  %v829_v62 = vpop.permute.xlu1 %828 }
 0x199   :  { %1190 = vmatmul.msk.f32.gmra.mxu1 %vm403_vm6, %v1342_v55  ;;  %v844_v32 = vpop.permute.xlu1 %843 }
 0x1a1   :  { %1191 = vmatmul.msk.f32.gmra.mxu1 %vm404_vm9, %v1342_v55 }
 0x1a9   :  { %1192 = vmatmul.msk.f32.gmra.mxu1 %vm405_vm12, %v1342_v55 }
 0x1b1   :  { %1193 = vmatmul.msk.f32.gmra.mxu1 %vm406_vm15, %v1342_v55  ;;  %v804_v55 = vpop.permute.xlu2 %803 }
 0x1b6   :  { %v440_v58 = vpop.f32.mrf.mxu1 }
 0x1b7   :  { %v856_v42 = vmul.f32 %v779_v28, %v440_v58  ;;  %v2263_v28 = vld [vmem:[%s2298_s5] ss:$0 sm:$0xff] }
 0x1b9   :  { %908 = vmatmul.f32.vlgmr.msrb.gmra.mxu2 %v856_v42  ;;  %v819_v29 = vpop.permute.xlu2 %818 }
 0x1be   :  { %v443_v7 = vpop.f32.mrf.mxu1 }
 0x1bf   :  { %v857_v9 = vmul.f32 %v784_v6, %v443_v7 }
 0x1c1   :  { %911 = vmatmul.f32.gmra.mxu2 %v857_v9  ;;  %v834_v17 = vpop.permute.xlu2 %833 }
 0x1c6   :  { %v446_v44 = vpop.f32.mrf.mxu1 }
 0x1c7   :  { %v858_v16 = vmul.f32 %v789_v52, %v446_v44 }
 0x1c9   :  { %914 = vmatmul.f32.gmra.mxu2 %v858_v16  ;;  %v849_v60 = vpop.permute.xlu2 %848 }
 0x1ce   :  { %v449_v46 = vpop.f32.mrf.mxu1 }
 0x1cf   :  { %v859_v41 = vmul.f32 %v794_v20, %v449_v46 }
 0x1d1   :  { %917 = vmatmul.f32.gmra.mxu2 %v859_v41 }
 0x1d6   :  { %v452_v19 = vpop.f32.mrf.mxu1 }
 0x1d7   :  { %v860_v24 = vmul.f32 %v799_v43, %v452_v19 }
 0x1d9   :  { %920 = vmatmul.f32.gmra.mxu2 %v860_v24 }
 0x1de   :  { %v455_v48 = vpop.f32.mrf.mxu1 }
 0x1df   :  { %v861_v5 = vmul.f32 %v804_v55, %v455_v48 }
 0x1e1   :  { %923 = vmatmul.f32.gmra.mxu2 %v861_v5 }
 0x1e6   :  { %v458_v53 = vpop.f32.mrf.mxu1 }
 0x1e7   :  { %v862_v18 = vmul.f32 %v809_v14, %v458_v53 }
 0x1e9   :  { %926 = vmatmul.f32.gmra.mxu2 %v862_v18 }
 0x1ee   :  { %v461_v22 = vpop.f32.mrf.mxu1 }
 0x1ef   :  { %v863_v25 = vmul.f32 %v814_v23, %v461_v22  ;;  %v1057_v23 = vld [vmem:[#allocation2 + $0x78] sm:$0xff]  ;;  %v1056_v22 = vld [vmem:[#allocation2 + $0x70] sm:$0xff] }
 0x1f0   :  { %1062 = vmatpush.msrb.mxu0 %v1057_v23 }
 0x1f1   :  { %929 = vmatmul.f32.gmra.mxu2 %v863_v25  ;;  %v1055_v25 = vld [vmem:[#allocation2 + $0x68] sm:$0xff] }
 0x1f2   :  { %1063 = vmatpush.msrb.mxu0 %v1056_v22 }
 0x1f4   :  { %1064 = vmatpush.msrb.mxu0 %v1055_v25 }
 0x1f6   :  { %v464_v30 = vpop.f32.mrf.mxu1 }
 0x1f7   :  { %v864_v13 = vmul.f32 %v819_v29, %v464_v30  ;;  %v1054_v29 = vld [vmem:[#allocation2 + $0x60] sm:$0xff] }
 0x1f8   :  { %1065 = vmatpush.msrb.mxu0 %v1054_v29 }
 0x1f9   :  { %932 = vmatmul.f32.gmra.mxu2 %v864_v13 }
 0x1fe   :  { %v467_v56 = vpop.f32.mrf.mxu1 }
 0x1ff   :  { %v865_v35 = vmul.f32 %v824_v59, %v467_v56  ;;  %v1053_v59 = vld [vmem:[#allocation2 + $0x58] sm:$0xff]  ;;  %v1052_v56 = vld [vmem:[#allocation2 + $0x50] sm:$0xff] }
 0x200   :  { %1066 = vmatpush.msrb.mxu0 %v1053_v59 }
 0x201   :  { %935 = vmatmul.f32.gmra.mxu2 %v865_v35  ;;  %v1051_v35 = vld [vmem:[#allocation2 + $0x48] sm:$0xff] }
 0x202   :  { %1067 = vmatpush.msrb.mxu0 %v1052_v56 }
 0x204   :  { %1068 = vmatpush.msrb.mxu0 %v1051_v35 }
 0x206   :  { %v470_v45 = vpop.f32.mrf.mxu1  ;;  %1069 = vmatpush.msrb.mxu0 %v1050_v31 }
 0x207   :  { %v866_v37 = vmul.f32 %v829_v62, %v470_v45  ;;  %v1048_v62 = vld [vmem:[#allocation2 + $0x30] sm:$0xff]  ;;  %v1047_v45 = vld [vmem:[#allocation2 + $0x28] sm:$0xff] }
 0x208   :  { %1070 = vmatpush.msrb.mxu0 %v1049_v47 }
 0x209   :  { %938 = vmatmul.f32.gmra.mxu2 %v866_v37  ;;  %v1046_v37 = vld [vmem:[#allocation2 + $0x20] sm:$0xff] }
 0x20a   :  { %1071 = vmatpush.msrb.mxu0 %v1048_v62 }
 0x20c   :  { %1072 = vmatpush.msrb.mxu0 %v1047_v45 }
 0x20e   :  { %v473_v54 = vpop.f32.mrf.mxu1  ;;  %1073 = vmatpush.msrb.mxu0 %v1046_v37 }
 0x20f   :  { %v867_v2 = vmul.f32 %v834_v17, %v473_v54  ;;  %v1043_v17 = vld [vmem:[#allocation2 + $0x8] sm:$0xff]  ;;  %v1042_v54 = vld [vmem:[#allocation2] sm:$0xff] }
 0x210   :  { %1074 = vmatpush.msrb.mxu0 %v1045_v49 }
 0x211   :  { %941 = vmatmul.f32.gmra.mxu2 %v867_v2 }
 0x212   :  { %1075 = vmatpush.msrb.mxu0 %v1044_v51 }
 0x214   :  { %1076 = vmatpush.msrb.mxu0 %v1043_v17 }
 0x216   :  { %v476_v1 = vpop.f32.mrf.mxu1  ;;  %1077 = vmatpush.msrb.mxu0 %v1042_v54 }
 0x217   :  { %v868_v11 = vmul.f32 %v839_v27, %v476_v1  ;;  %v1252_v27 = vld [vmem:[%s2300_s7] ss:$0 sm:$0xff] }
 0x219   :  { %944 = vmatmul.f32.gmra.mxu2 %v868_v11 }
 0x21e   :  { %v479_v3 = vpop.f32.mrf.mxu1 }
 0x21f   :  { %v869_v21 = vmul.f32 %v844_v32, %v479_v3 }
 0x221   :  { %947 = vmatmul.f32.gmra.mxu2 %v869_v21 }
 0x226   :  { %v482_v15 = vpop.f32.mrf.mxu1 }
 0x227   :  { %v870_v61 = vmul.f32 %v849_v60, %v482_v15 }
 0x229   :  { %950 = vmatmul.f32.gmra.mxu2 %v870_v61 }
 0x22e   :  { %v485_v26 = vpop.f32.mrf.mxu1 }
 0x22f   :  { %v871_v63 = vmul.f32 %v854_v10, %v485_v26 }
 0x231   :  { %953 = vmatmul.f32.gmra.mxu2 %v871_v63 }
 0x23c   :  { %v909_v58 = vpop.f32.mrf.mxu2 }
 0x23d   :  { %v910_v42 = vadd.f32 %v2263_v28, %v909_v58 }
 0x23f   :  { %993 = vmatmul.f32.vlgmr.msrb.gmra.mxu3 %v910_v42 }
 0x244   :  { %v912_v6 = vpop.f32.mrf.mxu2 }
 0x245   :  { %v913_v7 = vadd.f32 %v2263_v28, %v912_v6 }
 0x247   :  { %996 = vmatmul.f32.gmra.mxu3 %v913_v7 }
 0x24c   :  { %v915_v9 = vpop.f32.mrf.mxu2 }
 0x24d   :  { %v916_v52 = vadd.f32 %v2263_v28, %v915_v9 }
 0x24f   :  { %999 = vmatmul.f32.gmra.mxu3 %v916_v52 }
 0x254   :  { %v918_v44 = vpop.f32.mrf.mxu2 }
 0x255   :  { %v919_v16 = vadd.f32 %v2263_v28, %v918_v44 }
 0x257   :  { %1002 = vmatmul.f32.gmra.mxu3 %v919_v16 }
 0x25c   :  { %v921_v20 = vpop.f32.mrf.mxu2 }
 0x25d   :  { %v922_v46 = vadd.f32 %v2263_v28, %v921_v20 }
 0x25f   :  { %1005 = vmatmul.f32.gmra.mxu3 %v922_v46 }
 0x264   :  { %v924_v41 = vpop.f32.mrf.mxu2 }
 0x265   :  { %v925_v43 = vadd.f32 %v2263_v28, %v924_v41 }
 0x267   :  { %1008 = vmatmul.f32.gmra.mxu3 %v925_v43 }
 0x26c   :  { %v927_v19 = vpop.f32.mrf.mxu2 }
 0x26d   :  { %v928_v24 = vadd.f32 %v2263_v28, %v927_v19 }
 0x26f   :  { %1011 = vmatmul.f32.gmra.mxu3 %v928_v24 }
 0x274   :  { %v930_v55 = vpop.f32.mrf.mxu2 }
 0x275   :  { %v931_v48 = vadd.f32 %v2263_v28, %v930_v55 }
 0x277   :  { %1014 = vmatmul.f32.gmra.mxu3 %v931_v48 }
 0x27c   :  { %v933_v5 = vpop.f32.mrf.mxu2 }
 0x27d   :  { %v934_v14 = vadd.f32 %v2263_v28, %v933_v5 }
 0x27f   :  { %1017 = vmatmul.f32.gmra.mxu3 %v934_v14  ;;  %v1253_v14 = vld [vmem:[%s2302_s9] ss:$0 sm:$0xff]  ;;  %s1343_s9 = smov [#allocation5]  }
 0x280   :  { %s1147_s3 = sshll.u32 %s1343_s9, 4  ;;  %s1148_s3 = int_to_ptr.vmem [resolvable:$true] %s1147_s3 }
 0x284   :  { %v936_v53 = vpop.f32.mrf.mxu2 }
 0x285   :  { %v937_v18 = vadd.f32 %v2263_v28, %v936_v53 }
 0x287   :  { %1020 = vmatmul.f32.gmra.mxu3 %v937_v18 }
 0x28c   :  { %v939_v30 = vpop.f32.mrf.mxu2 }
 0x28d   :  { %v940_v13 = vadd.f32 %v2263_v28, %v939_v30 }
 0x28f   :  { %1023 = vmatmul.f32.gmra.mxu3 %v940_v13 }
 0x294   :  { %v942_v39 = vpop.f32.mrf.mxu2 }
 0x295   :  { %v943_v40 = vadd.f32 %v2263_v28, %v942_v39 }
 0x297   :  { %1026 = vmatmul.f32.gmra.mxu3 %v943_v40 }
 0x29c   :  { %v945_v50 = vpop.f32.mrf.mxu2 }
 0x29d   :  { %v946_v33 = vadd.f32 %v2263_v28, %v945_v50 }
 0x29f   :  { %1029 = vmatmul.f32.gmra.mxu3 %v946_v33 }
 0x2a4   :  { %v948_v2 = vpop.f32.mrf.mxu2 }
 0x2a5   :  { %v949_v57 = vadd.f32 %v2263_v28, %v948_v2 }
 0x2a7   :  { %1032 = vmatmul.f32.gmra.mxu3 %v949_v57 }
 0x2ac   :  { %v951_v38 = vpop.f32.mrf.mxu2 }
 0x2ad   :  { %v952_v0 = vadd.f32 %v2263_v28, %v951_v38 }
 0x2af   :  { %1035 = vmatmul.f32.gmra.mxu3 %v952_v0 }
 0x2b4   :  { %v954_v4 = vpop.f32.mrf.mxu2 }
 0x2b5   :  { %v955_v36 = vadd.f32 %v2263_v28, %v954_v4 }
 0x2b7   :  { %1038 = vmatmul.f32.gmra.mxu3 %v955_v36 }
 0x2c2   :  { %v994_v1 = vpop.f32.mrf.mxu3 }
 0x2c3   :  { %v995_v11 = vadd.f32 %v1252_v27, %v994_v1 }
 0x2c5   :  { %1078 = vmatmul.f32.vlgmr.msrb.gmra.mxu0 %v995_v11 }
 0x2ca   :  { %v997_v8 = vpop.f32.mrf.mxu3 }
 0x2cb   :  { %v998_v12 = vadd.f32 %v1252_v27, %v997_v8 }
 0x2cd   :  { %1081 = vmatmul.f32.gmra.mxu0 %v998_v12 }
 0x2d2   :  { %v1000_v34 = vpop.f32.mrf.mxu3 }
 0x2d3   :  { %v1001_v32 = vadd.f32 %v1252_v27, %v1000_v34 }
 0x2d5   :  { %1084 = vmatmul.f32.gmra.mxu0 %v1001_v32 }
 0x2da   :  { %v1003_v3 = vpop.f32.mrf.mxu3 }
 0x2db   :  { %v1004_v21 = vadd.f32 %v1252_v27, %v1003_v3 }
 0x2dd   :  { %1087 = vmatmul.f32.gmra.mxu0 %v1004_v21 }
 0x2e2   :  { %v1006_v60 = vpop.f32.mrf.mxu3 }
 0x2e3   :  { %v1007_v15 = vadd.f32 %v1252_v27, %v1006_v60 }
 0x2e5   :  { %1090 = vmatmul.f32.gmra.mxu0 %v1007_v15 }
 0x2ea   :  { %v1009_v61 = vpop.f32.mrf.mxu3 }
 0x2eb   :  { %v1010_v10 = vadd.f32 %v1252_v27, %v1009_v61 }
 0x2ed   :  { %1093 = vmatmul.f32.gmra.mxu0 %v1010_v10 }
 0x2f2   :  { %v1012_v26 = vpop.f32.mrf.mxu3 }
 0x2f3   :  { %v1013_v63 = vadd.f32 %v1252_v27, %v1012_v26 }
 0x2f5   :  { %1096 = vmatmul.f32.gmra.mxu0 %v1013_v63 }
 0x2fa   :  { %v1015_v28 = vpop.f32.mrf.mxu3 }
 0x2fb   :  { %v1016_v58 = vadd.f32 %v1252_v27, %v1015_v28 }
 0x2fd   :  { %1099 = vmatmul.f32.gmra.mxu0 %v1016_v58 }
 0x302   :  { %v1018_v42 = vpop.f32.mrf.mxu3 }
 0x303   :  { %v1019_v6 = vadd.f32 %v1252_v27, %v1018_v42 }
 0x305   :  { %1102 = vmatmul.f32.gmra.mxu0 %v1019_v6 }
 0x30a   :  { %v1021_v7 = vpop.f32.mrf.mxu3 }
 0x30b   :  { %v1022_v9 = vadd.f32 %v1252_v27, %v1021_v7 }
 0x30d   :  { %1105 = vmatmul.f32.gmra.mxu0 %v1022_v9 }
 0x312   :  { %v1024_v52 = vpop.f32.mrf.mxu3 }
 0x313   :  { %v1025_v44 = vadd.f32 %v1252_v27, %v1024_v52 }
 0x315   :  { %1108 = vmatmul.f32.gmra.mxu0 %v1025_v44 }
 0x31a   :  { %v1027_v16 = vpop.f32.mrf.mxu3 }
 0x31b   :  { %v1028_v20 = vadd.f32 %v1252_v27, %v1027_v16 }
 0x31d   :  { %1111 = vmatmul.f32.gmra.mxu0 %v1028_v20 }
 0x322   :  { %v1030_v46 = vpop.f32.mrf.mxu3 }
 0x323   :  { %v1031_v41 = vadd.f32 %v1252_v27, %v1030_v46 }
 0x325   :  { %1114 = vmatmul.f32.gmra.mxu0 %v1031_v41 }
 0x32a   :  { %v1033_v43 = vpop.f32.mrf.mxu3 }
 0x32b   :  { %v1034_v19 = vadd.f32 %v1252_v27, %v1033_v43 }
 0x32d   :  { %1117 = vmatmul.f32.gmra.mxu0 %v1034_v19 }
 0x332   :  { %v1036_v24 = vpop.f32.mrf.mxu3 }
 0x333   :  { %v1037_v55 = vadd.f32 %v1252_v27, %v1036_v24 }
 0x335   :  { %1120 = vmatmul.f32.gmra.mxu0 %v1037_v55 }
 0x33a   :  { %v1039_v48 = vpop.f32.mrf.mxu3 }
 0x33b   :  { %v1040_v5 = vadd.f32 %v1252_v27, %v1039_v48 }
 0x33d   :  { %1123 = vmatmul.f32.gmra.mxu0 %v1040_v5 }
 0x342   :  { %v1079_v53 = vpop.f32.mrf.mxu0 }
 0x343   :  { %v1080_v18 = vadd.f32 %v1253_v14, %v1079_v53 }
 0x345   :  { %1127 = vst [vmem:[#allocation5] sm:$0xff] %v1080_v18 }
 0x34a   :  { %v1082_v23 = vpop.f32.mrf.mxu0 }
 0x34b   :  { %v1083_v22 = vadd.f32 %v1253_v14, %v1082_v23 }
 0x34d   :  { %1128 = vst [vmem:[#allocation5 + $0x8] sm:$0xff] %v1083_v22 }
 0x352   :  { %v1085_v25 = vpop.f32.mrf.mxu0 }
 0x353   :  { %v1086_v29 = vadd.f32 %v1253_v14, %v1085_v25 }
 0x355   :  { %1129 = vst [vmem:[#allocation5 + $0x10] sm:$0xff] %v1086_v29 }
 0x35a   :  { %v1088_v30 = vpop.f32.mrf.mxu0 }
 0x35b   :  { %v1089_v13 = vadd.f32 %v1253_v14, %v1088_v30 }
 0x35d   :  { %1130 = vst [vmem:[#allocation5 + $0x18] sm:$0xff] %v1089_v13 }
 0x362   :  { %v1091_v59 = vpop.f32.mrf.mxu0 }
 0x363   :  { %v1092_v56 = vadd.f32 %v1253_v14, %v1091_v59 }
 0x365   :  { %1131 = vst [vmem:[#allocation5 + $0x20] sm:$0xff] %v1092_v56 }
 0x36a   :  { %v1094_v35 = vpop.f32.mrf.mxu0 }
 0x36b   :  { %v1095_v31 = vadd.f32 %v1253_v14, %v1094_v35 }
 0x36d   :  { %1132 = vst [vmem:[#allocation5 + $0x28] sm:$0xff] %v1095_v31 }
 0x372   :  { %v1097_v39 = vpop.f32.mrf.mxu0 }
 0x373   :  { %v1098_v40 = vadd.f32 %v1253_v14, %v1097_v39 }
 0x375   :  { %1133 = vst [vmem:[#allocation5 + $0x30] sm:$0xff] %v1098_v40 }
 0x37a   :  { %v1100_v47 = vpop.f32.mrf.mxu0 }
 0x37b   :  { %v1101_v62 = vadd.f32 %v1253_v14, %v1100_v47 }
 0x37d   :  { %1134 = vst [vmem:[#allocation5 + $0x38] sm:$0xff] %v1101_v62 }
 0x382   :  { %v1103_v45 = vpop.f32.mrf.mxu0 }
 0x383   :  { %v1104_v37 = vadd.f32 %v1253_v14, %v1103_v45 }
 0x385   :  { %1135 = vst [vmem:[#allocation5 + $0x40] sm:$0xff] %v1104_v37 }
 0x38a   :  { %v1106_v49 = vpop.f32.mrf.mxu0 }
 0x38b   :  { %v1107_v50 = vadd.f32 %v1253_v14, %v1106_v49 }
 0x38d   :  { %1136 = vst [vmem:[#allocation5 + $0x48] sm:$0xff] %v1107_v50 }
 0x392   :  { %v1109_v33 = vpop.f32.mrf.mxu0 }
 0x393   :  { %v1110_v51 = vadd.f32 %v1253_v14, %v1109_v33 }
 0x395   :  { %1137 = vst [vmem:[#allocation5 + $0x50] sm:$0xff] %v1110_v51 }
 0x39a   :  { %v1112_v17 = vpop.f32.mrf.mxu0 }
 0x39b   :  { %v1113_v54 = vadd.f32 %v1253_v14, %v1112_v17 }
 0x39d   :  { %1138 = vst [vmem:[#allocation5 + $0x58] sm:$0xff] %v1113_v54 }
 0x3a2   :  { %v1115_v2 = vpop.f32.mrf.mxu0 }
 0x3a3   :  { %v1116_v57 = vadd.f32 %v1253_v14, %v1115_v2 }
 0x3a5   :  { %1139 = vst [vmem:[#allocation5 + $0x60] sm:$0xff] %v1116_v57 }
 0x3aa   :  { %v1118_v38 = vpop.f32.mrf.mxu0 }
 0x3ab   :  { %v1119_v0 = vadd.f32 %v1253_v14, %v1118_v38 }
 0x3ad   :  { %1140 = vst [vmem:[#allocation5 + $0x68] sm:$0xff] %v1119_v0 }
 0x3b2   :  { %v1121_v4 = vpop.f32.mrf.mxu0 }
 0x3b3   :  { %v1122_v36 = vadd.f32 %v1253_v14, %v1121_v4 }
 0x3b5   :  { %1141 = vst [vmem:[#allocation5 + $0x70] sm:$0xff] %v1122_v36 }
 0x3ba   :  { %v1124_v27 = vpop.f32.mrf.mxu0 }
 0x3bb   :  { %v1125_v1 = vadd.f32 %v1253_v14, %v1124_v27 }
 0x3bd   :  { %1142 = vst [vmem:[#allocation5 + $0x78] sm:$0xff] %v1125_v1 }
 0x3be   :  { %1155 = dma.vmem_to_hbm [thread:$0]  %s1148_s3, 2048, %s1150_s25, [#allocation4], %s1339_s18, %s1339_s18, %s1340_s19  }
 0x3bf   :  { %1336 = dma.done.wait [#allocation4], 2048  }
 0x3c0   :  { %1337 = vsyncadd [#allocation4], 4294965248 }
 0x3c1   :  { %1160 = vsyncpa [#allocation3], 1 }
 0x3c2   :  { %1161 = vsyncpa [#allocation4], 1 }

// kernel: tpu_custom_call.1
= control target key start
LH: loop header
LB: loop body
LE: loop exit
PB: predicated region body
PF: predicated region fallthrough
CT: control target
= control target key end

     0   :  { %15 = vsyncpa [#allocation3], 0  ;;  %s2293_s0 = inlined_call_operand.vmem [shape: s32[128,1], index: 0, kind: input, shape index: {}]   ;;  %s2294_s1 = inlined_call_operand.vmem [shape: s32[128,1], index: 1, kind: input, shape index: {}]   ;;  %s2295_s2 = inlined_call_operand.vmem [shape: s32[128,1], index: 2, kind: input, shape index: {}]   ;;  %s2296_s3 = inlined_call_operand.vmem [shape: f32[128,128], index: 3, kind: input, shape index: {}]   ;;  %s2297_s4 = inlined_call_operand.vmem [shape: f32[128,128], index: 4, kind: input, shape index: {}]   ;;  %s2298_s5 = inlined_call_operand.vmem [shape: f32[1,128], index: 5, kind: input, shape index: {}]   ;;  %s2299_s6 = inlined_call_operand.vmem [shape: f32[128,128], index: 6, kind: input, shape index: {}]   ;;  %s2300_s7 = inlined_call_operand.vmem [shape: f32[1,128], index: 7, kind: input, shape index: {}]   ;;  %s2301_s8 = inlined_call_operand.hbm [shape: f32[128,128], index: 8, kind: input, shape index: {}]   ;;  %s2302_s9 = inlined_call_operand.vmem [shape: f32[1,128], index: 9, kind: input, shape index: {}]   ;;  %s2303_s10 = inlined_call_operand.hbm [shape: f32[128,128], index: 10, kind: output, shape index: {}]  }
   0x1   :  { %16 = vsyncpa [#allocation4], 0  ;;  %s37_s15 = sshll.u32 %s2301_s8, 4  ;;  %s1338_s16 = smov [#allocation2]   ;;  %s38_s15 = int_to_ptr.hbm [resolvable:$true] %s37_s15 }
   0x2   :  { %s39_s17 = sshll.u32 %s1338_s16, 4  ;;  %s1339_s18 = smov 128   ;;  %s40_s17 = int_to_ptr.vmem [resolvable:$true] %s39_s17 }
   0x3   :  { %s1340_s19 = smov 8  }
   0x4   :  { %45 = dma.hbm_to_vmem [thread:$0]  %s38_s15, 2048, %s40_s17, [#allocation3], %s1339_s18, %s1339_s18, %s1340_s19  }
   0x5   :  { %1334 = dma.done.wait [#allocation3], 2048  }
   0x6   :  { %1335 = vsyncadd [#allocation3], 4294965248  ;;  %v1341_v0 = vmov 0   ;;  %v66_v1 = vld [vmem:[%s2293_s0 + $0x70] sm:$0xff]  ;;  %v65_v2 = vld [vmem:[%s2293_s0 + $0x68] sm:$0xff]  ;;  %s1149_s25 = sshll.u32 %s2303_s10, 4  ;;  %s1150_s25 = int_to_ptr.hbm [resolvable:$true] %s1149_s25 }
   0x7   :  { %1250 = vset.pattern.permute.xlu2 %v1341_v0  ;;  %1249 = vset.pattern.permute.xlu1 %v1341_v0  ;;  %v64_v3 = vld [vmem:[%s2293_s0 + $0x60] sm:$0xff]  ;;  %v61_v4 = vld [vmem:[%s2293_s0 + $0x48] sm:$0xff]  ;;  %v67_v10 = vld [vmem:[%s2293_s0 + $0x78] sm:$0xff] }
   0x8   :  { %1248 = vset.pattern.permute.xlu0 %v1341_v0  ;;  %113 = vperm.xlu2 %1250, %v66_v1   ;;  %v56_v5 = vld [vmem:[%s2293_s0 + $0x20] sm:$0xff]  ;;  %v62_v12 = vld [vmem:[%s2293_s0 + $0x50] sm:$0xff]  ;;  %v63_v13 = vld [vmem:[%s2293_s0 + $0x58] sm:$0xff] }
   0x9   :  { %110 = vperm.xlu1 %1249, %v65_v2   ;;  %107 = vperm.xlu0 %1248, %v64_v3   ;;  %v60_v6 = vld [vmem:[%s2293_s0 + $0x40] sm:$0xff]  ;;  %v53_v14 = vld [vmem:[%s2293_s0 + $0x8] sm:$0xff]  ;;  %v54_v16 = vld [vmem:[%s2293_s0 + $0x10] sm:$0xff] }
   0xa   :  { %v231_v7 = vld [vmem:[%s2294_s1] sm:$0xff]  ;;  %v57_v15 = vld [vmem:[%s2293_s0 + $0x28] sm:$0xff]  ;;  %v59_v17 = vld [vmem:[%s2293_s0 + $0x38] sm:$0xff] }
   0xb   :  { %v247_v8 = vld [vmem:[%s2295_s2] sm:$0xff]  ;;  %v58_v18 = vld [vmem:[%s2293_s0 + $0x30] sm:$0xff]  ;;  %v55_v19 = vld [vmem:[%s2293_s0 + $0x18] sm:$0xff] }
   0xc   :  { %v1429_v9 = vsub.s32 %v247_v8, %v231_v7  ;;  %v52_v11 = vld [vmem:[%s2293_s0] sm:$0xff]  ;;  %v1464_v20 = vld [vmem:[%s2295_s2 + $0x8] sm:$0xff]  ;;  %v1469_v21 = vld [vmem:[%s2294_s1 + $0x10] sm:$0xff] }
   0xd   :  { %v1474_v22 = vld [vmem:[%s2294_s1 + $0x8] sm:$0xff]  ;;  %v165_v23 = vld [vmem:[%s2296_s3 + $0x78] sm:$0xff]  ;;  %v164_v24 = vld [vmem:[%s2296_s3 + $0x70] sm:$0xff] }
   0xe   :  { %1196 = vmatpush.msra.mxu3 %v165_v23  ;;  %166 = vmatpush.msra.mxu0 %v165_v23  ;;  %v234_v25 = vld [vmem:[%s2294_s1 + $0x18] sm:$0xff]  ;;  %v249_v27 = vld [vmem:[%s2295_s2 + $0x10] sm:$0xff]  ;;  %v163_v28 = vld [vmem:[%s2296_s3 + $0x68] sm:$0xff]  ;;  %v489_v43 = vsub.s32 %v1464_v20, %v1474_v22  ;;  %vm504_vm0 = vcmp.gt.s32.totalorder %v1429_v9, 1 }
   0xf   :  { %1195 = vmatpush.msra.mxu2 %v165_v23  ;;  %1194 = vmatpush.msra.mxu1 %v165_v23  ;;  %v250_v26 = vld [vmem:[%s2295_s2 + $0x18] sm:$0xff]  ;;  %v162_v29 = vld [vmem:[%s2296_s3 + $0x60] sm:$0xff]  ;;  %v236_v32 = vld [vmem:[%s2294_s1 + $0x28] sm:$0xff]  ;;  %v490_v44 = vsub.s32 %v249_v27, %v1469_v21  ;;  %v505_v54 = vsel %vm504_vm0, %v1429_v9, 1 }
  0x10   :  { %83 = vperm.xlu2 %1250, %v56_v5   ;;  %1199 = vmatpush.msra.mxu3 %v164_v24  ;;  %v161_v30 = vld [vmem:[%s2296_s3 + $0x58] sm:$0xff]  ;;  %v251_v31 = vld [vmem:[%s2295_s2 + $0x20] sm:$0xff]  ;;  %v160_v34 = vld [vmem:[%s2296_s3 + $0x50] sm:$0xff]  ;;  %v491_v46 = vsub.s32 %v250_v26, %v234_v25  ;;  %vm506_vm1 = vcmp.gt.s32.totalorder %v489_v43, 1  ;;  %v1565_v59 = vcvt.s32.f32 %v505_v54 }
  0x11   :  { %98 = vperm.xlu1 %1249, %v61_v4   ;;  %95 = vperm.xlu0 %1248, %v60_v6   ;;  %v235_v33 = vld [vmem:[%s2294_s1 + $0x20] sm:$0xff]  ;;  %v159_v35 = vld [vmem:[%s2296_s3 + $0x48] sm:$0xff]  ;;  %v157_v37 = vld [vmem:[%s2296_s3 + $0x38] sm:$0xff]  ;;  %vm508_vm2 = vcmp.gt.s32.totalorder %v490_v44, 1  ;;  %v507_v55 = vsel %vm506_vm1, %v489_v43, 1 }
  0x12   :  { %167 = vmatpush.msra.mxu0 %v164_v24  ;;  %1198 = vmatpush.msra.mxu2 %v164_v24  ;;  %v158_v36 = vld [vmem:[%s2296_s3 + $0x40] sm:$0xff]  ;;  %v237_v38 = vld [vmem:[%s2294_s1 + $0x30] sm:$0xff]  ;;  %v252_v40 = vld [vmem:[%s2295_s2 + $0x28] sm:$0xff]  ;;  %v492_v48 = vsub.s32 %v251_v31, %v235_v33  ;;  %vm510_vm3 = vcmp.gt.s32.totalorder %v491_v46, 1  ;;  %v509_v58 = vsel %vm508_vm2, %v490_v44, 1  ;;  %v1570_v62 = vcvt.s32.f32 %v507_v55 }
  0x13   :  { %1197 = vmatpush.msra.mxu1 %v164_v24  ;;  %1202 = vmatpush.msra.mxu3 %v163_v28  ;;  %v253_v39 = vld [vmem:[%s2295_s2 + $0x30] sm:$0xff]  ;;  %v155_v42 = vld [vmem:[%s2296_s3 + $0x28] sm:$0xff]  ;;  %v154_v45 = vld [vmem:[%s2296_s3 + $0x20] sm:$0xff]  ;;  %v493_v51 = vsub.s32 %v252_v40, %v236_v32  ;;  %v511_v60 = vsel %vm510_vm3, %v491_v46, 1  ;;  %v1572_v0 = vcvt.s32.f32 %v509_v58  ;;  %1254 = vrcp.f32 %v1565_v59 }
  0x14   :  { %168 = vmatpush.msra.mxu0 %v163_v28  ;;  %1201 = vmatpush.msra.mxu2 %v163_v28  ;;  %v156_v41 = vld [vmem:[%s2296_s3 + $0x30] sm:$0xff]  ;;  %v153_v47 = vld [vmem:[%s2296_s3 + $0x18] sm:$0xff]  ;;  %v239_v50 = vld [vmem:[%s2294_s1 + $0x40] sm:$0xff]  ;;  %vm512_vm4 = vcmp.gt.s32.totalorder %v492_v48, 1  ;;  %v494_v56 = vsub.s32 %v253_v39, %v237_v38  ;;  %v1583_v5 = vcvt.s32.f32 %v511_v60  ;;  %1256 = vrcp.f32 %v1570_v62 }
  0x15   :  { %1200 = vmatpush.msra.mxu1 %v163_v28  ;;  %1205 = vmatpush.msra.mxu3 %v162_v29  ;;  %v254_v49 = vld [vmem:[%s2295_s2 + $0x38] sm:$0xff]  ;;  %v152_v53 = vld [vmem:[%s2296_s3 + $0x10] sm:$0xff]  ;;  %v151_v57 = vld [vmem:[%s2296_s3 + $0x8] sm:$0xff]  ;;  %vm514_vm5 = vcmp.gt.s32.totalorder %v493_v51, 1  ;;  %v513_v63 = vsel %vm512_vm4, %v492_v48, 1  ;;  %1258 = vrcp.f32 %v1572_v0  ;;  %v68_v24 = vlaneseq }
  0x16   :  { %169 = vmatpush.msra.mxu0 %v162_v29  ;;  %1204 = vmatpush.msra.mxu2 %v162_v29  ;;  %v238_v52 = vld [vmem:[%s2294_s1 + $0x38] sm:$0xff]  ;;  %v150_v61 = vld [vmem:[%s2296_s3] sm:$0xff]  ;;  %v515_v1 = vsel %vm514_vm5, %v493_v51, 1  ;;  %vm516_vm6 = vcmp.gt.s32.totalorder %v494_v56, 1  ;;  %v240_v3 = vld [vmem:[%s2294_s1 + $0x48] sm:$0xff]  ;;  %1260 = vrcp.f32 %v1583_v5  ;;  %v1342_v55 = vmov 1.0  }
  0x17   :  { %1203 = vmatpush.msra.mxu1 %v162_v29  ;;  %1208 = vmatpush.msra.mxu3 %v161_v30  ;;  %v255_v2 = vld [vmem:[%s2295_s2 + $0x40] sm:$0xff]  ;;  %v256_v4 = vld [vmem:[%s2295_s2 + $0x48] sm:$0xff]  ;;  %v495_v6 = vsub.s32 %v254_v49, %v238_v52  ;;  %v1665_v43 = vand.u32 127, %v68_v24  ;;  %v1676_v46 = vld [vmem:[%s2295_s2 + $0x78] sm:$0xff]  ;;  %vm557_vm1 = vweird.f32 %v1565_v59  ;;  %vm571_vm4 = vweird.f32 %v1570_v62 }
  0x18   :  { %71 = vperm.xlu2 %1250, %v52_v11   ;;  %170 = vmatpush.msra.mxu0 %v161_v30  ;;  %v497_v9 = vsub.s32 %v256_v4, %v240_v3  ;;  %v517_v11 = vsel %vm516_vm6, %v494_v56, 1  ;;  %vm585_vm6 = vweird.f32 %v1572_v0 }
  0x19   :  { %116 = vperm.xlu1 %1249, %v67_v10   ;;  %101 = vperm.xlu0 %1248, %v62_v12   ;;  %v1589_v10 = vcvt.s32.f32 %v515_v1  ;;  %v241_v12 = vld [vmem:[%s2294_s1 + $0x50] sm:$0xff]  ;;  %vm518_vm7 = vcmp.gt.s32.totalorder %v495_v6, 1 }
  0x1a   :  { %1207 = vmatpush.msra.mxu2 %v161_v30  ;;  %1206 = vmatpush.msra.mxu1 %v161_v30  ;;  %vm522_vm9 = vcmp.gt.s32.totalorder %v497_v9, 1 }
  0x1b   :  { %1211 = vmatpush.msra.mxu3 %v160_v34  ;;  %171 = vmatpush.msra.mxu0 %v160_v34  ;;  %v523_v29 = vsel %vm522_vm9, %v497_v9, 1 }
  0x1c   :  { %1210 = vmatpush.msra.mxu2 %v160_v34  ;;  %1209 = vmatpush.msra.mxu1 %v160_v34 }
  0x1d   :  { %1214 = vmatpush.msra.mxu3 %v159_v35  ;;  %172 = vmatpush.msra.mxu0 %v159_v35 }
  0x1e   :  { %1213 = vmatpush.msra.mxu2 %v159_v35  ;;  %1212 = vmatpush.msra.mxu1 %v159_v35 }
  0x1f   :  { %1217 = vmatpush.msra.mxu3 %v158_v36  ;;  %173 = vmatpush.msra.mxu0 %v158_v36 }
  0x20   :  { %74 = vperm.xlu2 %1250, %v53_v14   ;;  %1216 = vmatpush.msra.mxu2 %v158_v36 }
  0x21   :  { %104 = vperm.xlu1 %1249, %v63_v13   ;;  %86 = vperm.xlu0 %1248, %v57_v15   ;;  %v257_v13 = vld [vmem:[%s2295_s2 + $0x50] sm:$0xff]  ;;  %v242_v15 = vld [vmem:[%s2294_s1 + $0x58] sm:$0xff] }
  0x22   :  { %1220 = vmatpush.msra.mxu3 %v157_v37  ;;  %1215 = vmatpush.msra.mxu1 %v158_v36  ;;  %v498_v14 = vsub.s32 %v257_v13, %v241_v12 }
  0x23   :  { %174 = vmatpush.msra.mxu0 %v157_v37  ;;  %1219 = vmatpush.msra.mxu2 %v157_v37 }
  0x24   :  { %1223 = vmatpush.msra.mxu3 %v156_v41  ;;  %1218 = vmatpush.msra.mxu1 %v157_v37  ;;  %vm524_vm10 = vcmp.gt.s32.totalorder %v498_v14, 1 }
  0x25   :  { %175 = vmatpush.msra.mxu0 %v156_v41  ;;  %1222 = vmatpush.msra.mxu2 %v156_v41 }
  0x26   :  { %1226 = vmatpush.msra.mxu3 %v155_v42  ;;  %1221 = vmatpush.msra.mxu1 %v156_v41 }
  0x27   :  { %176 = vmatpush.msra.mxu0 %v155_v42  ;;  %1225 = vmatpush.msra.mxu2 %v155_v42 }
  0x28   :  { %92 = vperm.xlu2 %1250, %v59_v17   ;;  %1229 = vmatpush.msra.mxu3 %v154_v45 }
  0x29   :  { %77 = vperm.xlu1 %1249, %v54_v16   ;;  %89 = vperm.xlu0 %1248, %v58_v18   ;;  %v1605_v16 = vld [vmem:[%s2295_s2 + $0x58] sm:$0xff] }
  0x2a   :  { %1232 = vmatpush.msra.mxu3 %v153_v47  ;;  %1224 = vmatpush.msra.mxu1 %v155_v42  ;;  %v499_v18 = vsub.s32 %v1605_v16, %v242_v15  ;;  %v1663_v42 = vcvt.s32.f32 %v523_v29  ;;  %v575_v29 = vand.u32 2147483647, %v1570_v62 }
  0x2b   :  { %177 = vmatpush.msra.mxu0 %v154_v45  ;;  %1228 = vmatpush.msra.mxu2 %v154_v45 }
  0x2c   :  { %1235 = vmatpush.msra.mxu3 %v152_v53  ;;  %1227 = vmatpush.msra.mxu1 %v154_v45  ;;  %vm526_vm11 = vcmp.gt.s32.totalorder %v499_v18, 1  ;;  %v1671_v45 = vld [vmem:[%s2294_s1 + $0x78] sm:$0xff] }
  0x2d   :  { %178 = vmatpush.msra.mxu0 %v153_v47  ;;  %1231 = vmatpush.msra.mxu2 %v153_v47  ;;  %v527_v44 = vsel %vm526_vm11, %v499_v18, 1 }
  0x2e   :  { %1238 = vmatpush.msra.mxu3 %v151_v57  ;;  %1230 = vmatpush.msra.mxu1 %v153_v47 }
  0x2f   :  { %179 = vmatpush.msra.mxu0 %v152_v53  ;;  %1234 = vmatpush.msra.mxu2 %v152_v53 }
  0x30   :  { %328 = vperm.xlu2 %1250, %v247_v8   ;;  %1241 = vmatpush.msra.mxu3 %v150_v61  ;;  %v1586_v8 = vcvt.s32.f32 %v513_v63 }
  0x31   :  { %264 = vperm.xlu1 %1249, %v231_v7   ;;  %80 = vperm.xlu0 %1248, %v55_v19   ;;  %v496_v7 = vsub.s32 %v255_v2, %v239_v50  ;;  %v1612_v19 = vcvt.s32.f32 %v517_v11 }
  0x32   :  { %1233 = vmatpush.msra.mxu1 %v152_v53  ;;  %180 = vmatpush.msra.mxu0 %v151_v57  ;;  %1262 = vrcp.f32 %v1586_v8  ;;  %v1690_v53 = vcvt.s32.f32 %v527_v44 }
  0x33   :  { %vm520_vm8 = vcmp.gt.s32.totalorder %v496_v7, 1  ;;  %1237 = vmatpush.msra.mxu2 %v151_v57  ;;  %1264 = vrcp.f32 %v1589_v10 }
  0x34   :  { %1236 = vmatpush.msra.mxu1 %v151_v57  ;;  %181 = vmatpush.msra.mxu0 %v150_v61  ;;  %v521_v23 = vsel %vm520_vm8, %v496_v7, 1  ;;  %1266 = vrcp.f32 %v1612_v19  ;;  %v563_v7 = vand.u32 2147483648, %v1565_v59 }
  0x35   :  { %1240 = vmatpush.msra.mxu2 %v150_v61 }
  0x36   :  { %1239 = vmatpush.msra.mxu1 %v150_v61 }
  0x38   :  { %270 = vperm.xlu2 %1250, %v1469_v21   ;;  %v1618_v21 = vpop.eup %1254 }
  0x39   :  { %331 = vperm.xlu1 %1249, %v1464_v20   ;;  %267 = vperm.xlu0 %1248, %v1474_v22   ;;  %v243_v20 = vld [vmem:[%s2294_s1 + $0x60] sm:$0xff]  ;;  %v519_v22 = vsel %vm518_vm7, %v495_v6, 1  ;;  %v1633_v28 = vpop.eup %1256  ;;  %vm558_vm2 = vweird.f32 %v1618_v21 }
  0x3a   :  { %v1647_v34 = vpop.eup %1258  ;;  %v1654_v37 = vcvt.s32.f32 %v519_v22  ;;  %v567_v47 = vmul.f32 %v1633_v28, %v1570_v62  ;;  %vm572_vm5 = vweird.f32 %v1633_v28  ;;  %v561_v22 = vand.u32 2147483647, %v1565_v59  ;;  %vm1736_vm8 = vmor %vm557_vm1, %vm558_vm2 }
  0x3b   :  { %v1652_v36 = vpop.eup %1260  ;;  %v581_v51 = vmul.f32 %v1647_v34, %v1572_v0  ;;  %vm586_vm7 = vweird.f32 %v1647_v34  ;;  %vm1751_vm9 = vmor %vm571_vm4, %vm572_vm5  ;;  %vm613_vm4 = vweird.f32 %v1586_v8 }
  0x3c   :  { %v1661_v41 = vpop.eup %1262  ;;  %1268 = vrcp.f32 %v1654_v37  ;;  %v568_v60 = vsub.f32 1.0, %v567_v47  ;;  %vm1776_vm11 = vcmp.eq.f32.partialorder %v561_v22, 8.507059e+37  ;;  %vm600_vm1 = vweird.f32 %v1652_v36 }
  0x3d   :  { %v1680_v48 = vpop.eup %1264  ;;  %v582_v63 = vsub.f32 1.0, %v581_v51  ;;  %vm614_vm5 = vweird.f32 %v1661_v41 }
  0x3e   :  { %v1693_v56 = vpop.eup %1266  ;;  %v569_v9 = vmul.f32 %v1633_v28, %v568_v60 }
  0x40   :  { %337 = vperm.xlu2 %1250, %v250_v26   ;;  %v1626_v26 = vld [vmem:[%s2294_s1 + $0x68] sm:$0xff] }
  0x41   :  { %273 = vperm.xlu1 %1249, %v234_v25   ;;  %334 = vperm.xlu0 %1248, %v249_v27   ;;  %v259_v25 = vld [vmem:[%s2295_s2 + $0x60] sm:$0xff]  ;;  %v1631_v27 = vld [vmem:[%s2295_s2 + $0x68] sm:$0xff] }
  0x42   :  { %v500_v30 = vsub.s32 %v259_v25, %v243_v20  ;;  %v1709_v11 = vpop.eup %1268 }
  0x44   :  { %vm528_vm12 = vcmp.gt.s32.totalorder %v500_v30, 1 }
  0x45   :  { %v529_v57 = vsel %vm528_vm12, %v500_v30, 1  ;;  %v609_v30 = vmul.f32 %v1661_v41, %v1586_v8  ;;  %vm1784_vm12 = vcmp.eq.f32.partialorder %v575_v29, 8.507059e+37 }
  0x46   :  { %v1699_v1 = vcvt.s32.f32 %v529_v57 }
  0x48   :  { %279 = vperm.xlu2 %1250, %v236_v32   ;;  %v1640_v32 = vld [vmem:[%s2294_s1 + $0x70] sm:$0xff] }
  0x49   :  { %340 = vperm.xlu1 %1249, %v251_v31   ;;  %276 = vperm.xlu0 %1248, %v235_v33   ;;  %v501_v31 = vsub.s32 %v1631_v27, %v1626_v26  ;;  %v1645_v33 = vld [vmem:[%s2295_s2 + $0x70] sm:$0xff] }
  0x4a   :  { %v502_v35 = vsub.s32 %v1645_v33, %v1640_v32 }
  0x4b   :  { %vm530_vm13 = vcmp.gt.s32.totalorder %v501_v31, 1 }
  0x4c   :  { %vm532_vm15 = vcmp.gt.s32.totalorder %v502_v35, 1  ;;  %v531_v58 = vsel %vm530_vm13, %v501_v31, 1 }
  0x4d   :  { %v533_v61 = vsel %vm532_vm15, %v502_v35, 1 }
  0x50   :  { %346 = vperm.xlu2 %1250, %v253_v39   ;;  %v525_v39 = vsel %vm524_vm10, %v498_v14, 1  ;;  %v595_v14 = vmul.f32 %v1652_v36, %v1583_v5  ;;  %vm1764_vm10 = vmor %vm585_vm6, %vm586_vm7  ;;  %vm627_vm6 = vweird.f32 %v1589_v10  ;;  %vm628_vm7 = vweird.f32 %v1680_v48 }
  0x51   :  { %282 = vperm.xlu1 %1249, %v237_v38   ;;  %343 = vperm.xlu0 %1248, %v252_v40   ;;  %v1656_v38 = vcvt.s32.f32 %v521_v23  ;;  %v553_v40 = vmul.f32 %v1618_v21, %v1565_v59 }
  0x53   :  { %v554_v54 = vsub.f32 1.0, %v553_v40  ;;  %1270 = vrcp.f32 %v1656_v38  ;;  %v596_v40 = vsub.f32 1.0, %v595_v14 }
  0x54   :  { %1272 = vrcp.f32 %v1663_v42 }
  0x58   :  { %288 = vperm.xlu2 %1250, %v239_v50   ;;  %v503_v50 = vsub.s32 %v1676_v46, %v1671_v45 }
  0x59   :  { %349 = vperm.xlu1 %1249, %v254_v49   ;;  %285 = vperm.xlu0 %1248, %v238_v52   ;;  %v1686_v52 = vcvt.s32.f32 %v525_v39  ;;  %v591_v39 = vand.u32 2147483648, %v1572_v0 }
  0x5a   :  { %vm534_vm0 = vcmp.gt.s32.totalorder %v503_v50, 1 }
  0x5b   :  { %1274 = vrcp.f32 %v1686_v52  ;;  %v535_v6 = vsel %vm534_vm0, %v503_v50, 1  ;;  %vm599_vm0 = vweird.f32 %v1583_v5 }
  0x5c   :  { %1276 = vrcp.f32 %v1690_v53  ;;  %v1758_v44 = vcvt.s32.f32 %v535_v6  ;;  %vm1821_vm2 = vmor %vm599_vm0, %vm600_vm1 }
  0x5d   :  { %1278 = vrcp.f32 %v1699_v1 }
  0x60   :  { %355 = vperm.xlu2 %1250, %v256_v4   ;;  %v1705_v4 = vcvt.s32.f32 %v533_v61 }
  0x61   :  { %291 = vperm.xlu1 %1249, %v240_v3   ;;  %352 = vperm.xlu0 %1248, %v255_v2   ;;  %v1701_v2 = vcvt.s32.f32 %v531_v58  ;;  %v555_v3 = vmul.f32 %v1618_v21, %v554_v54  ;;  %v564_v54 = vor.u32 1.1754944e-38, %v563_v7  ;;  %v603_v7 = vand.u32 2147483647, %v1583_v5 }
  0x62   :  { %v1608_v17 = vpop.permute.xlu2 %113 }
  0x63   :  { %1280 = vrcp.f32 %v1701_v2 }
  0x64   :  { %1282 = vrcp.f32 %v1705_v4 }
  0x65   :  { %1284 = vrcp.f32 %v1758_v44 }
  0x68   :  { %297 = vperm.xlu2 %1250, %v242_v15   ;;  %v1716_v15 = vpop.eup %1270 }
  0x69   :  { %358 = vperm.xlu1 %1249, %v257_v13   ;;  %294 = vperm.xlu0 %1248, %v241_v12   ;;  %v583_v13 = vmul.f32 %v1647_v34, %v582_v63  ;;  %v1722_v18 = vpop.eup %1272  ;;  %v597_v63 = vmul.f32 %v1652_v36, %v596_v40  ;;  %v665_v40 = vmul.f32 %v1716_v15, %v1656_v38 }
  0x6a   :  { %v84_v49 = vpop.permute.xlu2 %83  ;;  %v1729_v23 = vpop.eup %1274 }
  0x6b   :  { %vm122_vm14 = vcmp.eq.s32.totalorder %v1665_v43, %v84_v49  ;;  %v1744_v31 = vpop.eup %1276  ;;  %v584_v35 = vadd.f32 %v1647_v34, %v583_v13  ;;  %v623_v49 = vmul.f32 %v1680_v48, %v1589_v10  ;;  %v598_v24 = vadd.f32 %v1652_v36, %v597_v63 }
  0x6c   :  { %1166 = vmatmul.msk.f32.vlgmr.msra.gmra.mxu1 %vm122_vm14, %v1342_v55 }
  0x6d   :  { %v588_v61 = vsel %vm1764_vm10, %v1647_v34, %v584_v35  ;;  %v617_v35 = vand.u32 2147483647, %v1586_v8  ;;  %vm641_vm10 = vweird.f32 %v1612_v19 }
  0x70   :  { %364 = vperm.xlu2 %1250, %v259_v25   ;;  %v570_v25 = vadd.f32 %v1633_v28, %v569_v9  ;;  %v624_v9 = vsub.f32 1.0, %v623_v49 }
  0x71   :  { %300 = vperm.xlu1 %1249, %v243_v20   ;;  %361 = vperm.xlu0 %1248, %v1605_v16   ;;  %v577_v16 = vand.u32 2147483648, %v1570_v62  ;;  %v556_v20 = vadd.f32 %v1618_v21, %v555_v3  ;;  %v589_v62 = vand.u32 2147483647, %v1572_v0  ;;  %v1797_v3 = vpop.eup %1278 }
  0x72   :  { %v72_v12 = vpop.permute.xlu2 %71  ;;  %v574_v0 = vsel %vm1751_vm9, %v1633_v28, %v570_v25  ;;  %v605_v28 = vand.u32 2147483648, %v1583_v5  ;;  %v651_v25 = vmul.f32 %v1709_v11, %v1654_v37  ;;  %v625_v59 = vmul.f32 %v1680_v48, %v624_v9  ;;  %vm1856_vm9 = vmor %vm613_vm4, %vm614_vm5 }
  0x73   :  { %vm118_vm3 = vcmp.eq.s32.totalorder %v1665_v43, %v72_v12  ;;  %v560_v50 = vsel %vm1736_vm8, %v1618_v21, %v556_v20  ;;  %v578_v57 = vor.u32 1.1754944e-38, %v577_v16  ;;  %v637_v21 = vmul.f32 %v1693_v56, %v1612_v19  ;;  %v1801_v12 = vpop.eup %1280 }
  0x74   :  { %1162 = vmatmul.msk.f32.vlgmr.msra.gmra.mxu0 %vm118_vm3, %v1342_v55  ;;  %vm590_vm14 = vcmp.eq.f32.partialorder %v589_v62, 8.507059e+37  ;;  %v1808_v34 = vpop.eup %1282  ;;  %v1813_v13 = vsel %vm1776_vm11, %v564_v54, %v560_v50  ;;  %v606_v5 = vor.u32 1.1754944e-38, %v605_v28  ;;  %vm1825_vm3 = vcmp.eq.f32.partialorder %v603_v7, 8.507059e+37 }
  0x75   :  { %v579_v14 = vsel %vm1784_vm12, %v578_v57, %v574_v0  ;;  %v638_v20 = vsub.f32 1.0, %v637_v21  ;;  %v631_v62 = vand.u32 2147483647, %v1589_v10  ;;  %v602_v50 = vsel %vm1821_vm2, %v1652_v36, %v598_v24 }
  0x76   :  { %v652_v51 = vsub.f32 1.0, %v651_v25  ;;  %v626_v0 = vadd.f32 %v1680_v48, %v625_v59  ;;  %vm642_vm11 = vweird.f32 %v1693_v56  ;;  %v647_v36 = vand.u32 2147483648, %v1612_v19 }
  0x77   :  { %vm132_vm12 = vcmp.eq.s32.totalorder %v1665_v43, %v1608_v17  ;;  %v666_v21 = vsub.f32 1.0, %v665_v40  ;;  %vm1885_vm0 = vcmp.eq.f32.partialorder %v631_v62, 8.507059e+37  ;;  %v607_v63 = vsel %vm1825_vm3, %v606_v5, %v602_v50  ;;  %vm1901_vm1 = vmor %vm641_vm10, %vm642_vm11 }
  0x78   :  { %306 = vperm.xlu2 %1250, %v1640_v32   ;;  %v610_v32 = vsub.f32 1.0, %v609_v30  ;;  %v693_v7 = vmul.f32 %v1729_v23, %v1686_v52  ;;  %vm655_vm3 = vweird.f32 %v1654_v37  ;;  %vm656_vm4 = vweird.f32 %v1709_v11 }
  0x79   :  { %367 = vperm.xlu1 %1249, %v1631_v27   ;;  %303 = vperm.xlu0 %1248, %v1626_v26   ;;  %v592_v26 = vor.u32 1.1754944e-38, %v591_v39  ;;  %v619_v39 = vand.u32 2147483648, %v1586_v8  ;;  %v667_v24 = vmul.f32 %v1716_v15, %v666_v21  ;;  %v661_v5 = vand.u32 2147483648, %v1654_v37 }
  0x7a   :  { %v75_v60 = vpop.permute.xlu2 %74  ;;  %v611_v16 = vmul.f32 %v1661_v41, %v610_v32  ;;  %v645_v32 = vand.u32 2147483647, %v1612_v19  ;;  %vm669_vm5 = vweird.f32 %v1656_v38  ;;  %v694_v29 = vsub.f32 1.0, %v693_v7 }
  0x7b   :  { %v1790_v58 = vpop.permute.xlu1 %110  ;;  %v108_v6 = vpop.permute.xlu0 %107  ;;  %vm119_vm13 = vcmp.eq.s32.totalorder %v1665_v43, %v75_v60  ;;  %v593_v22 = vsel %vm590_vm14, %v592_v26, %v588_v61  ;;  %vm1867_vm14 = vcmp.eq.f32.partialorder %v617_v35, 8.507059e+37  ;;  %v620_v60 = vor.u32 1.1754944e-38, %v619_v39 }
  0x7c   :  { %vm130_vm15 = vcmp.eq.s32.totalorder %v1665_v43, %v108_v6  ;;  %1163 = vmatmul.msk.f32.gmra.mxu0 %vm119_vm13, %v1342_v55  ;;  %v612_v47 = vadd.f32 %v1661_v41, %v611_v16  ;;  %vm131_vm8 = vcmp.eq.s32.totalorder %v1665_v43, %v1790_v58  ;;  %v679_v26 = vmul.f32 %v1722_v18, %v1663_v42 }
  0x7d   :  { %1174 = vmatmul.msk.f32.vlgmr.msra.gmra.mxu3 %vm130_vm15, %v1342_v55  ;;  %vm1875_vm15 = vmor %vm627_vm6, %vm628_vm7  ;;  %v653_v6 = vmul.f32 %v1709_v11, %v652_v51  ;;  %vm1912_vm2 = vcmp.eq.f32.partialorder %v645_v32, 8.507059e+37  ;;  %vm670_vm6 = vweird.f32 %v1716_v15  ;;  %v707_v30 = vmul.f32 %v1744_v31, %v1690_v53 }
  0x7e   :  { %v616_v28 = vsel %vm1856_vm9, %v1661_v41, %v612_v47  ;;  %v630_v9 = vsel %vm1875_vm15, %v1680_v48, %v626_v0  ;;  %v659_v41 = vand.u32 2147483647, %v1654_v37  ;;  %vm1939_vm7 = vmor %vm655_vm3, %vm656_vm4  ;;  %v675_v40 = vand.u32 2147483648, %v1656_v38 }
  0x7f   :  { %v654_v25 = vadd.f32 %v1709_v11, %v653_v6  ;;  %v621_v59 = vsel %vm1867_vm14, %v620_v60, %v616_v28  ;;  %v668_v62 = vadd.f32 %v1716_v15, %v667_v24  ;;  %v662_v37 = vor.u32 1.1754944e-38, %v661_v5  ;;  %vm1962_vm10 = vmor %vm669_vm5, %vm670_vm6 }
  0x80   :  { %373 = vperm.xlu2 %1250, %v1676_v46   ;;  %v1844_v46 = vpop.eup %1284  ;;  %v689_v51 = vand.u32 2147483648, %v1663_v42  ;;  %vm683_vm11 = vweird.f32 %v1663_v42  ;;  %v708_v57 = vsub.f32 1.0, %v707_v30  ;;  %v701_v0 = vand.u32 2147483647, %v1686_v52 }
  0x81   :  { %309 = vperm.xlu1 %1249, %v1671_v45   ;;  %370 = vperm.xlu0 %1248, %v1645_v33   ;;  %v639_v45 = vmul.f32 %v1693_v56, %v638_v20  ;;  %v633_v33 = vand.u32 2147483648, %v1589_v10  ;;  %v648_v20 = vor.u32 1.1754944e-38, %v647_v36  ;;  %v658_v17 = vsel %vm1939_vm7, %v1709_v11, %v654_v25 }
  0x82   :  { %v703_v36 = vand.u32 2147483648, %v1686_v52  ;;  %v672_v27 = vsel %vm1962_vm10, %v1716_v15, %v668_v62  ;;  %vm697_vm14 = vweird.f32 %v1686_v52  ;;  %vm698_vm15 = vweird.f32 %v1729_v23 }
  0x83   :  { %v99_v49 = vpop.permute.xlu1 %98  ;;  %v96_v54 = vpop.permute.xlu0 %95  ;;  %v640_v10 = vadd.f32 %v1693_v56, %v639_v45  ;;  %v634_v16 = vor.u32 1.1754944e-38, %v633_v33  ;;  %v673_v45 = vand.u32 2147483647, %v1656_v38  ;;  %v687_v33 = vand.u32 2147483647, %v1663_v42 }
  0x84   :  { %vm126_vm13 = vcmp.eq.s32.totalorder %v1665_v43, %v96_v54  ;;  %vm127_vm9 = vcmp.eq.s32.totalorder %v1665_v43, %v99_v49  ;;  %v695_v54 = vmul.f32 %v1729_v23, %v694_v29  ;;  %v676_v38 = vor.u32 1.1754944e-38, %v675_v40 }
  0x85   :  { %1170 = vmatmul.msk.f32.vlgmr.msra.gmra.mxu2 %vm126_vm13, %v1342_v55  ;;  %1175 = vmatmul.msk.f32.gmra.mxu3 %vm131_vm8, %v1342_v55  ;;  %v644_v48 = vsel %vm1901_vm1, %v1693_v56, %v640_v10  ;;  %v635_v56 = vsel %vm1885_vm0, %v634_v16, %v630_v9  ;;  %vm1943_vm8 = vcmp.eq.f32.partialorder %v659_v41, 8.507059e+37  ;;  %vm674_vm13 = vcmp.eq.f32.partialorder %v673_v45, 8.507059e+37  ;;  %v887_v45 = vld [vmem:[%s2297_s4 + $0x78] sm:$0xff] }
  0x86   :  { %v649_v47 = vsel %vm1912_vm2, %v648_v20, %v644_v48  ;;  %v663_v11 = vsel %vm1943_vm8, %v662_v37, %v658_v17  ;;  %vm1985_vm0 = vcmp.eq.f32.partialorder %v687_v33, 8.507059e+37  ;;  %v690_v21 = vor.u32 1.1754944e-38, %v689_v51  ;;  %vm2005_vm2 = vmor %vm697_vm14, %vm698_vm15  ;;  %892 = vmatpush.msrb.mxu2 %v887_v45  ;;  %v883_v17 = vld [vmem:[%s2297_s4 + $0x58] sm:$0xff] }
  0x87   :  { %v696_v61 = vadd.f32 %v1729_v23, %v695_v54  ;;  %v709_v10 = vmul.f32 %v1744_v31, %v708_v57  ;;  %v677_v58 = vsel %vm674_vm13, %v676_v38, %v672_v27  ;;  %vm2009_vm3 = vcmp.eq.f32.partialorder %v701_v0, 8.507059e+37  ;;  %v93_v27 = vpop.permute.xlu2 %92 }
  0x88   :  { %788 = vperm.xlu2 %1250, %v593_v22   ;;  %v704_v7 = vor.u32 1.1754944e-38, %v703_v36  ;;  %v721_v9 = vmul.f32 %v1797_v3, %v1699_v1  ;;  %vm711_vm6 = vweird.f32 %v1690_v53  ;;  %vm712_vm7 = vweird.f32 %v1744_v31 }
  0x89   :  { %783 = vperm.xlu1 %1249, %v579_v14   ;;  %778 = vperm.xlu0 %1248, %v1813_v13   ;;  %v680_v14 = vsub.f32 1.0, %v679_v26  ;;  %v735_v26 = vmul.f32 %v1801_v12, %v1701_v2  ;;  %v715_v16 = vand.u32 2147483647, %v1690_v53  ;;  %v717_v20 = vand.u32 2147483648, %v1690_v53 }
  0x8a   :  { %v700_v41 = vsel %vm2005_vm2, %v1729_v23, %v696_v61  ;;  %v710_v19 = vadd.f32 %v1744_v31, %v709_v10  ;;  %vm725_vm10 = vweird.f32 %v1699_v1  ;;  %vm739_vm13 = vweird.f32 %v1701_v2 }
  0x8b   :  { %v1925_v22 = vpop.permute.xlu1 %116  ;;  %v102_v13 = vpop.permute.xlu0 %101  ;;  %v681_v50 = vmul.f32 %v1722_v18, %v680_v14  ;;  %v736_v24 = vsub.f32 1.0, %v735_v26  ;;  %v722_v14 = vsub.f32 1.0, %v721_v9  ;;  %vm740_vm15 = vweird.f32 %v1801_v12 }
  0x8c   :  { %vm128_vm4 = vcmp.eq.s32.totalorder %v1665_v43, %v102_v13  ;;  %vm133_vm8 = vcmp.eq.s32.totalorder %v1665_v43, %v1925_v22  ;;  %v718_v22 = vor.u32 1.1754944e-38, %v717_v20  ;;  %v763_v35 = vmul.f32 %v1844_v46, %v1758_v44 }
  0x8d   :  { %1171 = vmatmul.msk.f32.gmra.mxu2 %vm127_vm9, %v1342_v55  ;;  %1176 = vmatmul.msk.f32.gmra.mxu3 %vm132_vm12, %v1342_v55  ;;  %vm684_vm12 = vweird.f32 %v1722_v18  ;;  %v682_v8 = vadd.f32 %v1722_v18, %v681_v50  ;;  %vm2033_vm9 = vmor %vm711_vm6, %vm712_vm7  ;;  %v737_v30 = vmul.f32 %v1801_v12, %v736_v24  ;;  %vm753_vm2 = vweird.f32 %v1705_v4 }
  0x8e   :  { %vm1993_vm1 = vmor %vm683_vm11, %vm684_vm12  ;;  %vm2042_vm11 = vcmp.eq.f32.partialorder %v715_v16, 8.507059e+37  ;;  %vm726_vm12 = vweird.f32 %v1797_v3  ;;  %v714_v29 = vsel %vm2033_vm9, %v1744_v31, %v710_v19  ;;  %v731_v39 = vand.u32 2147483648, %v1699_v1 }
  0x8f   :  { %v686_v52 = vsel %vm1993_vm1, %v1722_v18, %v682_v8  ;;  %v705_v18 = vsel %vm2009_vm3, %v704_v7, %v700_v41  ;;  %vm754_vm3 = vweird.f32 %v1808_v34  ;;  %v719_v31 = vsel %vm2042_vm11, %v718_v22, %v714_v29  ;;  %vm2092_vm6 = vmor %vm725_vm10, %vm726_vm12  ;;  %v329_v5 = vpop.permute.xlu2 %328 }
  0x90   :  { %803 = vperm.xlu2 %1250, %v635_v56   ;;  %v691_v53 = vsel %vm1985_vm0, %v690_v21, %v686_v52  ;;  %v723_v56 = vmul.f32 %v1797_v3, %v722_v14  ;;  %v745_v40 = vand.u32 2147483648, %v1701_v2  ;;  %v738_v62 = vadd.f32 %v1801_v12, %v737_v30 }
  0x91   :  { %798 = vperm.xlu1 %1249, %v621_v59   ;;  %793 = vperm.xlu0 %1248, %v607_v63   ;;  %v749_v63 = vmul.f32 %v1808_v34, %v1705_v4  ;;  %v743_v37 = vand.u32 2147483647, %v1701_v2  ;;  %v757_v50 = vand.u32 2147483647, %v1705_v4  ;;  %v729_v51 = vand.u32 2147483647, %v1699_v1 }
  0x92   :  { %v724_v33 = vadd.f32 %v1797_v3, %v723_v56  ;;  %v764_v54 = vsub.f32 1.0, %v763_v35  ;;  %v732_v57 = vor.u32 1.1754944e-38, %v731_v39  ;;  %v746_v38 = vor.u32 1.1754944e-38, %v745_v40 }
  0x93   :  { %v105_v60 = vpop.permute.xlu1 %104  ;;  %v87_v28 = vpop.permute.xlu0 %86  ;;  %v750_v48 = vsub.f32 1.0, %v749_v63  ;;  %vm744_vm7 = vcmp.eq.f32.partialorder %v743_v37, 8.507059e+37  ;;  %vm730_vm9 = vcmp.eq.f32.partialorder %v729_v51, 8.507059e+37  ;;  %vm125_vm10 = vcmp.eq.s32.totalorder %v1665_v43, %v93_v27  ;;  %v886_v37 = vld [vmem:[%s2297_s4 + $0x70] sm:$0xff] }
  0x94   :  { %vm123_vm5 = vcmp.eq.s32.totalorder %v1665_v43, %v87_v28  ;;  %vm129_vm0 = vcmp.eq.s32.totalorder %v1665_v43, %v105_v60  ;;  %v765_v8 = vmul.f32 %v1844_v46, %v764_v54  ;;  %vm767_vm12 = vweird.f32 %v1758_v44  ;;  %893 = vmatpush.msrb.mxu2 %v886_v37  ;;  %v882_v54 = vld [vmem:[%s2297_s4 + $0x50] sm:$0xff] }
  0x95   :  { %1167 = vmatmul.msk.f32.gmra.mxu1 %vm123_vm5, %v1342_v55  ;;  %1172 = vmatmul.msk.f32.gmra.mxu2 %vm128_vm4, %v1342_v55  ;;  %v751_v13 = vmul.f32 %v1808_v34, %v750_v48  ;;  %vm2073_vm4 = vmor %vm739_vm13, %vm740_vm15  ;;  %vm768_vm13 = vweird.f32 %v1844_v46  ;;  %v771_v60 = vand.u32 2147483647, %v1758_v44 }
  0x96   :  { %1177 = vmatmul.msk.f32.gmra.mxu3 %vm133_vm8, %v1342_v55  ;;  %vm2084_vm5 = vmor %vm753_vm2, %vm754_vm3  ;;  %vm758_vm8 = vcmp.eq.f32.partialorder %v757_v50, 8.507059e+37  ;;  %v766_v21 = vadd.f32 %v1844_v46, %v765_v8 }
  0x97   :  { %v752_v49 = vadd.f32 %v1808_v34, %v751_v13  ;;  %vm772_vm15 = vcmp.eq.f32.partialorder %v771_v60, 8.507059e+37 }
  0x98   :  { %818 = vperm.xlu2 %1250, %v677_v58  }
  0x99   :  { %813 = vperm.xlu1 %1249, %v663_v11   ;;  %808 = vperm.xlu0 %1248, %v649_v47   ;;  %v759_v47 = vand.u32 2147483648, %v1705_v4  ;;  %v742_v4 = vsel %vm2073_vm4, %v1801_v12, %v738_v62  ;;  %v756_v36 = vsel %vm2084_vm5, %v1808_v34, %v752_v49  ;;  %v728_v11 = vsel %vm2092_vm6, %v1797_v3, %v724_v33  ;;  %v885_v49 = vld [vmem:[%s2297_s4 + $0x68] sm:$0xff]  ;;  %v884_v33 = vld [vmem:[%s2297_s4 + $0x60] sm:$0xff] }
  0x9a   :  { %v747_v12 = vsel %vm744_vm7, %v746_v38, %v742_v4  ;;  %v733_v32 = vsel %vm730_vm9, %v732_v57, %v728_v11  ;;  %v773_v3 = vand.u32 2147483648, %v1758_v44  ;;  %894 = vmatpush.msrb.mxu2 %v885_v49  ;;  %v881_v57 = vld [vmem:[%s2297_s4 + $0x48] sm:$0xff]  ;;  %v880_v38 = vld [vmem:[%s2297_s4 + $0x40] sm:$0xff]  ;;  %v878_v4 = vld [vmem:[%s2297_s4 + $0x30] sm:$0xff] }
  0x9b   :  { %v78_v25 = vpop.permute.xlu1 %77  ;;  %v90_v59 = vpop.permute.xlu0 %89  ;;  %v760_v0 = vor.u32 1.1754944e-38, %v759_v47  ;;  %v876_v11 = vld [vmem:[%s2297_s4 + $0x20] sm:$0xff]  ;;  %v968_v49 = vld [vmem:[%s2299_s6 + $0x58] sm:$0xff] }
  0x9c   :  { %vm120_vm14 = vcmp.eq.s32.totalorder %v1665_v43, %v78_v25  ;;  %vm124_vm1 = vcmp.eq.s32.totalorder %v1665_v43, %v90_v59  ;;  %v774_v15 = vor.u32 1.1754944e-38, %v773_v3  ;;  %895 = vmatpush.msrb.mxu2 %v884_v33  ;;  %v873_v3 = vld [vmem:[%s2297_s4 + $0x8] sm:$0xff] }
  0x9d   :  { %1164 = vmatmul.msk.f32.gmra.mxu0 %vm120_vm14, %v1342_v55  ;;  %1168 = vmatmul.msk.f32.gmra.mxu1 %vm124_vm1, %v1342_v55  ;;  %v761_v34 = vsel %vm758_vm8, %v760_v0, %v756_v36  ;;  %vm769_vm14 = vmor %vm767_vm12, %vm768_vm13  ;;  %vm375_vm1 = vcmp.lt.s32.totalorder %v1665_v43, %v329_v5  ;;  %v879_v0 = vld [vmem:[%s2297_s4 + $0x38] sm:$0xff]  ;;  %v966_v33 = vld [vmem:[%s2299_s6 + $0x48] sm:$0xff] }
  0x9e   :  { %1173 = vmatmul.msk.f32.gmra.mxu2 %vm129_vm0, %v1342_v55  ;;  %v770_v61 = vsel %vm769_vm14, %v1844_v46, %v766_v21  ;;  %v872_v21 = vld [vmem:[%s2297_s4] sm:$0xff] }
  0x9f   :  { %v775_v10 = vsel %vm772_vm15, %v774_v15, %v770_v61  ;;  %896 = vmatpush.msrb.mxu2 %v883_v17 }
  0xa0   :  { %833 = vperm.xlu2 %1250, %v719_v31  }
  0xa1   :  { %828 = vperm.xlu1 %1249, %v705_v18   ;;  %823 = vperm.xlu0 %1248, %v691_v53   ;;  %v271_v18 = vpop.permute.xlu2 %270 }
  0xa2   :  { %vm313_vm7 = vcmp.ge.s32.totalorder %v1665_v43, %v271_v18  ;;  %897 = vmatpush.msrb.mxu2 %v882_v54 }
  0xa3   :  { %v81_v1 = vpop.permute.xlu0 %80  ;;  %v265_v24 = vpop.permute.xlu1 %264 }
  0xa4   :  { %vm121_vm11 = vcmp.eq.s32.totalorder %v1665_v43, %v81_v1  ;;  %vm311_vm0 = vcmp.ge.s32.totalorder %v1665_v43, %v265_v24  ;;  %898 = vmatpush.msrb.mxu2 %v881_v57  ;;  %v877_v1 = vld [vmem:[%s2297_s4 + $0x28] sm:$0xff]  ;;  %v964_v57 = vld [vmem:[%s2299_s6 + $0x38] sm:$0xff] }
  0xa5   :  { %1165 = vmatmul.msk.f32.gmra.mxu0 %vm121_vm11, %v1342_v55  ;;  %1169 = vmatmul.msk.f32.gmra.mxu1 %vm125_vm10, %v1342_v55  ;;  %vm391_vm2 = vmand %vm311_vm0, %vm375_vm1 }
  0xa6   :  { %899 = vmatpush.msrb.mxu2 %v880_v38  ;;  %v963_v38 = vld [vmem:[%s2299_s6 + $0x30] sm:$0xff] }
  0xa8   :  { %848 = vperm.xlu2 %1250, %v761_v34   ;;  %900 = vmatpush.msrb.mxu2 %v879_v0  ;;  %v874_v34 = vld [vmem:[%s2297_s4 + $0x10] sm:$0xff]  ;;  %v962_v0 = vld [vmem:[%s2299_s6 + $0x28] sm:$0xff] }
  0xa9   :  { %843 = vperm.xlu1 %1249, %v747_v12   ;;  %838 = vperm.xlu0 %1248, %v733_v32   ;;  %v338_v25 = vpop.permute.xlu2 %337  ;;  %v875_v12 = vld [vmem:[%s2297_s4 + $0x18] sm:$0xff] }
  0xaa   :  { %vm378_vm10 = vcmp.lt.s32.totalorder %v1665_v43, %v338_v25  ;;  %901 = vmatpush.msrb.mxu2 %v878_v4  ;;  %v961_v4 = vld [vmem:[%s2299_s6 + $0x20] sm:$0xff] }
  0xab   :  { %v268_v14 = vpop.permute.xlu0 %267  ;;  %v332_v53 = vpop.permute.xlu1 %331 }
  0xac   :  { %vm312_vm3 = vcmp.ge.s32.totalorder %v1665_v43, %v268_v14  ;;  %vm376_vm4 = vcmp.lt.s32.totalorder %v1665_v43, %v332_v53  ;;  %902 = vmatpush.msrb.mxu2 %v877_v1 }
  0xad   :  { %vm392_vm5 = vmand %vm312_vm3, %vm376_vm4 }
  0xae   :  { %903 = vmatpush.msrb.mxu2 %v876_v11 }
  0xb0   :  { %904 = vmatpush.msrb.mxu2 %v875_v12  ;;  %v958_v12 = vld [vmem:[%s2299_s6 + $0x8] sm:$0xff] }
  0xb1   :  { %853 = vperm.xlu0 %1248, %v775_v10   ;;  %v280_v13 = vpop.permute.xlu2 %279 }
  0xb2   :  { %vm316_vm0 = vcmp.ge.s32.totalorder %v1665_v43, %v280_v13  ;;  %905 = vmatpush.msrb.mxu2 %v874_v34  ;;  %v957_v34 = vld [vmem:[%s2299_s6] sm:$0xff] }
  0xb3   :  { %v335_v23 = vpop.permute.xlu0 %334  ;;  %v274_v22 = vpop.permute.xlu1 %273 }
  0xb4   :  { %vm377_vm6 = vcmp.lt.s32.totalorder %v1665_v43, %v335_v23  ;;  %vm314_vm9 = vcmp.ge.s32.totalorder %v1665_v43, %v274_v22  ;;  %906 = vmatpush.msrb.mxu2 %v873_v3 }
  0xb5   :  { %vm393_vm8 = vmand %vm313_vm7, %vm377_vm6 }
  0xb6   :  { %vm394_vm11 = vmand %vm314_vm9, %vm378_vm10  ;;  %907 = vmatpush.msrb.mxu2 %v872_v21 }
  0xb9   :  { %v347_v35 = vpop.permute.xlu2 %346 }
  0xba   :  { %vm381_vm3 = vcmp.lt.s32.totalorder %v1665_v43, %v347_v35 }
  0xbb   :  { %v277_v29 = vpop.permute.xlu0 %276  ;;  %v341_v30 = vpop.permute.xlu1 %340 }
  0xbc   :  { %vm315_vm12 = vcmp.ge.s32.totalorder %v1665_v43, %v277_v29  ;;  %vm379_vm13 = vcmp.lt.s32.totalorder %v1665_v43, %v341_v30 }
  0xbd   :  { %vm395_vm14 = vmand %vm315_vm12, %vm379_vm13 }
  0xc1   :  { %v289_v40 = vpop.permute.xlu2 %288 }
  0xc2   :  { %vm319_vm9 = vcmp.ge.s32.totalorder %v1665_v43, %v289_v40  ;;  %v970_v40 = vld [vmem:[%s2299_s6 + $0x68] sm:$0xff] }
  0xc3   :  { %v344_v59 = vpop.permute.xlu0 %343  ;;  %v283_v56 = vpop.permute.xlu1 %282 }
  0xc4   :  { %vm380_vm15 = vcmp.lt.s32.totalorder %v1665_v43, %v344_v59 }
  0xc5   :  { %vm396_vm1 = vmand %vm316_vm0, %vm380_vm15 }
  0xc9   :  { %v356_v50 = vpop.permute.xlu2 %355 }
  0xca   :  { %vm384_vm12 = vcmp.lt.s32.totalorder %v1665_v43, %v356_v50  ;;  %v967_v50 = vld [vmem:[%s2299_s6 + $0x50] sm:$0xff] }
  0xcb   :  { %v286_v31 = vpop.permute.xlu0 %285  ;;  %v350_v39 = vpop.permute.xlu1 %349 }
  0xcc   :  { %vm382_vm6 = vcmp.lt.s32.totalorder %v1665_v43, %v350_v39  ;;  %v971_v39 = vld [vmem:[%s2299_s6 + $0x70] sm:$0xff] }
  0xd1   :  { %v298_v36 = vpop.permute.xlu2 %297 }
  0xd3   :  { %v353_v47 = vpop.permute.xlu0 %352  ;;  %v292_v62 = vpop.permute.xlu1 %291 }
  0xd9   :  { %v365_v32 = vpop.permute.xlu2 %364 }
  0xdb   :  { %v295_v51 = vpop.permute.xlu0 %294  ;;  %v359_v2 = vpop.permute.xlu1 %358 }
  0xdc   :  { %vm385_vm15 = vcmp.lt.s32.totalorder %v1665_v43, %v359_v2 }
  0xe1   :  { %v307_v61 = vpop.permute.xlu2 %306 }
  0xe3   :  { %v362_v27 = vpop.permute.xlu0 %361  ;;  %v301_v8 = vpop.permute.xlu1 %300 }
  0xe9   :  { %v195_v58 = vpop.f32.mrf.mxu1 }
  0xeb   :  { %v304_v60 = vpop.permute.xlu0 %303  ;;  %v368_v15 = vpop.permute.xlu1 %367 }
  0xf1   :  { %v183_v7 = vpop.f32.mrf.mxu0 }
  0xf3   :  { %v371_v10 = vpop.permute.xlu0 %370 }
  0xf9   :  { %v186_v16 = vpop.f32.mrf.mxu0 }
 0x100   :  { %v219_v26 = vpop.f32.mrf.mxu3 }
 0x108   :  { %v207_v63 = vpop.f32.mrf.mxu2  ;;  %v222_v28 = vpop.f32.mrf.mxu3 }
 0x110   :  { %v210_v42 = vpop.f32.mrf.mxu2  ;;  %v225_v6 = vpop.f32.mrf.mxu3 }
 0x112   :  { %v198_v9 = vpop.f32.mrf.mxu1 }
 0x118   :  { %v213_v52 = vpop.f32.mrf.mxu2 }
 0x119   :  { %v228_v44 = vpop.f32.mrf.mxu3 }
 0x11a   :  { %423 = vmatpush.msrb.mxu1 %v228_v44  ;;  %v201_v20 = vpop.f32.mrf.mxu1  ;;  %v189_v41 = vpop.f32.mrf.mxu0 }
 0x11c   :  { %424 = vmatpush.msrb.mxu1 %v225_v6 }
 0x11e   :  { %425 = vmatpush.msrb.mxu1 %v222_v28  ;;  %v779_v28 = vpop.permute.xlu0 %778 }
 0x120   :  { %426 = vmatpush.msrb.mxu1 %v219_v26  ;;  %v310_v26 = vpop.permute.xlu1 %309 }
 0x121   :  { %v216_v46 = vpop.f32.mrf.mxu2 }
 0x122   :  { %427 = vmatpush.msrb.mxu1 %v216_v46  ;;  %v204_v19 = vpop.f32.mrf.mxu1  ;;  %v192_v48 = vpop.f32.mrf.mxu0 }
 0x124   :  { %428 = vmatpush.msrb.mxu1 %v213_v52 }
 0x126   :  { %429 = vmatpush.msrb.mxu1 %v210_v42 }
 0x128   :  { %430 = vmatpush.msrb.mxu1 %v207_v63  ;;  %v374_v63 = vpop.permute.xlu2 %373  ;;  %v784_v6 = vpop.permute.xlu1 %783 }
 0x12a   :  { %431 = vmatpush.msrb.mxu1 %v204_v19 }
 0x12c   :  { %432 = vmatpush.msrb.mxu1 %v201_v20  ;;  %v794_v20 = vpop.permute.xlu0 %793 }
 0x12e   :  { %433 = vmatpush.msrb.mxu1 %v198_v9 }
 0x130   :  { %434 = vmatpush.msrb.mxu1 %v195_v58  ;;  %v789_v52 = vpop.permute.xlu2 %788 }
 0x132   :  { %435 = vmatpush.msrb.mxu1 %v192_v48 }
 0x134   :  { %436 = vmatpush.msrb.mxu1 %v189_v41  ;;  %v809_v14 = vpop.permute.xlu0 %808 }
 0x136   :  { %437 = vmatpush.msrb.mxu1 %v186_v16 }
 0x138   :  { %438 = vmatpush.msrb.mxu1 %v183_v7 }
 0x139   :  { %1178 = vmatmul.msk.f32.vlgmr.msrb.gmra.mxu1 %vm391_vm2, %v1342_v55  ;;  %vm317_vm2 = vcmp.ge.s32.totalorder %v1665_v43, %v283_v56 }
 0x13a   :  { %vm397_vm4 = vmand %vm317_vm2, %vm381_vm3  ;;  %vm322_vm2 = vcmp.ge.s32.totalorder %v1665_v43, %v298_v36  ;;  %v960_v36 = vld [vmem:[%s2299_s6 + $0x18] sm:$0xff] }
 0x13c   :  { %v824_v59 = vpop.permute.xlu0 %823 }
 0x141   :  { %1179 = vmatmul.msk.f32.gmra.mxu1 %vm392_vm5, %v1342_v55  ;;  %vm318_vm5 = vcmp.ge.s32.totalorder %v1665_v43, %v286_v31  ;;  %v972_v31 = vld [vmem:[%s2299_s6 + $0x78] sm:$0xff] }
 0x142   :  { %vm398_vm7 = vmand %vm318_vm5, %vm382_vm6  ;;  %vm387_vm5 = vcmp.lt.s32.totalorder %v1665_v43, %v365_v32  ;;  %977 = vmatpush.msrb.mxu3 %v972_v31  ;;  %v1050_v31 = vld [vmem:[#allocation2 + $0x40] sm:$0xff] }
 0x144   :  { %978 = vmatpush.msrb.mxu3 %v971_v39 }
 0x146   :  { %979 = vmatpush.msrb.mxu3 %v970_v40 }
 0x149   :  { %1180 = vmatmul.msk.f32.gmra.mxu1 %vm393_vm8, %v1342_v55  ;;  %vm383_vm8 = vcmp.lt.s32.totalorder %v1665_v43, %v353_v47  ;;  %v969_v47 = vld [vmem:[%s2299_s6 + $0x60] sm:$0xff] }
 0x14a   :  { %vm399_vm10 = vmand %vm319_vm9, %vm383_vm8  ;;  %vm388_vm8 = vcmp.lt.s32.totalorder %v1665_v43, %v368_v15  ;;  %980 = vmatpush.msrb.mxu3 %v969_v47  ;;  %v1049_v47 = vld [vmem:[#allocation2 + $0x38] sm:$0xff] }
 0x14c   :  { %981 = vmatpush.msrb.mxu3 %v968_v49  ;;  %v1045_v49 = vld [vmem:[#allocation2 + $0x18] sm:$0xff] }
 0x14e   :  { %982 = vmatpush.msrb.mxu3 %v967_v50 }
 0x150   :  { %983 = vmatpush.msrb.mxu3 %v966_v33 }
 0x151   :  { %1181 = vmatmul.msk.f32.gmra.mxu1 %vm394_vm11, %v1342_v55  ;;  %vm320_vm11 = vcmp.ge.s32.totalorder %v1665_v43, %v292_v62 }
 0x152   :  { %vm400_vm13 = vmand %vm320_vm11, %vm384_vm12  ;;  %vm325_vm11 = vcmp.ge.s32.totalorder %v1665_v43, %v307_v61 }
 0x159   :  { %1182 = vmatmul.msk.f32.gmra.mxu1 %vm395_vm14, %v1342_v55  ;;  %vm321_vm14 = vcmp.ge.s32.totalorder %v1665_v43, %v295_v51  ;;  %v965_v51 = vld [vmem:[%s2299_s6 + $0x40] sm:$0xff] }
 0x15a   :  { %vm401_vm0 = vmand %vm321_vm14, %vm385_vm15  ;;  %vm390_vm14 = vcmp.lt.s32.totalorder %v1665_v43, %v374_v63  ;;  %984 = vmatpush.msrb.mxu3 %v965_v51  ;;  %v1044_v51 = vld [vmem:[#allocation2 + $0x10] sm:$0xff] }
 0x15c   :  { %985 = vmatpush.msrb.mxu3 %v964_v57 }
 0x15e   :  { %986 = vmatpush.msrb.mxu3 %v963_v38 }
 0x160   :  { %987 = vmatpush.msrb.mxu3 %v962_v0 }
 0x161   :  { %1183 = vmatmul.msk.f32.gmra.mxu1 %vm396_vm1, %v1342_v55  ;;  %vm386_vm1 = vcmp.lt.s32.totalorder %v1665_v43, %v362_v27  ;;  %v839_v27 = vpop.permute.xlu0 %838 }
 0x162   :  { %vm402_vm3 = vmand %vm322_vm2, %vm386_vm1  ;;  %988 = vmatpush.msrb.mxu3 %v961_v4 }
 0x164   :  { %989 = vmatpush.msrb.mxu3 %v960_v36 }
 0x169   :  { %1184 = vmatmul.msk.f32.gmra.mxu1 %vm397_vm4, %v1342_v55  ;;  %vm323_vm4 = vcmp.ge.s32.totalorder %v1665_v43, %v301_v8  ;;  %v959_v8 = vld [vmem:[%s2299_s6 + $0x10] sm:$0xff] }
 0x16a   :  { %vm403_vm6 = vmand %vm323_vm4, %vm387_vm5  ;;  %990 = vmatpush.msrb.mxu3 %v959_v8 }
 0x16c   :  { %991 = vmatpush.msrb.mxu3 %v958_v12 }
 0x16e   :  { %992 = vmatpush.msrb.mxu3 %v957_v34 }
 0x171   :  { %1185 = vmatmul.msk.f32.gmra.mxu1 %vm398_vm7, %v1342_v55  ;;  %vm324_vm7 = vcmp.ge.s32.totalorder %v1665_v43, %v304_v60 }
 0x172   :  { %vm404_vm9 = vmand %vm324_vm7, %vm388_vm8 }
 0x179   :  { %1186 = vmatmul.msk.f32.gmra.mxu1 %vm399_vm10, %v1342_v55  ;;  %vm389_vm10 = vcmp.lt.s32.totalorder %v1665_v43, %v371_v10  ;;  %v854_v10 = vpop.permute.xlu0 %853 }
 0x17a   :  { %vm405_vm12 = vmand %vm325_vm11, %vm389_vm10 }
 0x181   :  { %1187 = vmatmul.msk.f32.gmra.mxu1 %vm400_vm13, %v1342_v55  ;;  %vm326_vm13 = vcmp.ge.s32.totalorder %v1665_v43, %v310_v26  ;;  %v799_v43 = vpop.permute.xlu1 %798 }
 0x182   :  { %vm406_vm15 = vmand %vm326_vm13, %vm390_vm14 }
 0x189   :  { %1188 = vmatmul.msk.f32.gmra.mxu1 %vm401_vm0, %v1342_v55  ;;  %v814_v23 = vpop.permute.xlu1 %813 }
 0x191   :  { %1189 = vmatmul.msk.f32.gmra.mxu1 %vm402_vm3, %v1342_v55  ;;  %v829_v62 = vpop.permute.xlu1 %828 }
 0x199   :  { %1190 = vmatmul.msk.f32.gmra.mxu1 %vm403_vm6, %v1342_v55  ;;  %v844_v32 = vpop.permute.xlu1 %843 }
 0x1a1   :  { %1191 = vmatmul.msk.f32.gmra.mxu1 %vm404_vm9, %v1342_v55 }
 0x1a9   :  { %1192 = vmatmul.msk.f32.gmra.mxu1 %vm405_vm12, %v1342_v55 }
 0x1b1   :  { %1193 = vmatmul.msk.f32.gmra.mxu1 %vm406_vm15, %v1342_v55  ;;  %v804_v55 = vpop.permute.xlu2 %803 }
 0x1b6   :  { %v440_v58 = vpop.f32.mrf.mxu1 }
 0x1b7   :  { %v856_v42 = vmul.f32 %v779_v28, %v440_v58  ;;  %v2263_v28 = vld [vmem:[%s2298_s5] ss:$0 sm:$0xff] }
 0x1b9   :  { %908 = vmatmul.f32.vlgmr.msrb.gmra.mxu2 %v856_v42  ;;  %v819_v29 = vpop.permute.xlu2 %818 }
 0x1be   :  { %v443_v7 = vpop.f32.mrf.mxu1 }
 0x1bf   :  { %v857_v9 = vmul.f32 %v784_v6, %v443_v7 }
 0x1c1   :  { %911 = vmatmul.f32.gmra.mxu2 %v857_v9  ;;  %v834_v17 = vpop.permute.xlu2 %833 }
 0x1c6   :  { %v446_v44 = vpop.f32.mrf.mxu1 }
 0x1c7   :  { %v858_v16 = vmul.f32 %v789_v52, %v446_v44 }
 0x1c9   :  { %914 = vmatmul.f32.gmra.mxu2 %v858_v16  ;;  %v849_v60 = vpop.permute.xlu2 %848 }
 0x1ce   :  { %v449_v46 = vpop.f32.mrf.mxu1 }
 0x1cf   :  { %v859_v41 = vmul.f32 %v794_v20, %v449_v46 }
 0x1d1   :  { %917 = vmatmul.f32.gmra.mxu2 %v859_v41 }
 0x1d6   :  { %v452_v19 = vpop.f32.mrf.mxu1 }
 0x1d7   :  { %v860_v24 = vmul.f32 %v799_v43, %v452_v19 }
 0x1d9   :  { %920 = vmatmul.f32.gmra.mxu2 %v860_v24 }
 0x1de   :  { %v455_v48 = vpop.f32.mrf.mxu1 }
 0x1df   :  { %v861_v5 = vmul.f32 %v804_v55, %v455_v48 }
 0x1e1   :  { %923 = vmatmul.f32.gmra.mxu2 %v861_v5 }
 0x1e6   :  { %v458_v53 = vpop.f32.mrf.mxu1 }
 0x1e7   :  { %v862_v18 = vmul.f32 %v809_v14, %v458_v53 }
 0x1e9   :  { %926 = vmatmul.f32.gmra.mxu2 %v862_v18 }
 0x1ee   :  { %v461_v22 = vpop.f32.mrf.mxu1 }
 0x1ef   :  { %v863_v25 = vmul.f32 %v814_v23, %v461_v22  ;;  %v1057_v23 = vld [vmem:[#allocation2 + $0x78] sm:$0xff]  ;;  %v1056_v22 = vld [vmem:[#allocation2 + $0x70] sm:$0xff] }
 0x1f0   :  { %1062 = vmatpush.msrb.mxu0 %v1057_v23 }
 0x1f1   :  { %929 = vmatmul.f32.gmra.mxu2 %v863_v25  ;;  %v1055_v25 = vld [vmem:[#allocation2 + $0x68] sm:$0xff] }
 0x1f2   :  { %1063 = vmatpush.msrb.mxu0 %v1056_v22 }
 0x1f4   :  { %1064 = vmatpush.msrb.mxu0 %v1055_v25 }
 0x1f6   :  { %v464_v30 = vpop.f32.mrf.mxu1 }
 0x1f7   :  { %v864_v13 = vmul.f32 %v819_v29, %v464_v30  ;;  %v1054_v29 = vld [vmem:[#allocation2 + $0x60] sm:$0xff] }
 0x1f8   :  { %1065 = vmatpush.msrb.mxu0 %v1054_v29 }
 0x1f9   :  { %932 = vmatmul.f32.gmra.mxu2 %v864_v13 }
 0x1fe   :  { %v467_v56 = vpop.f32.mrf.mxu1 }
 0x1ff   :  { %v865_v35 = vmul.f32 %v824_v59, %v467_v56  ;;  %v1053_v59 = vld [vmem:[#allocation2 + $0x58] sm:$0xff]  ;;  %v1052_v56 = vld [vmem:[#allocation2 + $0x50] sm:$0xff] }
 0x200   :  { %1066 = vmatpush.msrb.mxu0 %v1053_v59 }
 0x201   :  { %935 = vmatmul.f32.gmra.mxu2 %v865_v35  ;;  %v1051_v35 = vld [vmem:[#allocation2 + $0x48] sm:$0xff] }
 0x202   :  { %1067 = vmatpush.msrb.mxu0 %v1052_v56 }
 0x204   :  { %1068 = vmatpush.msrb.mxu0 %v1051_v35 }
 0x206   :  { %v470_v45 = vpop.f32.mrf.mxu1  ;;  %1069 = vmatpush.msrb.mxu0 %v1050_v31 }
 0x207   :  { %v866_v37 = vmul.f32 %v829_v62, %v470_v45  ;;  %v1048_v62 = vld [vmem:[#allocation2 + $0x30] sm:$0xff]  ;;  %v1047_v45 = vld [vmem:[#allocation2 + $0x28] sm:$0xff] }
 0x208   :  { %1070 = vmatpush.msrb.mxu0 %v1049_v47 }
 0x209   :  { %938 = vmatmul.f32.gmra.mxu2 %v866_v37  ;;  %v1046_v37 = vld [vmem:[#allocation2 + $0x20] sm:$0xff] }
 0x20a   :  { %1071 = vmatpush.msrb.mxu0 %v1048_v62 }
 0x20c   :  { %1072 = vmatpush.msrb.mxu0 %v1047_v45 }
 0x20e   :  { %v473_v54 = vpop.f32.mrf.mxu1  ;;  %1073 = vmatpush.msrb.mxu0 %v1046_v37 }
 0x20f   :  { %v867_v2 = vmul.f32 %v834_v17, %v473_v54  ;;  %v1043_v17 = vld [vmem:[#allocation2 + $0x8] sm:$0xff]  ;;  %v1042_v54 = vld [vmem:[#allocation2] sm:$0xff] }
 0x210   :  { %1074 = vmatpush.msrb.mxu0 %v1045_v49 }
 0x211   :  { %941 = vmatmul.f32.gmra.mxu2 %v867_v2 }
 0x212   :  { %1075 = vmatpush.msrb.mxu0 %v1044_v51 }
 0x214   :  { %1076 = vmatpush.msrb.mxu0 %v1043_v17 }
 0x216   :  { %v476_v1 = vpop.f32.mrf.mxu1  ;;  %1077 = vmatpush.msrb.mxu0 %v1042_v54 }
 0x217   :  { %v868_v11 = vmul.f32 %v839_v27, %v476_v1  ;;  %v1252_v27 = vld [vmem:[%s2300_s7] ss:$0 sm:$0xff] }
 0x219   :  { %944 = vmatmul.f32.gmra.mxu2 %v868_v11 }
 0x21e   :  { %v479_v3 = vpop.f32.mrf.mxu1 }
 0x21f   :  { %v869_v21 = vmul.f32 %v844_v32, %v479_v3 }
 0x221   :  { %947 = vmatmul.f32.gmra.mxu2 %v869_v21 }
 0x226   :  { %v482_v15 = vpop.f32.mrf.mxu1 }
 0x227   :  { %v870_v61 = vmul.f32 %v849_v60, %v482_v15 }
 0x229   :  { %950 = vmatmul.f32.gmra.mxu2 %v870_v61 }
 0x22e   :  { %v485_v26 = vpop.f32.mrf.mxu1 }
 0x22f   :  { %v871_v63 = vmul.f32 %v854_v10, %v485_v26 }
 0x231   :  { %953 = vmatmul.f32.gmra.mxu2 %v871_v63 }
 0x23c   :  { %v909_v58 = vpop.f32.mrf.mxu2 }
 0x23d   :  { %v910_v42 = vadd.f32 %v2263_v28, %v909_v58 }
 0x23f   :  { %993 = vmatmul.f32.vlgmr.msrb.gmra.mxu3 %v910_v42 }
 0x244   :  { %v912_v6 = vpop.f32.mrf.mxu2 }
 0x245   :  { %v913_v7 = vadd.f32 %v2263_v28, %v912_v6 }
 0x247   :  { %996 = vmatmul.f32.gmra.mxu3 %v913_v7 }
 0x24c   :  { %v915_v9 = vpop.f32.mrf.mxu2 }
 0x24d   :  { %v916_v52 = vadd.f32 %v2263_v28, %v915_v9 }
 0x24f   :  { %999 = vmatmul.f32.gmra.mxu3 %v916_v52 }
 0x254   :  { %v918_v44 = vpop.f32.mrf.mxu2 }
 0x255   :  { %v919_v16 = vadd.f32 %v2263_v28, %v918_v44 }
 0x257   :  { %1002 = vmatmul.f32.gmra.mxu3 %v919_v16 }
 0x25c   :  { %v921_v20 = vpop.f32.mrf.mxu2 }
 0x25d   :  { %v922_v46 = vadd.f32 %v2263_v28, %v921_v20 }
 0x25f   :  { %1005 = vmatmul.f32.gmra.mxu3 %v922_v46 }
 0x264   :  { %v924_v41 = vpop.f32.mrf.mxu2 }
 0x265   :  { %v925_v43 = vadd.f32 %v2263_v28, %v924_v41 }
 0x267   :  { %1008 = vmatmul.f32.gmra.mxu3 %v925_v43 }
 0x26c   :  { %v927_v19 = vpop.f32.mrf.mxu2 }
 0x26d   :  { %v928_v24 = vadd.f32 %v2263_v28, %v927_v19 }
 0x26f   :  { %1011 = vmatmul.f32.gmra.mxu3 %v928_v24 }
 0x274   :  { %v930_v55 = vpop.f32.mrf.mxu2 }
 0x275   :  { %v931_v48 = vadd.f32 %v2263_v28, %v930_v55 }
 0x277   :  { %1014 = vmatmul.f32.gmra.mxu3 %v931_v48 }
 0x27c   :  { %v933_v5 = vpop.f32.mrf.mxu2 }
 0x27d   :  { %v934_v14 = vadd.f32 %v2263_v28, %v933_v5 }
 0x27f   :  { %1017 = vmatmul.f32.gmra.mxu3 %v934_v14  ;;  %v1253_v14 = vld [vmem:[%s2302_s9] ss:$0 sm:$0xff]  ;;  %s1343_s9 = smov [#allocation5]  }
 0x280   :  { %s1147_s3 = sshll.u32 %s1343_s9, 4  ;;  %s1148_s3 = int_to_ptr.vmem [resolvable:$true] %s1147_s3 }
 0x284   :  { %v936_v53 = vpop.f32.mrf.mxu2 }
 0x285   :  { %v937_v18 = vadd.f32 %v2263_v28, %v936_v53 }
 0x287   :  { %1020 = vmatmul.f32.gmra.mxu3 %v937_v18 }
 0x28c   :  { %v939_v30 = vpop.f32.mrf.mxu2 }
 0x28d   :  { %v940_v13 = vadd.f32 %v2263_v28, %v939_v30 }
 0x28f   :  { %1023 = vmatmul.f32.gmra.mxu3 %v940_v13 }
 0x294   :  { %v942_v39 = vpop.f32.mrf.mxu2 }
 0x295   :  { %v943_v40 = vadd.f32 %v2263_v28, %v942_v39 }
 0x297   :  { %1026 = vmatmul.f32.gmra.mxu3 %v943_v40 }
 0x29c   :  { %v945_v50 = vpop.f32.mrf.mxu2 }
 0x29d   :  { %v946_v33 = vadd.f32 %v2263_v28, %v945_v50 }
 0x29f   :  { %1029 = vmatmul.f32.gmra.mxu3 %v946_v33 }
 0x2a4   :  { %v948_v2 = vpop.f32.mrf.mxu2 }
 0x2a5   :  { %v949_v57 = vadd.f32 %v2263_v28, %v948_v2 }
 0x2a7   :  { %1032 = vmatmul.f32.gmra.mxu3 %v949_v57 }
 0x2ac   :  { %v951_v38 = vpop.f32.mrf.mxu2 }
 0x2ad   :  { %v952_v0 = vadd.f32 %v2263_v28, %v951_v38 }
 0x2af   :  { %1035 = vmatmul.f32.gmra.mxu3 %v952_v0 }
 0x2b4   :  { %v954_v4 = vpop.f32.mrf.mxu2 }
 0x2b5   :  { %v955_v36 = vadd.f32 %v2263_v28, %v954_v4 }
 0x2b7   :  { %1038 = vmatmul.f32.gmra.mxu3 %v955_v36 }
 0x2c2   :  { %v994_v1 = vpop.f32.mrf.mxu3 }
 0x2c3   :  { %v995_v11 = vadd.f32 %v1252_v27, %v994_v1 }
 0x2c5   :  { %1078 = vmatmul.f32.vlgmr.msrb.gmra.mxu0 %v995_v11 }
 0x2ca   :  { %v997_v8 = vpop.f32.mrf.mxu3 }
 0x2cb   :  { %v998_v12 = vadd.f32 %v1252_v27, %v997_v8 }
 0x2cd   :  { %1081 = vmatmul.f32.gmra.mxu0 %v998_v12 }
 0x2d2   :  { %v1000_v34 = vpop.f32.mrf.mxu3 }
 0x2d3   :  { %v1001_v32 = vadd.f32 %v1252_v27, %v1000_v34 }
 0x2d5   :  { %1084 = vmatmul.f32.gmra.mxu0 %v1001_v32 }
 0x2da   :  { %v1003_v3 = vpop.f32.mrf.mxu3 }
 0x2db   :  { %v1004_v21 = vadd.f32 %v1252_v27, %v1003_v3 }
 0x2dd   :  { %1087 = vmatmul.f32.gmra.mxu0 %v1004_v21 }
 0x2e2   :  { %v1006_v60 = vpop.f32.mrf.mxu3 }
 0x2e3   :  { %v1007_v15 = vadd.f32 %v1252_v27, %v1006_v60 }
 0x2e5   :  { %1090 = vmatmul.f32.gmra.mxu0 %v1007_v15 }
 0x2ea   :  { %v1009_v61 = vpop.f32.mrf.mxu3 }
 0x2eb   :  { %v1010_v10 = vadd.f32 %v1252_v27, %v1009_v61 }
 0x2ed   :  { %1093 = vmatmul.f32.gmra.mxu0 %v1010_v10 }
 0x2f2   :  { %v1012_v26 = vpop.f32.mrf.mxu3 }
 0x2f3   :  { %v1013_v63 = vadd.f32 %v1252_v27, %v1012_v26 }
 0x2f5   :  { %1096 = vmatmul.f32.gmra.mxu0 %v1013_v63 }
 0x2fa   :  { %v1015_v28 = vpop.f32.mrf.mxu3 }
 0x2fb   :  { %v1016_v58 = vadd.f32 %v1252_v27, %v1015_v28 }
 0x2fd   :  { %1099 = vmatmul.f32.gmra.mxu0 %v1016_v58 }
 0x302   :  { %v1018_v42 = vpop.f32.mrf.mxu3 }
 0x303   :  { %v1019_v6 = vadd.f32 %v1252_v27, %v1018_v42 }
 0x305   :  { %1102 = vmatmul.f32.gmra.mxu0 %v1019_v6 }
 0x30a   :  { %v1021_v7 = vpop.f32.mrf.mxu3 }
 0x30b   :  { %v1022_v9 = vadd.f32 %v1252_v27, %v1021_v7 }
 0x30d   :  { %1105 = vmatmul.f32.gmra.mxu0 %v1022_v9 }
 0x312   :  { %v1024_v52 = vpop.f32.mrf.mxu3 }
 0x313   :  { %v1025_v44 = vadd.f32 %v1252_v27, %v1024_v52 }
 0x315   :  { %1108 = vmatmul.f32.gmra.mxu0 %v1025_v44 }
 0x31a   :  { %v1027_v16 = vpop.f32.mrf.mxu3 }
 0x31b   :  { %v1028_v20 = vadd.f32 %v1252_v27, %v1027_v16 }
 0x31d   :  { %1111 = vmatmul.f32.gmra.mxu0 %v1028_v20 }
 0x322   :  { %v1030_v46 = vpop.f32.mrf.mxu3 }
 0x323   :  { %v1031_v41 = vadd.f32 %v1252_v27, %v1030_v46 }
 0x325   :  { %1114 = vmatmul.f32.gmra.mxu0 %v1031_v41 }
 0x32a   :  { %v1033_v43 = vpop.f32.mrf.mxu3 }
 0x32b   :  { %v1034_v19 = vadd.f32 %v1252_v27, %v1033_v43 }
 0x32d   :  { %1117 = vmatmul.f32.gmra.mxu0 %v1034_v19 }
 0x332   :  { %v1036_v24 = vpop.f32.mrf.mxu3 }
 0x333   :  { %v1037_v55 = vadd.f32 %v1252_v27, %v1036_v24 }
 0x335   :  { %1120 = vmatmul.f32.gmra.mxu0 %v1037_v55 }
 0x33a   :  { %v1039_v48 = vpop.f32.mrf.mxu3 }
 0x33b   :  { %v1040_v5 = vadd.f32 %v1252_v27, %v1039_v48 }
 0x33d   :  { %1123 = vmatmul.f32.gmra.mxu0 %v1040_v5 }
 0x342   :  { %v1079_v53 = vpop.f32.mrf.mxu0 }
 0x343   :  { %v1080_v18 = vadd.f32 %v1253_v14, %v1079_v53 }
 0x345   :  { %1127 = vst [vmem:[#allocation5] sm:$0xff] %v1080_v18 }
 0x34a   :  { %v1082_v23 = vpop.f32.mrf.mxu0 }
 0x34b   :  { %v1083_v22 = vadd.f32 %v1253_v14, %v1082_v23 }
 0x34d   :  { %1128 = vst [vmem:[#allocation5 + $0x8] sm:$0xff] %v1083_v22 }
 0x352   :  { %v1085_v25 = vpop.f32.mrf.mxu0 }
 0x353   :  { %v1086_v29 = vadd.f32 %v1253_v14, %v1085_v25 }
 0x355   :  { %1129 = vst [vmem:[#allocation5 + $0x10] sm:$0xff] %v1086_v29 }
 0x35a   :  { %v1088_v30 = vpop.f32.mrf.mxu0 }
 0x35b   :  { %v1089_v13 = vadd.f32 %v1253_v14, %v1088_v30 }
 0x35d   :  { %1130 = vst [vmem:[#allocation5 + $0x18] sm:$0xff] %v1089_v13 }
 0x362   :  { %v1091_v59 = vpop.f32.mrf.mxu0 }
 0x363   :  { %v1092_v56 = vadd.f32 %v1253_v14, %v1091_v59 }
 0x365   :  { %1131 = vst [vmem:[#allocation5 + $0x20] sm:$0xff] %v1092_v56 }
 0x36a   :  { %v1094_v35 = vpop.f32.mrf.mxu0 }
 0x36b   :  { %v1095_v31 = vadd.f32 %v1253_v14, %v1094_v35 }
 0x36d   :  { %1132 = vst [vmem:[#allocation5 + $0x28] sm:$0xff] %v1095_v31 }
 0x372   :  { %v1097_v39 = vpop.f32.mrf.mxu0 }
 0x373   :  { %v1098_v40 = vadd.f32 %v1253_v14, %v1097_v39 }
 0x375   :  { %1133 = vst [vmem:[#allocation5 + $0x30] sm:$0xff] %v1098_v40 }
 0x37a   :  { %v1100_v47 = vpop.f32.mrf.mxu0 }
 0x37b   :  { %v1101_v62 = vadd.f32 %v1253_v14, %v1100_v47 }
 0x37d   :  { %1134 = vst [vmem:[#allocation5 + $0x38] sm:$0xff] %v1101_v62 }
 0x382   :  { %v1103_v45 = vpop.f32.mrf.mxu0 }
 0x383   :  { %v1104_v37 = vadd.f32 %v1253_v14, %v1103_v45 }
 0x385   :  { %1135 = vst [vmem:[#allocation5 + $0x40] sm:$0xff] %v1104_v37 }
 0x38a   :  { %v1106_v49 = vpop.f32.mrf.mxu0 }
 0x38b   :  { %v1107_v50 = vadd.f32 %v1253_v14, %v1106_v49 }
 0x38d   :  { %1136 = vst [vmem:[#allocation5 + $0x48] sm:$0xff] %v1107_v50 }
 0x392   :  { %v1109_v33 = vpop.f32.mrf.mxu0 }
 0x393   :  { %v1110_v51 = vadd.f32 %v1253_v14, %v1109_v33 }
 0x395   :  { %1137 = vst [vmem:[#allocation5 + $0x50] sm:$0xff] %v1110_v51 }
 0x39a   :  { %v1112_v17 = vpop.f32.mrf.mxu0 }
 0x39b   :  { %v1113_v54 = vadd.f32 %v1253_v14, %v1112_v17 }
 0x39d   :  { %1138 = vst [vmem:[#allocation5 + $0x58] sm:$0xff] %v1113_v54 }
 0x3a2   :  { %v1115_v2 = vpop.f32.mrf.mxu0 }
 0x3a3   :  { %v1116_v57 = vadd.f32 %v1253_v14, %v1115_v2 }
 0x3a5   :  { %1139 = vst [vmem:[#allocation5 + $0x60] sm:$0xff] %v1116_v57 }
 0x3aa   :  { %v1118_v38 = vpop.f32.mrf.mxu0 }
 0x3ab   :  { %v1119_v0 = vadd.f32 %v1253_v14, %v1118_v38 }
 0x3ad   :  { %1140 = vst [vmem:[#allocation5 + $0x68] sm:$0xff] %v1119_v0 }
 0x3b2   :  { %v1121_v4 = vpop.f32.mrf.mxu0 }
 0x3b3   :  { %v1122_v36 = vadd.f32 %v1253_v14, %v1121_v4 }
 0x3b5   :  { %1141 = vst [vmem:[#allocation5 + $0x70] sm:$0xff] %v1122_v36 }
 0x3ba   :  { %v1124_v27 = vpop.f32.mrf.mxu0 }
 0x3bb   :  { %v1125_v1 = vadd.f32 %v1253_v14, %v1124_v27 }
 0x3bd   :  { %1142 = vst [vmem:[#allocation5 + $0x78] sm:$0xff] %v1125_v1 }
 0x3be   :  { %1155 = dma.vmem_to_hbm [thread:$0]  %s1148_s3, 2048, %s1150_s25, [#allocation4], %s1339_s18, %s1339_s18, %s1340_s19  }
 0x3bf   :  { %1336 = dma.done.wait [#allocation4], 2048  }
 0x3c0   :  { %1337 = vsyncadd [#allocation4], 4294965248 }
 0x3c1   :  { %1160 = vsyncpa [#allocation3], 1 }
 0x3c2   :  { %1161 = vsyncpa [#allocation4], 1 }

</bundles_post_ra>
